<compile_context>
chip_gen: v5e
topology: v5e:2x2
jax: 0.10.0
libtpu: 0.0.40
codegen_flags: <defaults>
</compile_context>

<pallas_src>
import functools

import jax
import jax.numpy as jnp
from jax.experimental import pallas as pl
from jax.experimental.pallas import tpu as pltpu


def _fused_kernel(x_ref, w1_ref, b1_ref, w2_ref, b2_ref, o_ref):
    """One pixel tile: fused (seg + prior) MLP, sigmoid, lane-ordered output."""
    x = x_ref[...]                                                    # (tm, C_in)

    # Layer 1 (both branches at once): (tm, C_in) @ (C_in, 2H) -> (tm, 2H)
    h = jnp.dot(x, w1_ref[...], preferred_element_type=jnp.float32)
    h = jnp.maximum(h + b1_ref[...], 0.0)                             # f32 ReLU

    # Layer 2 (block-diagonal): (tm, 2H) @ (2H, 2*C_out) -> (tm, 2*C_out)
    # Columns [:C_out] only see the seg half of h, columns [C_out:] only the
    # prior half, so the result is exactly torch.cat([seg, prior], dim=-1).
    z = jnp.dot(h.astype(w2_ref.dtype), w2_ref[...],
                preferred_element_type=jnp.float32)
    o_ref[...] = jax.nn.sigmoid(z + b2_ref[...]).astype(o_ref.dtype)


@functools.partial(jax.jit, static_argnames=("tile_m",))
def combined_segmentation_forward(x, seg_params, prior_params, *, tile_m=1024):
    """Forward pass of the combined segmentation module.

    x: (B, H*W, C_in), PIXEL input mode (f32 or bf16).
    Returns: (B, H*W, 2*C_out), dtype of x -- [seg | prior] on channels.
    """
    B, N, C_in = x.shape
    sw1, sb1, sw2, sb2 = seg_params
    pw1, pb1, pw2, pb2 = prior_params
    hidden = sw1.shape[1]
    C_out = sw2.shape[1]

    io_dtype = x.dtype                       # matmul-operand / output dtype
    acc_dtype = jnp.float32                  # bias-add / sigmoid stay in f32

    # ---- host-side weight fusion (tiny arrays, done once per trace) ----
    w1_cat = jnp.concatenate([sw1, pw1], axis=1).astype(io_dtype)      # (C_in, 2H)
    b1_cat = jnp.concatenate([sb1, pb1], axis=1).astype(acc_dtype)     # (1, 2H)
    w2_blk = jnp.zeros((2 * hidden, 2 * C_out), io_dtype)
    w2_blk = w2_blk.at[:hidden, :C_out].set(sw2.astype(io_dtype))
    w2_blk = w2_blk.at[hidden:, C_out:].set(pw2.astype(io_dtype))      # (2H, 2C)
    b2_cat = jnp.concatenate([sb2, pb2], axis=1).astype(acc_dtype)     # (1, 2C)

    # ---- flatten pixels, pad rows to a tile multiple (no divisibility req) ----
    rows = B * N
    n_tiles = pl.cdiv(rows, tile_m)
    rows_padded = n_tiles * tile_m
    x_flat = x.reshape(rows, C_in)
    if rows_padded != rows:
        x_flat = jnp.pad(x_flat, ((0, rows_padded - rows), (0, 0)))

    full = lambda arr: pl.BlockSpec(arr.shape, lambda i: (0, 0))

    out_flat = pl.pallas_call(
        _fused_kernel,
        out_shape=jax.ShapeDtypeStruct((rows_padded, 2 * C_out), io_dtype),
        grid_spec=pltpu.PrefetchScalarGridSpec(
            num_scalar_prefetch=0,
            grid=(n_tiles,),
            in_specs=[
                pl.BlockSpec((tile_m, C_in), lambda i: (i, 0)),   # x tile
                full(w1_cat), full(b1_cat),                       # fused layer 1
                full(w2_blk), full(b2_cat),                       # fused layer 2
            ],
            out_specs=pl.BlockSpec((tile_m, 2 * C_out), lambda i: (i, 0)),
        ),
        compiler_params=pltpu.CompilerParams(
            dimension_semantics=("parallel",)),                   # megacore on v7x
    )(x_flat, w1_cat, b1_cat, w2_blk, b2_cat)

    out_flat = out_flat[:rows]
    return out_flat.reshape(B, N, 2 * C_out)


def _init_mlp_params(key, c_in, hidden, c_out):
    """Deterministic 2-layer MLP parameters (biases kept 2D for TPU layout)."""
    k1, k2 = jax.random.split(key)
    w1 = jax.random.normal(k1, (c_in, hidden), jnp.float32) * 0.1
    b1 = jnp.zeros((1, hidden), jnp.float32)
    w2 = jax.random.normal(k2, (hidden, c_out), jnp.float32) * 0.1
    b2 = jnp.zeros((1, c_out), jnp.float32)
    return (w1, b1, w2, b2)


def _reference_forward(x, seg_params, prior_params):
    """Pure-JAX f32 reference of the same forward pass."""
    def mlp(xp, p):
        w1, b1, w2, b2 = p
        h = jnp.maximum(xp @ w1 + b1, 0.0)
        return jax.nn.sigmoid(h @ w2 + b2)
    seg = mlp(x, seg_params)
    pri = mlp(x, prior_params)
    return jnp.concatenate([seg, pri], axis=-1)


if __name__ == "__main__":
    B, H, W, C_in = 2, 16, 16, 4
    hidden, C_out = 32, 4

    key = jax.random.PRNGKey(0)
    kx, kseg, kpri = jax.random.split(key, 3)

    # PIXEL input mode: (B, H*W, C_in)
    x = jax.random.normal(kx, (B, H * W, C_in), jnp.float32)
    seg_params = _init_mlp_params(kseg, C_in, hidden, C_out)
    prior_params = _init_mlp_params(kpri, C_in, hidden, C_out)

    ref = _reference_forward(x, seg_params, prior_params)

    # --- f32 path (default) ---
    out = combined_segmentation_forward(x, seg_params, prior_params)
    out = jax.block_until_ready(out)
    assert out.shape == (B, H * W, 2 * C_out), out.shape
    assert jnp.allclose(out, ref, atol=1e-4), "f32 mismatch vs reference"

    # --- ragged-rows path (B*H*W not a multiple of tile_m): pad + slice ---
    x_ragged = x[:, :100, :]                                   # rows = 200
    out_ragged = combined_segmentation_forward(x_ragged, seg_params, prior_params)
    out_ragged = jax.block_until_ready(out_ragged)
    assert out_ragged.shape == (B, 100, 2 * C_out), out_ragged.shape
    assert jnp.allclose(out_ragged, ref[:, :100, :], atol=1e-4), "ragged mismatch"

    # --- bf16 I/O path (halves HBM traffic on bf16-native generations) ---
    out_bf16 = combined_segmentation_forward(
        x.astype(jnp.bfloat16), seg_params, prior_params)
    out_bf16 = jax.block_until_ready(out_bf16)
    assert out_bf16.dtype == jnp.bfloat16
    assert jnp.allclose(out_bf16.astype(jnp.float32), ref, atol=2e-2), \
        "bf16 mismatch vs reference"

    print("KERNEL_OK")
</pallas_src>

<mosaic_0001>
module attributes {stable_mosaic.version = 11 : i64} {
  func.func @_fused_kernel(%arg0: i32, %arg1: memref<1024x4xf32, #tpu.memory_space<vmem>>, %arg2: memref<4x64xf32, #tpu.memory_space<vmem>>, %arg3: memref<1x64xf32, #tpu.memory_space<vmem>>, %arg4: memref<64x8xf32, #tpu.memory_space<vmem>>, %arg5: memref<1x8xf32, #tpu.memory_space<vmem>>, %arg6: memref<1024x8xf32, #tpu.memory_space<vmem>>) attributes {dimension_semantics = [#tpu.dimension_semantics<parallel>], iteration_bounds = array<i64: 1>, scalar_prefetch = 0 : i64, scratch_operands = 0 : i64, tpu.core_type = #tpu.core_type<tc>, window_params = [{transform_indices = @transform_0, window_bounds = array<i64: 1024, 4>}, {pipeline_mode = #tpu.pipeline_mode<synchronous>, transform_indices = @transform_1, window_bounds = array<i64: 4, 64>}, {pipeline_mode = #tpu.pipeline_mode<synchronous>, transform_indices = @transform_2, window_bounds = array<i64: 1, 64>}, {pipeline_mode = #tpu.pipeline_mode<synchronous>, transform_indices = @transform_3, window_bounds = array<i64: 64, 8>}, {pipeline_mode = #tpu.pipeline_mode<synchronous>, transform_indices = @transform_4, window_bounds = array<i64: 1, 8>}, {transform_indices = @transform_5, window_bounds = array<i64: 1024, 8>}]} {
    %c0 = arith.constant 0 : index
    %c0_0 = arith.constant 0 : index
    %0 = vector.load %arg1[%c0, %c0_0] : memref<1024x4xf32, #tpu.memory_space<vmem>>, vector<1024x4xf32>
    %c0_1 = arith.constant 0 : index
    %c0_2 = arith.constant 0 : index
    %1 = vector.load %arg2[%c0_1, %c0_2] : memref<4x64xf32, #tpu.memory_space<vmem>>, vector<4x64xf32>
    %cst = arith.constant dense<0.000000e+00> : vector<1024x64xf32>
    %2 = tpu.matmul %0, %1, %cst {dimension_numbers = #tpu.dot_dimension_numbers<[1], [0], [0], [1], [0, 0, 1, 1], [], []>} : vector<1024x4xf32>, vector<4x64xf32>, vector<1024x64xf32> -> vector<1024x64xf32>
    %c0_3 = arith.constant 0 : index
    %c0_4 = arith.constant 0 : index
    %3 = vector.load %arg3[%c0_3, %c0_4] : memref<1x64xf32, #tpu.memory_space<vmem>>, vector<1x64xf32>
    %4 = vector.broadcast %3 : vector<1x64xf32> to vector<1024x64xf32>
    %5 = arith.addf %2, %4 : vector<1024x64xf32>
    %cst_5 = arith.constant 0.000000e+00 : f32
    %6 = vector.broadcast %cst_5 : f32 to vector<1024x64xf32>
    %7 = arith.maximumf %5, %6 : vector<1024x64xf32>
    %c0_6 = arith.constant 0 : index
    %c0_7 = arith.constant 0 : index
    %8 = vector.load %arg4[%c0_6, %c0_7] : memref<64x8xf32, #tpu.memory_space<vmem>>, vector<64x8xf32>
    %cst_8 = arith.constant dense<0.000000e+00> : vector<1024x8xf32>
    %9 = tpu.matmul %7, %8, %cst_8 {dimension_numbers = #tpu.dot_dimension_numbers<[1], [0], [0], [1], [0, 0, 1, 1], [], []>} : vector<1024x64xf32>, vector<64x8xf32>, vector<1024x8xf32> -> vector<1024x8xf32>
    %c0_9 = arith.constant 0 : index
    %c0_10 = arith.constant 0 : index
    %10 = vector.load %arg5[%c0_9, %c0_10] : memref<1x8xf32, #tpu.memory_space<vmem>>, vector<1x8xf32>
    %11 = vector.broadcast %10 : vector<1x8xf32> to vector<1024x8xf32>
    %12 = arith.addf %9, %11 : vector<1024x8xf32>
    %13 = arith.negf %12 : vector<1024x8xf32>
    %14 = math.exp %13 : vector<1024x8xf32>
    %cst_11 = arith.constant 1.000000e+00 : f32
    %15 = vector.broadcast %cst_11 : f32 to vector<1024x8xf32>
    %16 = arith.addf %15, %14 : vector<1024x8xf32>
    %17 = arith.divf %15, %16 : vector<1024x8xf32>
    %c0_12 = arith.constant 0 : index
    %c0_13 = arith.constant 0 : index
    %18 = vector.load %arg6[%c0_12, %c0_13] : memref<1024x8xf32, #tpu.memory_space<vmem>>, vector<1024x8xf32>
    tpu.vector_store %arg6[%c0_12, %c0_13], %17 {strides = array<i32>} : memref<1024x8xf32, #tpu.memory_space<vmem>>, vector<1024x8xf32>,
    return
  }
  func.func @transform_0(%arg0: i32) -> (i32, i32) {
    %c0_i32 = arith.constant 0 : i32
    %c0_i32_0 = arith.constant 0 : i32
    return %arg0, %c0_i32 : i32, i32
  }
  func.func @transform_1(%arg0: i32) -> (i32, i32) {
    %c0_i32 = arith.constant 0 : i32
    %c0_i32_0 = arith.constant 0 : i32
    %c0_i32_1 = arith.constant 0 : i32
    return %c0_i32, %c0_i32_0 : i32, i32
  }
  func.func @transform_2(%arg0: i32) -> (i32, i32) {
    %c0_i32 = arith.constant 0 : i32
    %c0_i32_0 = arith.constant 0 : i32
    %c0_i32_1 = arith.constant 0 : i32
    return %c0_i32, %c0_i32_0 : i32, i32
  }
  func.func @transform_3(%arg0: i32) -> (i32, i32) {
    %c0_i32 = arith.constant 0 : i32
    %c0_i32_0 = arith.constant 0 : i32
    %c0_i32_1 = arith.constant 0 : i32
    return %c0_i32, %c0_i32_0 : i32, i32
  }
  func.func @transform_4(%arg0: i32) -> (i32, i32) {
    %c0_i32 = arith.constant 0 : i32
    %c0_i32_0 = arith.constant 0 : i32
    %c0_i32_1 = arith.constant 0 : i32
    return %c0_i32, %c0_i32_0 : i32, i32
  }
  func.func @transform_5(%arg0: i32) -> (i32, i32) {
    %c0_i32 = arith.constant 0 : i32
    %c0_i32_0 = arith.constant 0 : i32
    return %arg0, %c0_i32 : i32, i32
  }
}

</mosaic_0001>

<bundles_post_ra>
// kernel: combined_segmentation_forward.1
= control target key start
LH: loop header
LB: loop body
LE: loop exit
PB: predicated region body
PF: predicated region fallthrough
CT: control target
= control target key end

     0   :  { %vm538_vm0 = vcmask 1043456   ;;  %vm153_vm1 = vcmask 31744   ;;  %vm1083_vm2 = vcmask 523264   ;;  %vm4301_vm6 = vcmask 64512   ;;  %s7129_s1 = inlined_call_operand.vmem [shape: f32[4,64], index: 1, kind: input, shape index: {}]   ;;  %s7130_s0 = inlined_call_operand.vmem [shape: f32[1024,4], index: 0, kind: input, shape index: {}]   ;;  %s7131_s2 = inlined_call_operand.vmem [shape: f32[1,64], index: 2, kind: input, shape index: {}]   ;;  %s7132_s3 = inlined_call_operand.vmem [shape: f32[64,8], index: 3, kind: input, shape index: {}]   ;;  %s7133_s4 = inlined_call_operand.vmem [shape: f32[1,8], index: 4, kind: input, shape index: {}]   ;;  %s7134_s5 = inlined_call_operand.vmem [shape: f32[1024,8], index: 5, kind: output, shape index: {}]  }
   0x1   :  { %v148_v0 = vld [vmem:[%s7129_s1] sm:$0xf]  ;;  %v21_v2 = vld [vmem:[%s7130_s0 + $0x8] sm:$0xff]  ;;  %v22_v3 = vld [vmem:[%s7130_s0 + $0x10] sm:$0xff] }
   0x2   :  { %v20_v1 = vld [vmem:[%s7130_s0] sm:$0xff]  ;;  %4434 = vmatpush.msk.msra.mxu0 %vm538_vm0, %v148_v0  ;;  %4819 = vmatpush.msk.msra.mxu3 %vm538_vm0, %v148_v0  ;;  %v23_v4 = vld [vmem:[%s7130_s0 + $0x18] sm:$0xff]  ;;  %v25_v6 = vld [vmem:[%s7130_s0 + $0x28] sm:$0xff] }
   0x3   :  { %4435 = vmatmul.msk.f32.vlgmr.msra.gmra.mxu0 %vm153_vm1, %v20_v1  ;;  %v24_v5 = vld [vmem:[%s7130_s0 + $0x20] sm:$0xff]  ;;  %v26_v7 = vld [vmem:[%s7130_s0 + $0x30] sm:$0xff]  ;;  %v27_v8 = vld [vmem:[%s7130_s0 + $0x38] sm:$0xff] }
   0x4   :  { %v28_v9 = vld [vmem:[%s7130_s0 + $0x40] sm:$0xff]  ;;  %v29_v10 = vld [vmem:[%s7130_s0 + $0x48] sm:$0xff]  ;;  %v30_v11 = vld [vmem:[%s7130_s0 + $0x50] sm:$0xff] }
   0x5   :  { %v1078_v12 = vld [vmem:[%s7132_s3 + $0x38] sm:$0xff]  ;;  %v1077_v13 = vld [vmem:[%s7132_s3 + $0x30] sm:$0xff]  ;;  %v1076_v14 = vld [vmem:[%s7132_s3 + $0x28] sm:$0xff] }
   0x6   :  { %1476 = vmatpush.msra.mxu1 %v1078_v12  ;;  %4820 = vmatpush.msra.mxu2 %v1078_v12  ;;  %v31_v15 = vld [vmem:[%s7130_s0 + $0x58] sm:$0xff]  ;;  %v1075_v16 = vld [vmem:[%s7132_s3 + $0x20] sm:$0xff]  ;;  %v1073_v18 = vld [vmem:[%s7132_s3 + $0x10] sm:$0xff] }
   0x7   :  { %4821 = vmatpush.msrb.mxu3 %v1078_v12  ;;  %v1074_v17 = vld [vmem:[%s7132_s3 + $0x18] sm:$0xff]  ;;  %v32_v19 = vld [vmem:[%s7130_s0 + $0x60] sm:$0xff]  ;;  %v1072_v20 = vld [vmem:[%s7132_s3 + $0x8] sm:$0xff] }
   0x8   :  { %1477 = vmatpush.msra.mxu1 %v1077_v13  ;;  %4822 = vmatpush.msra.mxu2 %v1077_v13  ;;  %v1071_v21 = vld [vmem:[%s7132_s3] sm:$0xff]  ;;  %v33_v22 = vld [vmem:[%s7130_s0 + $0x68] sm:$0xff]  ;;  %v34_v23 = vld [vmem:[%s7130_s0 + $0x70] sm:$0xff] }
   0x9   :  { %4823 = vmatpush.msrb.mxu3 %v1077_v13  ;;  %v35_v24 = vld [vmem:[%s7130_s0 + $0x78] sm:$0xff]  ;;  %v5485_v25 = vld [vmem:[%s7131_s2] ss:$0 sm:$0xff]  ;;  %v37_v31 = vld [vmem:[%s7130_s0 + $0x88] sm:$0xff] }
   0xa   :  { %1478 = vmatpush.msra.mxu1 %v1076_v14  ;;  %4824 = vmatpush.msra.mxu2 %v1076_v14  ;;  %v36_v27 = vld [vmem:[%s7130_s0 + $0x80] sm:$0xff]  ;;  %v38_v35 = vld [vmem:[%s7130_s0 + $0x90] sm:$0xff]  ;;  %v39_v39 = vld [vmem:[%s7130_s0 + $0x98] sm:$0xff] }
   0xb   :  { %4436 = vmatmul.msk.f32.gmra.mxu0 %vm153_vm1, %v21_v2  ;;  %4825 = vmatpush.msrb.mxu3 %v1076_v14  ;;  %v40_v43 = vld [vmem:[%s7130_s0 + $0xa0] sm:$0xff]  ;;  %v41_v47 = vld [vmem:[%s7130_s0 + $0xa8] sm:$0xff]  ;;  %v42_v51 = vld [vmem:[%s7130_s0 + $0xb0] sm:$0xff] }
   0xc   :  { %1479 = vmatpush.msra.mxu1 %v1075_v16  ;;  %4826 = vmatpush.msra.mxu2 %v1075_v16  ;;  %v43_v55 = vld [vmem:[%s7130_s0 + $0xb8] sm:$0xff]  ;;  %v44_v59 = vld [vmem:[%s7130_s0 + $0xc0] sm:$0xff]  ;;  %v45_v63 = vld [vmem:[%s7130_s0 + $0xc8] sm:$0xff] }
   0xd   :  { %4827 = vmatpush.msrb.mxu3 %v1075_v16 }
   0xe   :  { %1480 = vmatpush.msra.mxu1 %v1074_v17  ;;  %4828 = vmatpush.msra.mxu2 %v1074_v17 }
   0xf   :  { %4829 = vmatpush.msrb.mxu3 %v1074_v17 }
  0x10   :  { %1481 = vmatpush.msra.mxu1 %v1073_v18  ;;  %4830 = vmatpush.msra.mxu2 %v1073_v18 }
  0x11   :  { %4831 = vmatpush.msrb.mxu3 %v1073_v18 }
  0x12   :  { %1482 = vmatpush.msra.mxu1 %v1072_v20  ;;  %4832 = vmatpush.msra.mxu2 %v1072_v20 }
  0x13   :  { %4437 = vmatmul.msk.f32.gmra.mxu0 %vm153_vm1, %v22_v3  ;;  %4833 = vmatpush.msrb.mxu3 %v1072_v20  ;;  %v46_v3 = vld [vmem:[%s7130_s0 + $0xd0] sm:$0xff] }
  0x14   :  { %1483 = vmatpush.msra.mxu1 %v1071_v21  ;;  %4834 = vmatpush.msra.mxu2 %v1071_v21 }
  0x15   :  { %4835 = vmatpush.msrb.mxu3 %v1071_v21 }
  0x1b   :  { %4438 = vmatmul.msk.f32.gmra.mxu0 %vm153_vm1, %v23_v4 }
  0x23   :  { %4439 = vmatmul.msk.f32.gmra.mxu0 %vm153_vm1, %v24_v5 }
  0x2b   :  { %4440 = vmatmul.msk.f32.gmra.mxu0 %vm153_vm1, %v25_v6 }
  0x33   :  { %4441 = vmatmul.msk.f32.gmra.mxu0 %vm153_vm1, %v26_v7  ;;  %v47_v7 = vld [vmem:[%s7130_s0 + $0xd8] sm:$0xff] }
  0x3b   :  { %4442 = vmatmul.msk.f32.gmra.mxu0 %vm153_vm1, %v27_v8 }
  0x43   :  { %4443 = vmatmul.msk.f32.gmra.mxu0 %vm153_vm1, %v28_v9 }
  0x4b   :  { %4444 = vmatmul.msk.f32.gmra.mxu0 %vm153_vm1, %v29_v10 }
  0x53   :  { %4445 = vmatmul.msk.f32.gmra.mxu0 %vm153_vm1, %v30_v11  ;;  %v48_v11 = vld [vmem:[%s7130_s0 + $0xe0] sm:$0xff] }
  0x5b   :  { %4446 = vmatmul.msk.f32.gmra.mxu0 %vm153_vm1, %v31_v15  ;;  %v49_v15 = vld [vmem:[%s7130_s0 + $0xe8] sm:$0xff] }
  0x63   :  { %4447 = vmatmul.msk.f32.gmra.mxu0 %vm153_vm1, %v32_v19  ;;  %v50_v19 = vld [vmem:[%s7130_s0 + $0xf0] sm:$0xff] }
  0x6b   :  { %4448 = vmatmul.msk.f32.gmra.mxu0 %vm153_vm1, %v33_v22 }
  0x73   :  { %4449 = vmatmul.msk.f32.gmra.mxu0 %vm153_vm1, %v34_v23  ;;  %v51_v23 = vld [vmem:[%s7130_s0 + $0xf8] sm:$0xff] }
  0x7b   :  { %4450 = vmatmul.msk.f32.gmra.mxu0 %vm153_vm1, %v35_v24 }
  0x80   :  { %v559_v26 = vpop.f32.mrf.mxu0 }
  0x81   :  { %v560_v28 = vadd.f32 %v5485_v25, %v559_v26 }
  0x83   :  { %v943_v29 = vmax.f32 %v560_v28, 0.0  ;;  %4451 = vmatmul.msk.f32.gmra.mxu0 %vm153_vm1, %v36_v27  ;;  %v5586_v27 = vld [vmem:[%s7133_s4] ss:$0 sm:$0xff] }
  0x85   :  { %4563 = vmatmul.msk.f32.vlgmr.msra.gmra.mxu1 %vm1083_vm2, %v943_v29  ;;  %v52_v29 = vld [vmem:[%s7130_s0 + $0x100] sm:$0xff] }
  0x88   :  { %v562_v30 = vpop.f32.mrf.mxu0 }
  0x89   :  { %v563_v32 = vadd.f32 %v5485_v25, %v562_v30 }
  0x8b   :  { %v944_v33 = vmax.f32 %v563_v32, 0.0  ;;  %4452 = vmatmul.msk.f32.gmra.mxu0 %vm153_vm1, %v37_v31 }
  0x8d   :  { %4564 = vmatmul.msk.f32.gmra.mxu1 %vm1083_vm2, %v944_v33 }
  0x90   :  { %v565_v34 = vpop.f32.mrf.mxu0 }
  0x91   :  { %v566_v36 = vadd.f32 %v5485_v25, %v565_v34 }
  0x93   :  { %v945_v37 = vmax.f32 %v566_v36, 0.0  ;;  %4453 = vmatmul.msk.f32.gmra.mxu0 %vm153_vm1, %v38_v35  ;;  %v53_v36 = vld [vmem:[%s7130_s0 + $0x108] sm:$0xff] }
  0x95   :  { %4565 = vmatmul.msk.f32.gmra.mxu1 %vm1083_vm2, %v945_v37 }
  0x98   :  { %v568_v38 = vpop.f32.mrf.mxu0 }
  0x99   :  { %v569_v40 = vadd.f32 %v5485_v25, %v568_v38 }
  0x9b   :  { %v946_v41 = vmax.f32 %v569_v40, 0.0  ;;  %4454 = vmatmul.msk.f32.gmra.mxu0 %vm153_vm1, %v39_v39 }
  0x9d   :  { %4566 = vmatmul.msk.f32.gmra.mxu1 %vm1083_vm2, %v946_v41 }
  0xa0   :  { %v571_v42 = vpop.f32.mrf.mxu0 }
  0xa1   :  { %v572_v44 = vadd.f32 %v5485_v25, %v571_v42 }
  0xa3   :  { %v947_v45 = vmax.f32 %v572_v44, 0.0  ;;  %4455 = vmatmul.msk.f32.gmra.mxu0 %vm153_vm1, %v40_v43 }
  0xa5   :  { %4567 = vmatmul.msk.f32.gmra.mxu1 %vm1083_vm2, %v947_v45  ;;  %v54_v45 = vld [vmem:[%s7130_s0 + $0x110] sm:$0xff] }
  0xa8   :  { %v574_v46 = vpop.f32.mrf.mxu0 }
  0xa9   :  { %v575_v48 = vadd.f32 %v5485_v25, %v574_v46 }
  0xab   :  { %v948_v49 = vmax.f32 %v575_v48, 0.0  ;;  %4456 = vmatmul.msk.f32.gmra.mxu0 %vm153_vm1, %v41_v47 }
  0xad   :  { %4568 = vmatmul.msk.f32.gmra.mxu1 %vm1083_vm2, %v948_v49 }
  0xb0   :  { %v577_v50 = vpop.f32.mrf.mxu0 }
  0xb1   :  { %v578_v52 = vadd.f32 %v5485_v25, %v577_v50 }
  0xb3   :  { %v949_v53 = vmax.f32 %v578_v52, 0.0  ;;  %4457 = vmatmul.msk.f32.gmra.mxu0 %vm153_vm1, %v42_v51 }
  0xb5   :  { %4569 = vmatmul.msk.f32.gmra.mxu1 %vm1083_vm2, %v949_v53 }
  0xb8   :  { %v580_v54 = vpop.f32.mrf.mxu0 }
  0xb9   :  { %v581_v56 = vadd.f32 %v5485_v25, %v580_v54 }
  0xbb   :  { %v950_v57 = vmax.f32 %v581_v56, 0.0  ;;  %4458 = vmatmul.msk.f32.gmra.mxu0 %vm153_vm1, %v43_v55  ;;  %v55_v56 = vld [vmem:[%s7130_s0 + $0x118] sm:$0xff] }
  0xbd   :  { %4570 = vmatmul.msk.f32.gmra.mxu1 %vm1083_vm2, %v950_v57 }
  0xc0   :  { %v583_v58 = vpop.f32.mrf.mxu0 }
  0xc1   :  { %v584_v60 = vadd.f32 %v5485_v25, %v583_v58 }
  0xc3   :  { %v951_v61 = vmax.f32 %v584_v60, 0.0  ;;  %4459 = vmatmul.msk.f32.gmra.mxu0 %vm153_vm1, %v44_v59 }
  0xc5   :  { %4571 = vmatmul.msk.f32.gmra.mxu1 %vm1083_vm2, %v951_v61 }
  0xc8   :  { %v586_v62 = vpop.f32.mrf.mxu0 }
  0xc9   :  { %v587_v0 = vadd.f32 %v5485_v25, %v586_v62 }
  0xcb   :  { %v952_v1 = vmax.f32 %v587_v0, 0.0  ;;  %4460 = vmatmul.msk.f32.gmra.mxu0 %vm153_vm1, %v45_v63 }
  0xcd   :  { %4572 = vmatmul.msk.f32.gmra.mxu1 %vm1083_vm2, %v952_v1 }
  0xd0   :  { %v589_v2 = vpop.f32.mrf.mxu0 }
  0xd1   :  { %v590_v4 = vadd.f32 %v5485_v25, %v589_v2 }
  0xd3   :  { %v953_v5 = vmax.f32 %v590_v4, 0.0  ;;  %4461 = vmatmul.msk.f32.gmra.mxu0 %vm153_vm1, %v46_v3 }
  0xd5   :  { %4573 = vmatmul.msk.f32.gmra.mxu1 %vm1083_vm2, %v953_v5 }
  0xd8   :  { %v592_v6 = vpop.f32.mrf.mxu0 }
  0xd9   :  { %v593_v8 = vadd.f32 %v5485_v25, %v592_v6 }
  0xdb   :  { %v954_v9 = vmax.f32 %v593_v8, 0.0  ;;  %4462 = vmatmul.msk.f32.gmra.mxu0 %vm153_vm1, %v47_v7 }
  0xdd   :  { %4574 = vmatmul.msk.f32.gmra.mxu1 %vm1083_vm2, %v954_v9 }
  0xe0   :  { %v595_v10 = vpop.f32.mrf.mxu0 }
  0xe1   :  { %v596_v12 = vadd.f32 %v5485_v25, %v595_v10 }
  0xe3   :  { %v955_v13 = vmax.f32 %v596_v12, 0.0  ;;  %4463 = vmatmul.msk.f32.gmra.mxu0 %vm153_vm1, %v48_v11  ;;  %v56_v11 = vld [vmem:[%s7130_s0 + $0x120] sm:$0xff] }
  0xe5   :  { %4575 = vmatmul.msk.f32.gmra.mxu1 %vm1083_vm2, %v955_v13 }
  0xe8   :  { %v598_v14 = vpop.f32.mrf.mxu0 }
  0xe9   :  { %v599_v16 = vadd.f32 %v5485_v25, %v598_v14 }
  0xeb   :  { %v956_v17 = vmax.f32 %v599_v16, 0.0  ;;  %4464 = vmatmul.msk.f32.gmra.mxu0 %vm153_vm1, %v49_v15 }
  0xed   :  { %4576 = vmatmul.msk.f32.gmra.mxu1 %vm1083_vm2, %v956_v17 }
  0xf0   :  { %v601_v18 = vpop.f32.mrf.mxu0 }
  0xf1   :  { %v602_v20 = vadd.f32 %v5485_v25, %v601_v18 }
  0xf3   :  { %v957_v21 = vmax.f32 %v602_v20, 0.0  ;;  %4465 = vmatmul.msk.f32.gmra.mxu0 %vm153_vm1, %v50_v19 }
  0xf5   :  { %4577 = vmatmul.msk.f32.gmra.mxu1 %vm1083_vm2, %v957_v21 }
  0xf8   :  { %v604_v22 = vpop.f32.mrf.mxu0 }
  0xf9   :  { %v605_v24 = vadd.f32 %v5485_v25, %v604_v22 }
  0xfb   :  { %v958_v26 = vmax.f32 %v605_v24, 0.0  ;;  %4466 = vmatmul.msk.f32.gmra.mxu0 %vm153_vm1, %v51_v23 }
  0xfd   :  { %4578 = vmatmul.msk.f32.gmra.mxu1 %vm1083_vm2, %v958_v26 }
 0x100   :  { %v607_v28 = vpop.f32.mrf.mxu0 }
 0x101   :  { %v608_v30 = vadd.f32 %v5485_v25, %v607_v28 }
 0x102   :  { %v1485_v31 = vpop.f32.mrf.mxu1 }
 0x103   :  { %v959_v32 = vmax.f32 %v608_v30, 0.0  ;;  %v1486_v33 = vadd.f32 %v5586_v27, %v1485_v31  ;;  %4467 = vmatmul.msk.f32.gmra.mxu0 %vm153_vm1, %v52_v29 }
 0x105   :  { %v4691_v34 = vmul.f32 -1.442695, %v1486_v33  ;;  %4579 = vmatmul.msk.f32.gmra.mxu1 %vm1083_vm2, %v959_v32  ;;  %v57_v32 = vld [vmem:[%s7130_s0 + $0x128] sm:$0xff] }
 0x107   :  { %4838 = vpow2.f32 %v4691_v34 }
 0x108   :  { %v610_v35 = vpop.f32.mrf.mxu0 }
 0x109   :  { %v611_v37 = vadd.f32 %v5485_v25, %v610_v35 }
 0x10a   :  { %v1488_v38 = vpop.f32.mrf.mxu1 }
 0x10b   :  { %v960_v39 = vmax.f32 %v611_v37, 0.0  ;;  %v1489_v40 = vadd.f32 %v5586_v27, %v1488_v38  ;;  %4468 = vmatmul.msk.f32.gmra.mxu0 %vm153_vm1, %v53_v36 }
 0x10d   :  { %v4839_v41 = vpop.eup %4838  ;;  %v4692_v42 = vmul.f32 -1.442695, %v1489_v40  ;;  %4580 = vmatmul.msk.f32.gmra.mxu1 %vm1083_vm2, %v960_v39 }
 0x10e   :  { %v2253_v43 = vadd.f32 1.0, %v4839_v41 }
 0x10f   :  { %4840 = vpow2.f32 %v4692_v42 }
 0x110   :  { %4842 = vrcp.f32 %v2253_v43  ;;  %v613_v44 = vpop.f32.mrf.mxu0  ;;  %v2390_v59 = vand.u32 2147483647, %v2253_v43  ;;  %v2392_v60 = vand.u32 2147483648, %v2253_v43  ;;  %vm2386_vm4 = vweird.f32 %v2253_v43 }
 0x111   :  { %v614_v46 = vadd.f32 %v5485_v25, %v613_v44 }
 0x112   :  { %v1491_v47 = vpop.f32.mrf.mxu1  ;;  %v2393_v5 = vor.u32 1.1754944e-38, %v2392_v60  ;;  %vm2391_vm7 = vcmp.eq.f32.partialorder %v2390_v59, 8.507059e+37 }
 0x113   :  { %v961_v48 = vmax.f32 %v614_v46, 0.0  ;;  %v1492_v49 = vadd.f32 %v5586_v27, %v1491_v47  ;;  %4469 = vmatmul.msk.f32.gmra.mxu0 %vm153_vm1, %v54_v45 }
 0x115   :  { %v4841_v50 = vpop.eup %4840  ;;  %v4693_v51 = vmul.f32 -1.442695, %v1492_v49  ;;  %4581 = vmatmul.msk.f32.gmra.mxu1 %vm1083_vm2, %v961_v48 }
 0x116   :  { %v4843_v52 = vpop.eup %4842  ;;  %v2254_v53 = vadd.f32 1.0, %v4841_v50 }
 0x117   :  { %v2382_v54 = vmul.f32 %v4843_v52, %v2253_v43  ;;  %4844 = vpow2.f32 %v4693_v51  ;;  %vm2387_vm3 = vweird.f32 %v4843_v52  ;;  %v58_v51 = vld [vmem:[%s7130_s0 + $0x130] sm:$0xff] }
 0x118   :  { %4846 = vrcp.f32 %v2254_v53  ;;  %v616_v55 = vpop.f32.mrf.mxu0  ;;  %vm2388_vm5 = vmor %vm2386_vm4, %vm2387_vm3  ;;  %v2405_v14 = vand.u32 2147483647, %v2254_v53  ;;  %v2407_v15 = vand.u32 2147483648, %v2254_v53  ;;  %vm2401_vm9 = vweird.f32 %v2254_v53 }
 0x119   :  { %v2383_v57 = vsub.f32 1.0, %v2382_v54  ;;  %v617_v58 = vadd.f32 %v5485_v25, %v616_v55 }
 0x11a   :  { %v1494_v61 = vpop.f32.mrf.mxu1  ;;  %v2408_v24 = vor.u32 1.1754944e-38, %v2407_v15  ;;  %vm2406_vm11 = vcmp.eq.f32.partialorder %v2405_v14, 8.507059e+37 }
 0x11b   :  { %v2384_v62 = vmul.f32 %v4843_v52, %v2383_v57  ;;  %v962_v63 = vmax.f32 %v617_v58, 0.0  ;;  %v1495_v0 = vadd.f32 %v5586_v27, %v1494_v61  ;;  %4470 = vmatmul.msk.f32.gmra.mxu0 %vm153_vm1, %v55_v56 }
 0x11d   :  { %v4845_v1 = vpop.eup %4844  ;;  %v2385_v2 = vadd.f32 %v4843_v52, %v2384_v62  ;;  %v4694_v3 = vmul.f32 -1.442695, %v1495_v0  ;;  %4582 = vmatmul.msk.f32.gmra.mxu1 %vm1083_vm2, %v962_v63 }
 0x11e   :  { %v4847_v4 = vpop.eup %4846  ;;  %v2255_v6 = vadd.f32 1.0, %v4845_v1 }
 0x11f   :  { %v2389_v7 = vsel %vm2388_vm5, %v4843_v52, %v2385_v2  ;;  %v2397_v8 = vmul.f32 %v4847_v4, %v2254_v53  ;;  %4848 = vpow2.f32 %v4694_v3  ;;  %vm2402_vm8 = vweird.f32 %v4847_v4 }
 0x120   :  { %v2394_v9 = vsel %vm2391_vm7, %v2393_v5, %v2389_v7  ;;  %4850 = vrcp.f32 %v2255_v6  ;;  %v619_v10 = vpop.f32.mrf.mxu0  ;;  %vm2403_vm10 = vmor %vm2401_vm9, %vm2402_vm8  ;;  %v2420_v35 = vand.u32 2147483647, %v2255_v6  ;;  %v2422_v36 = vand.u32 2147483648, %v2255_v6 }
 0x121   :  { %4302 = vst.msk [vmem:[%s7134_s5] sm:$0xff] %vm4301_vm6, %v2394_v9  ;;  %v2398_v12 = vsub.f32 1.0, %v2397_v8  ;;  %v620_v13 = vadd.f32 %v5485_v25, %v619_v10  ;;  %vm2416_vm13 = vweird.f32 %v2255_v6 }
 0x122   :  { %v1497_v16 = vpop.f32.mrf.mxu1  ;;  %v2423_v45 = vor.u32 1.1754944e-38, %v2422_v36  ;;  %vm2421_vm15 = vcmp.eq.f32.partialorder %v2420_v35, 8.507059e+37 }
 0x123   :  { %v2399_v17 = vmul.f32 %v4847_v4, %v2398_v12  ;;  %v963_v18 = vmax.f32 %v620_v13, 0.0  ;;  %v1498_v19 = vadd.f32 %v5586_v27, %v1497_v16  ;;  %4471 = vmatmul.msk.f32.gmra.mxu0 %vm153_vm1, %v56_v11 }
 0x125   :  { %v4849_v20 = vpop.eup %4848  ;;  %v2400_v21 = vadd.f32 %v4847_v4, %v2399_v17  ;;  %v4695_v22 = vmul.f32 -1.442695, %v1498_v19  ;;  %4583 = vmatmul.msk.f32.gmra.mxu1 %vm1083_vm2, %v963_v18 }
 0x126   :  { %v4851_v23 = vpop.eup %4850  ;;  %v2256_v26 = vadd.f32 1.0, %v4849_v20 }
 0x127   :  { %v2404_v28 = vsel %vm2403_vm10, %v4847_v4, %v2400_v21  ;;  %v2412_v29 = vmul.f32 %v4851_v23, %v2255_v6  ;;  %4852 = vpow2.f32 %v4695_v22  ;;  %vm2417_vm12 = vweird.f32 %v4851_v23  ;;  %v59_v6 = vld [vmem:[%s7130_s0 + $0x138] sm:$0xff] }
 0x128   :  { %v2409_v30 = vsel %vm2406_vm11, %v2408_v24, %v2404_v28  ;;  %4854 = vrcp.f32 %v2256_v26  ;;  %v622_v31 = vpop.f32.mrf.mxu0  ;;  %vm2418_vm14 = vmor %vm2416_vm13, %vm2417_vm12  ;;  %v2435_v54 = vand.u32 2147483647, %v2256_v26  ;;  %v2437_v55 = vand.u32 2147483648, %v2256_v26 }
 0x129   :  { %4303 = vst.msk [vmem:[%s7134_s5 + $0x8] sm:$0xff] %vm4301_vm6, %v2409_v30  ;;  %v2413_v33 = vsub.f32 1.0, %v2412_v29  ;;  %v623_v34 = vadd.f32 %v5485_v25, %v622_v31  ;;  %vm2431_vm3 = vweird.f32 %v2256_v26 }
 0x12a   :  { %v1500_v37 = vpop.f32.mrf.mxu1  ;;  %v2438_v0 = vor.u32 1.1754944e-38, %v2437_v55  ;;  %vm2436_vm5 = vcmp.eq.f32.partialorder %v2435_v54, 8.507059e+37 }
 0x12b   :  { %v2414_v38 = vmul.f32 %v4851_v23, %v2413_v33  ;;  %v964_v39 = vmax.f32 %v623_v34, 0.0  ;;  %v1501_v40 = vadd.f32 %v5586_v27, %v1500_v37  ;;  %4472 = vmatmul.msk.f32.gmra.mxu0 %vm153_vm1, %v57_v32 }
 0x12d   :  { %v4853_v41 = vpop.eup %4852  ;;  %v2415_v42 = vadd.f32 %v4851_v23, %v2414_v38  ;;  %v4696_v43 = vmul.f32 -1.442695, %v1501_v40  ;;  %4584 = vmatmul.msk.f32.gmra.mxu1 %vm1083_vm2, %v964_v39 }
 0x12e   :  { %v4855_v44 = vpop.eup %4854  ;;  %v2257_v46 = vadd.f32 1.0, %v4853_v41 }
 0x12f   :  { %v2419_v47 = vsel %vm2418_vm14, %v4851_v23, %v2415_v42  ;;  %v2427_v48 = vmul.f32 %v4855_v44, %v2256_v26  ;;  %4856 = vpow2.f32 %v4696_v43  ;;  %vm2432_vm0 = vweird.f32 %v4855_v44  ;;  %v60_v26 = vld [vmem:[%s7130_s0 + $0x140] sm:$0xff] }
 0x130   :  { %v2424_v49 = vsel %vm2421_vm15, %v2423_v45, %v2419_v47  ;;  %4858 = vrcp.f32 %v2257_v46  ;;  %v625_v50 = vpop.f32.mrf.mxu0  ;;  %vm2433_vm4 = vmor %vm2431_vm3, %vm2432_vm0  ;;  %v2450_v9 = vand.u32 2147483647, %v2257_v46  ;;  %v2452_v10 = vand.u32 2147483648, %v2257_v46 }
 0x131   :  { %4304 = vst.msk [vmem:[%s7134_s5 + $0x10] sm:$0xff] %vm4301_vm6, %v2424_v49  ;;  %v2428_v52 = vsub.f32 1.0, %v2427_v48  ;;  %v626_v53 = vadd.f32 %v5485_v25, %v625_v50  ;;  %vm2446_vm8 = vweird.f32 %v2257_v46 }
 0x132   :  { %v1503_v56 = vpop.f32.mrf.mxu1  ;;  %v2453_v19 = vor.u32 1.1754944e-38, %v2452_v10  ;;  %vm2451_vm10 = vcmp.eq.f32.partialorder %v2450_v9, 8.507059e+37 }
 0x133   :  { %v2429_v57 = vmul.f32 %v4855_v44, %v2428_v52  ;;  %v965_v58 = vmax.f32 %v626_v53, 0.0  ;;  %v1504_v59 = vadd.f32 %v5586_v27, %v1503_v56  ;;  %4473 = vmatmul.msk.f32.gmra.mxu0 %vm153_vm1, %v58_v51 }
 0x135   :  { %v4857_v60 = vpop.eup %4856  ;;  %v2430_v61 = vadd.f32 %v4855_v44, %v2429_v57  ;;  %v4697_v62 = vmul.f32 -1.442695, %v1504_v59  ;;  %4585 = vmatmul.msk.f32.gmra.mxu1 %vm1083_vm2, %v965_v58 }
 0x136   :  { %v4859_v63 = vpop.eup %4858  ;;  %v2258_v1 = vadd.f32 1.0, %v4857_v60 }
 0x137   :  { %v2434_v2 = vsel %vm2433_vm4, %v4855_v44, %v2430_v61  ;;  %v2442_v3 = vmul.f32 %v4859_v63, %v2257_v46  ;;  %4860 = vpow2.f32 %v4697_v62  ;;  %vm2447_vm7 = vweird.f32 %v4859_v63  ;;  %v61_v46 = vld [vmem:[%s7130_s0 + $0x148] sm:$0xff] }
 0x138   :  { %v2439_v4 = vsel %vm2436_vm5, %v2438_v0, %v2434_v2  ;;  %4862 = vrcp.f32 %v2258_v1  ;;  %v628_v5 = vpop.f32.mrf.mxu0  ;;  %vm2448_vm9 = vmor %vm2446_vm8, %vm2447_vm7  ;;  %v2465_v30 = vand.u32 2147483647, %v2258_v1  ;;  %v2467_v31 = vand.u32 2147483648, %v2258_v1 }
 0x139   :  { %4305 = vst.msk [vmem:[%s7134_s5 + $0x18] sm:$0xff] %vm4301_vm6, %v2439_v4  ;;  %v2443_v7 = vsub.f32 1.0, %v2442_v3  ;;  %v629_v8 = vadd.f32 %v5485_v25, %v628_v5  ;;  %vm2461_vm12 = vweird.f32 %v2258_v1 }
 0x13a   :  { %v1506_v11 = vpop.f32.mrf.mxu1  ;;  %v2468_v40 = vor.u32 1.1754944e-38, %v2467_v31  ;;  %vm2466_vm14 = vcmp.eq.f32.partialorder %v2465_v30, 8.507059e+37 }
 0x13b   :  { %v2444_v12 = vmul.f32 %v4859_v63, %v2443_v7  ;;  %v966_v13 = vmax.f32 %v629_v8, 0.0  ;;  %v1507_v14 = vadd.f32 %v5586_v27, %v1506_v11  ;;  %4474 = vmatmul.msk.f32.gmra.mxu0 %vm153_vm1, %v59_v6 }
 0x13d   :  { %v4861_v15 = vpop.eup %4860  ;;  %v2445_v16 = vadd.f32 %v4859_v63, %v2444_v12  ;;  %v4698_v17 = vmul.f32 -1.442695, %v1507_v14  ;;  %4586 = vmatmul.msk.f32.gmra.mxu1 %vm1083_vm2, %v966_v13 }
 0x13e   :  { %v4863_v18 = vpop.eup %4862  ;;  %v2259_v20 = vadd.f32 1.0, %v4861_v15 }
 0x13f   :  { %v2449_v21 = vsel %vm2448_vm9, %v4859_v63, %v2445_v16  ;;  %v2457_v22 = vmul.f32 %v4863_v18, %v2258_v1  ;;  %4864 = vpow2.f32 %v4698_v17  ;;  %vm2462_vm11 = vweird.f32 %v4863_v18  ;;  %v62_v1 = vld [vmem:[%s7130_s0 + $0x150] sm:$0xff] }
 0x140   :  { %v2454_v23 = vsel %vm2451_vm10, %v2453_v19, %v2449_v21  ;;  %4866 = vrcp.f32 %v2259_v20  ;;  %v631_v24 = vpop.f32.mrf.mxu0  ;;  %vm2463_vm13 = vmor %vm2461_vm12, %vm2462_vm11  ;;  %v2480_v49 = vand.u32 2147483647, %v2259_v20  ;;  %v2482_v50 = vand.u32 2147483648, %v2259_v20 }
 0x141   :  { %4306 = vst.msk [vmem:[%s7134_s5 + $0x20] sm:$0xff] %vm4301_vm6, %v2454_v23  ;;  %v2458_v28 = vsub.f32 1.0, %v2457_v22  ;;  %v632_v29 = vadd.f32 %v5485_v25, %v631_v24  ;;  %vm2476_vm0 = vweird.f32 %v2259_v20 }
 0x142   :  { %v1509_v32 = vpop.f32.mrf.mxu1  ;;  %v2483_v59 = vor.u32 1.1754944e-38, %v2482_v50  ;;  %vm2481_vm4 = vcmp.eq.f32.partialorder %v2480_v49, 8.507059e+37 }
 0x143   :  { %v2459_v33 = vmul.f32 %v4863_v18, %v2458_v28  ;;  %v967_v34 = vmax.f32 %v632_v29, 0.0  ;;  %v1510_v35 = vadd.f32 %v5586_v27, %v1509_v32  ;;  %4475 = vmatmul.msk.f32.gmra.mxu0 %vm153_vm1, %v60_v26 }
 0x145   :  { %v4865_v36 = vpop.eup %4864  ;;  %v2460_v37 = vadd.f32 %v4863_v18, %v2459_v33  ;;  %v4699_v38 = vmul.f32 -1.442695, %v1510_v35  ;;  %4587 = vmatmul.msk.f32.gmra.mxu1 %vm1083_vm2, %v967_v34 }
 0x146   :  { %v4867_v39 = vpop.eup %4866  ;;  %v2260_v41 = vadd.f32 1.0, %v4865_v36 }
 0x147   :  { %v2464_v42 = vsel %vm2463_vm13, %v4863_v18, %v2460_v37  ;;  %v2472_v43 = vmul.f32 %v4867_v39, %v2259_v20  ;;  %4868 = vpow2.f32 %v4699_v38  ;;  %vm2477_vm15 = vweird.f32 %v4867_v39  ;;  %v63_v20 = vld [vmem:[%s7130_s0 + $0x158] sm:$0xff] }
 0x148   :  { %v2469_v44 = vsel %vm2466_vm14, %v2468_v40, %v2464_v42  ;;  %4870 = vrcp.f32 %v2260_v41  ;;  %v634_v45 = vpop.f32.mrf.mxu0  ;;  %vm2478_vm3 = vmor %vm2476_vm0, %vm2477_vm15  ;;  %v2495_v4 = vand.u32 2147483647, %v2260_v41  ;;  %v2497_v5 = vand.u32 2147483648, %v2260_v41 }
 0x149   :  { %4307 = vst.msk [vmem:[%s7134_s5 + $0x28] sm:$0xff] %vm4301_vm6, %v2469_v44  ;;  %v2473_v47 = vsub.f32 1.0, %v2472_v43  ;;  %v635_v48 = vadd.f32 %v5485_v25, %v634_v45  ;;  %vm2491_vm7 = vweird.f32 %v2260_v41 }
 0x14a   :  { %v1512_v51 = vpop.f32.mrf.mxu1  ;;  %v2498_v14 = vor.u32 1.1754944e-38, %v2497_v5  ;;  %vm2496_vm9 = vcmp.eq.f32.partialorder %v2495_v4, 8.507059e+37 }
 0x14b   :  { %v2474_v52 = vmul.f32 %v4867_v39, %v2473_v47  ;;  %v968_v53 = vmax.f32 %v635_v48, 0.0  ;;  %v1513_v54 = vadd.f32 %v5586_v27, %v1512_v51  ;;  %4476 = vmatmul.msk.f32.gmra.mxu0 %vm153_vm1, %v61_v46 }
 0x14d   :  { %v4869_v55 = vpop.eup %4868  ;;  %v2475_v56 = vadd.f32 %v4867_v39, %v2474_v52  ;;  %v4700_v57 = vmul.f32 -1.442695, %v1513_v54  ;;  %4588 = vmatmul.msk.f32.gmra.mxu1 %vm1083_vm2, %v968_v53 }
 0x14e   :  { %v4871_v58 = vpop.eup %4870  ;;  %v2261_v60 = vadd.f32 1.0, %v4869_v55 }
 0x14f   :  { %v2479_v61 = vsel %vm2478_vm3, %v4867_v39, %v2475_v56  ;;  %v2487_v62 = vmul.f32 %v4871_v58, %v2260_v41  ;;  %4872 = vpow2.f32 %v4700_v57  ;;  %vm2492_vm5 = vweird.f32 %v4871_v58  ;;  %v64_v41 = vld [vmem:[%s7130_s0 + $0x160] sm:$0xff] }
 0x150   :  { %v2484_v63 = vsel %vm2481_vm4, %v2483_v59, %v2479_v61  ;;  %4874 = vrcp.f32 %v2261_v60  ;;  %v637_v0 = vpop.f32.mrf.mxu0  ;;  %vm2493_vm8 = vmor %vm2491_vm7, %vm2492_vm5  ;;  %v2510_v23 = vand.u32 2147483647, %v2261_v60  ;;  %v2512_v24 = vand.u32 2147483648, %v2261_v60 }
 0x151   :  { %4308 = vst.msk [vmem:[%s7134_s5 + $0x30] sm:$0xff] %vm4301_vm6, %v2484_v63  ;;  %v2488_v2 = vsub.f32 1.0, %v2487_v62  ;;  %v638_v3 = vadd.f32 %v5485_v25, %v637_v0  ;;  %vm2506_vm11 = vweird.f32 %v2261_v60 }
 0x152   :  { %v1515_v6 = vpop.f32.mrf.mxu1  ;;  %v2513_v35 = vor.u32 1.1754944e-38, %v2512_v24  ;;  %vm2511_vm13 = vcmp.eq.f32.partialorder %v2510_v23, 8.507059e+37 }
 0x153   :  { %v2489_v7 = vmul.f32 %v4871_v58, %v2488_v2  ;;  %v969_v8 = vmax.f32 %v638_v3, 0.0  ;;  %v1516_v9 = vadd.f32 %v5586_v27, %v1515_v6  ;;  %4477 = vmatmul.msk.f32.gmra.mxu0 %vm153_vm1, %v62_v1 }
 0x155   :  { %v4873_v10 = vpop.eup %4872  ;;  %v2490_v11 = vadd.f32 %v4871_v58, %v2489_v7  ;;  %v4701_v12 = vmul.f32 -1.442695, %v1516_v9  ;;  %4589 = vmatmul.msk.f32.gmra.mxu1 %vm1083_vm2, %v969_v8 }
 0x156   :  { %v4875_v13 = vpop.eup %4874  ;;  %v2262_v15 = vadd.f32 1.0, %v4873_v10 }
 0x157   :  { %v2494_v16 = vsel %vm2493_vm8, %v4871_v58, %v2490_v11  ;;  %v2502_v17 = vmul.f32 %v4875_v13, %v2261_v60  ;;  %4876 = vpow2.f32 %v4701_v12  ;;  %vm2507_vm10 = vweird.f32 %v4875_v13  ;;  %v65_v60 = vld [vmem:[%s7130_s0 + $0x168] sm:$0xff] }
 0x158   :  { %v2499_v18 = vsel %vm2496_vm9, %v2498_v14, %v2494_v16  ;;  %4878 = vrcp.f32 %v2262_v15  ;;  %v640_v19 = vpop.f32.mrf.mxu0  ;;  %vm2508_vm12 = vmor %vm2506_vm11, %vm2507_vm10  ;;  %v2525_v44 = vand.u32 2147483647, %v2262_v15  ;;  %v2527_v45 = vand.u32 2147483648, %v2262_v15 }
 0x159   :  { %4309 = vst.msk [vmem:[%s7134_s5 + $0x38] sm:$0xff] %vm4301_vm6, %v2499_v18  ;;  %v2503_v21 = vsub.f32 1.0, %v2502_v17  ;;  %v641_v22 = vadd.f32 %v5485_v25, %v640_v19  ;;  %vm2521_vm15 = vweird.f32 %v2262_v15 }
 0x15a   :  { %v1518_v26 = vpop.f32.mrf.mxu1  ;;  %v2528_v54 = vor.u32 1.1754944e-38, %v2527_v45  ;;  %vm2526_vm3 = vcmp.eq.f32.partialorder %v2525_v44, 8.507059e+37 }
 0x15b   :  { %v2504_v28 = vmul.f32 %v4875_v13, %v2503_v21  ;;  %v970_v29 = vmax.f32 %v641_v22, 0.0  ;;  %v1519_v30 = vadd.f32 %v5586_v27, %v1518_v26  ;;  %4478 = vmatmul.msk.f32.gmra.mxu0 %vm153_vm1, %v63_v20 }
 0x15d   :  { %v4877_v31 = vpop.eup %4876  ;;  %v2505_v32 = vadd.f32 %v4875_v13, %v2504_v28  ;;  %v4702_v33 = vmul.f32 -1.442695, %v1519_v30  ;;  %4590 = vmatmul.msk.f32.gmra.mxu1 %vm1083_vm2, %v970_v29 }
 0x15e   :  { %v4879_v34 = vpop.eup %4878  ;;  %v2263_v36 = vadd.f32 1.0, %v4877_v31 }
 0x15f   :  { %v2509_v37 = vsel %vm2508_vm12, %v4875_v13, %v2505_v32  ;;  %v2517_v38 = vmul.f32 %v4879_v34, %v2262_v15  ;;  %4880 = vpow2.f32 %v4702_v33  ;;  %vm2522_vm14 = vweird.f32 %v4879_v34  ;;  %v66_v15 = vld [vmem:[%s7130_s0 + $0x170] sm:$0xff] }
 0x160   :  { %v2514_v39 = vsel %vm2511_vm13, %v2513_v35, %v2509_v37  ;;  %4882 = vrcp.f32 %v2263_v36  ;;  %v643_v40 = vpop.f32.mrf.mxu0  ;;  %vm2523_vm0 = vmor %vm2521_vm15, %vm2522_vm14  ;;  %v2540_v63 = vand.u32 2147483647, %v2263_v36  ;;  %v2542_v0 = vand.u32 2147483648, %v2263_v36 }
 0x161   :  { %4310 = vst.msk [vmem:[%s7134_s5 + $0x40] sm:$0xff] %vm4301_vm6, %v2514_v39  ;;  %v2518_v42 = vsub.f32 1.0, %v2517_v38  ;;  %v644_v43 = vadd.f32 %v5485_v25, %v643_v40  ;;  %vm2536_vm5 = vweird.f32 %v2263_v36 }
 0x162   :  { %v1521_v46 = vpop.f32.mrf.mxu1  ;;  %v2543_v9 = vor.u32 1.1754944e-38, %v2542_v0  ;;  %vm2541_vm8 = vcmp.eq.f32.partialorder %v2540_v63, 8.507059e+37 }
 0x163   :  { %v2519_v47 = vmul.f32 %v4879_v34, %v2518_v42  ;;  %v971_v48 = vmax.f32 %v644_v43, 0.0  ;;  %v1522_v49 = vadd.f32 %v5586_v27, %v1521_v46  ;;  %4479 = vmatmul.msk.f32.gmra.mxu0 %vm153_vm1, %v64_v41 }
 0x165   :  { %v4881_v50 = vpop.eup %4880  ;;  %v2520_v51 = vadd.f32 %v4879_v34, %v2519_v47  ;;  %v4703_v52 = vmul.f32 -1.442695, %v1522_v49  ;;  %4591 = vmatmul.msk.f32.gmra.mxu1 %vm1083_vm2, %v971_v48 }
 0x166   :  { %v4883_v53 = vpop.eup %4882  ;;  %v2264_v55 = vadd.f32 1.0, %v4881_v50 }
 0x167   :  { %v2524_v56 = vsel %vm2523_vm0, %v4879_v34, %v2520_v51  ;;  %v2532_v57 = vmul.f32 %v4883_v53, %v2263_v36  ;;  %4884 = vpow2.f32 %v4703_v52  ;;  %vm2537_vm4 = vweird.f32 %v4883_v53  ;;  %v67_v36 = vld [vmem:[%s7130_s0 + $0x178] sm:$0xff] }
 0x168   :  { %v2529_v58 = vsel %vm2526_vm3, %v2528_v54, %v2524_v56  ;;  %4886 = vrcp.f32 %v2264_v55  ;;  %v646_v59 = vpop.f32.mrf.mxu0  ;;  %vm2538_vm7 = vmor %vm2536_vm5, %vm2537_vm4  ;;  %v2555_v18 = vand.u32 2147483647, %v2264_v55  ;;  %v2557_v19 = vand.u32 2147483648, %v2264_v55 }
 0x169   :  { %4311 = vst.msk [vmem:[%s7134_s5 + $0x48] sm:$0xff] %vm4301_vm6, %v2529_v58  ;;  %v2533_v61 = vsub.f32 1.0, %v2532_v57  ;;  %v647_v62 = vadd.f32 %v5485_v25, %v646_v59  ;;  %vm2551_vm10 = vweird.f32 %v2264_v55 }
 0x16a   :  { %v1524_v1 = vpop.f32.mrf.mxu1  ;;  %v2558_v30 = vor.u32 1.1754944e-38, %v2557_v19  ;;  %vm2556_vm12 = vcmp.eq.f32.partialorder %v2555_v18, 8.507059e+37 }
 0x16b   :  { %v2534_v2 = vmul.f32 %v4883_v53, %v2533_v61  ;;  %v972_v3 = vmax.f32 %v647_v62, 0.0  ;;  %v1525_v4 = vadd.f32 %v5586_v27, %v1524_v1  ;;  %4480 = vmatmul.msk.f32.gmra.mxu0 %vm153_vm1, %v65_v60 }
 0x16d   :  { %v4885_v5 = vpop.eup %4884  ;;  %v2535_v6 = vadd.f32 %v4883_v53, %v2534_v2  ;;  %v4704_v7 = vmul.f32 -1.442695, %v1525_v4  ;;  %4592 = vmatmul.msk.f32.gmra.mxu1 %vm1083_vm2, %v972_v3 }
 0x16e   :  { %v4887_v8 = vpop.eup %4886  ;;  %v2265_v10 = vadd.f32 1.0, %v4885_v5 }
 0x16f   :  { %v2539_v11 = vsel %vm2538_vm7, %v4883_v53, %v2535_v6  ;;  %v2547_v12 = vmul.f32 %v4887_v8, %v2264_v55  ;;  %4888 = vpow2.f32 %v4704_v7  ;;  %vm2552_vm9 = vweird.f32 %v4887_v8  ;;  %v68_v55 = vld [vmem:[%s7130_s0 + $0x180] sm:$0xff] }
 0x170   :  { %v2544_v13 = vsel %vm2541_vm8, %v2543_v9, %v2539_v11  ;;  %4890 = vrcp.f32 %v2265_v10  ;;  %v649_v14 = vpop.f32.mrf.mxu0  ;;  %vm2553_vm11 = vmor %vm2551_vm10, %vm2552_vm9  ;;  %v2570_v39 = vand.u32 2147483647, %v2265_v10  ;;  %v2572_v40 = vand.u32 2147483648, %v2265_v10  ;;  %v69_v9 = vld [vmem:[%s7130_s0 + $0x188] sm:$0xff]  ;;  %v5769_v11 = vld [vmem:[%s7131_s2] ss:$0 sm:$0xff] }
 0x171   :  { %4312 = vst.msk [vmem:[%s7134_s5 + $0x50] sm:$0xff] %vm4301_vm6, %v2544_v13  ;;  %v2548_v16 = vsub.f32 1.0, %v2547_v12  ;;  %v650_v17 = vadd.f32 %v5485_v25, %v649_v14  ;;  %vm2566_vm14 = vweird.f32 %v2265_v10 }
 0x172   :  { %v1527_v20 = vpop.f32.mrf.mxu1  ;;  %v2573_v49 = vor.u32 1.1754944e-38, %v2572_v40  ;;  %vm2571_vm0 = vcmp.eq.f32.partialorder %v2570_v39, 8.507059e+37 }
 0x173   :  { %v2549_v21 = vmul.f32 %v4887_v8, %v2548_v16  ;;  %v973_v22 = vmax.f32 %v650_v17, 0.0  ;;  %v1528_v23 = vadd.f32 %v5586_v27, %v1527_v20  ;;  %4481 = vmatmul.msk.f32.gmra.mxu0 %vm153_vm1, %v66_v15 }
 0x175   :  { %v4889_v24 = vpop.eup %4888  ;;  %v2550_v26 = vadd.f32 %v4887_v8, %v2549_v21  ;;  %v4705_v28 = vmul.f32 -1.442695, %v1528_v23  ;;  %4593 = vmatmul.msk.f32.gmra.mxu1 %vm1083_vm2, %v973_v22 }
 0x176   :  { %v4891_v29 = vpop.eup %4890  ;;  %v2266_v31 = vadd.f32 1.0, %v4889_v24 }
 0x177   :  { %v2554_v32 = vsel %vm2553_vm11, %v4887_v8, %v2550_v26  ;;  %v2562_v33 = vmul.f32 %v4891_v29, %v2265_v10  ;;  %4892 = vpow2.f32 %v4705_v28  ;;  %vm2567_vm13 = vweird.f32 %v4891_v29 }
 0x178   :  { %v2559_v34 = vsel %vm2556_vm12, %v2558_v30, %v2554_v32  ;;  %4894 = vrcp.f32 %v2266_v31  ;;  %v652_v35 = vpop.f32.mrf.mxu0  ;;  %vm2568_vm15 = vmor %vm2566_vm14, %vm2567_vm13  ;;  %v2585_v58 = vand.u32 2147483647, %v2266_v31  ;;  %v2587_v59 = vand.u32 2147483648, %v2266_v31 }
 0x179   :  { %4313 = vst.msk [vmem:[%s7134_s5 + $0x58] sm:$0xff] %vm4301_vm6, %v2559_v34  ;;  %v2563_v37 = vsub.f32 1.0, %v2562_v33  ;;  %v653_v38 = vadd.f32 %v5485_v25, %v652_v35  ;;  %vm2581_vm4 = vweird.f32 %v2266_v31 }
 0x17a   :  { %v1530_v41 = vpop.f32.mrf.mxu1  ;;  %v2588_v4 = vor.u32 1.1754944e-38, %v2587_v59  ;;  %vm2586_vm7 = vcmp.eq.f32.partialorder %v2585_v58, 8.507059e+37 }
 0x17b   :  { %v2564_v42 = vmul.f32 %v4891_v29, %v2563_v37  ;;  %v974_v43 = vmax.f32 %v653_v38, 0.0  ;;  %v1531_v44 = vadd.f32 %v5586_v27, %v1530_v41  ;;  %4482 = vmatmul.msk.f32.gmra.mxu0 %vm153_vm1, %v67_v36 }
 0x17d   :  { %v4893_v45 = vpop.eup %4892  ;;  %v2565_v46 = vadd.f32 %v4891_v29, %v2564_v42  ;;  %v4706_v47 = vmul.f32 -1.442695, %v1531_v44  ;;  %4594 = vmatmul.msk.f32.gmra.mxu1 %vm1083_vm2, %v974_v43 }
 0x17e   :  { %v4895_v48 = vpop.eup %4894  ;;  %v2267_v50 = vadd.f32 1.0, %v4893_v45 }
 0x17f   :  { %v2569_v51 = vsel %vm2568_vm15, %v4891_v29, %v2565_v46  ;;  %v2577_v52 = vmul.f32 %v4895_v48, %v2266_v31  ;;  %4896 = vpow2.f32 %v4706_v47  ;;  %vm2582_vm3 = vweird.f32 %v4895_v48  ;;  %v70_v31 = vld [vmem:[%s7130_s0 + $0x190] sm:$0xff] }
 0x180   :  { %v2574_v53 = vsel %vm2571_vm0, %v2573_v49, %v2569_v51  ;;  %4898 = vrcp.f32 %v2267_v50  ;;  %v655_v54 = vpop.f32.mrf.mxu0  ;;  %vm2583_vm5 = vmor %vm2581_vm4, %vm2582_vm3  ;;  %v2600_v13 = vand.u32 2147483647, %v2267_v50  ;;  %v2602_v14 = vand.u32 2147483648, %v2267_v50 }
 0x181   :  { %4314 = vst.msk [vmem:[%s7134_s5 + $0x60] sm:$0xff] %vm4301_vm6, %v2574_v53  ;;  %v2578_v56 = vsub.f32 1.0, %v2577_v52  ;;  %v656_v57 = vadd.f32 %v5485_v25, %v655_v54  ;;  %vm2596_vm9 = vweird.f32 %v2267_v50 }
 0x182   :  { %v1533_v60 = vpop.f32.mrf.mxu1  ;;  %v2603_v23 = vor.u32 1.1754944e-38, %v2602_v14  ;;  %vm2601_vm11 = vcmp.eq.f32.partialorder %v2600_v13, 8.507059e+37 }
 0x183   :  { %v2579_v61 = vmul.f32 %v4895_v48, %v2578_v56  ;;  %v975_v62 = vmax.f32 %v656_v57, 0.0  ;;  %v1534_v63 = vadd.f32 %v5586_v27, %v1533_v60  ;;  %4483 = vmatmul.msk.f32.gmra.mxu0 %vm153_vm1, %v68_v55 }
 0x185   :  { %v4897_v0 = vpop.eup %4896  ;;  %v2580_v1 = vadd.f32 %v4895_v48, %v2579_v61  ;;  %v4707_v2 = vmul.f32 -1.442695, %v1534_v63  ;;  %4595 = vmatmul.msk.f32.gmra.mxu1 %vm1083_vm2, %v975_v62 }
 0x186   :  { %v4899_v3 = vpop.eup %4898  ;;  %v2268_v25 = vadd.f32 1.0, %v4897_v0 }
 0x187   :  { %v2584_v5 = vsel %vm2583_vm5, %v4895_v48, %v2580_v1  ;;  %v2592_v6 = vmul.f32 %v4899_v3, %v2267_v50  ;;  %4900 = vpow2.f32 %v4707_v2  ;;  %vm2597_vm8 = vweird.f32 %v4899_v3  ;;  %v71_v50 = vld [vmem:[%s7130_s0 + $0x198] sm:$0xff] }
 0x188   :  { %v2589_v7 = vsel %vm2586_vm7, %v2588_v4, %v2584_v5  ;;  %4902 = vrcp.f32 %v2268_v25  ;;  %v658_v8 = vpop.f32.mrf.mxu0  ;;  %vm2598_vm10 = vmor %vm2596_vm9, %vm2597_vm8  ;;  %v2615_v34 = vand.u32 2147483647, %v2268_v25  ;;  %v2617_v35 = vand.u32 2147483648, %v2268_v25 }
 0x189   :  { %4315 = vst.msk [vmem:[%s7134_s5 + $0x68] sm:$0xff] %vm4301_vm6, %v2589_v7  ;;  %v2593_v10 = vsub.f32 1.0, %v2592_v6  ;;  %v659_v12 = vadd.f32 %v5769_v11, %v658_v8  ;;  %vm2611_vm13 = vweird.f32 %v2268_v25 }
 0x18a   :  { %v1536_v15 = vpop.f32.mrf.mxu1  ;;  %v2618_v44 = vor.u32 1.1754944e-38, %v2617_v35  ;;  %vm2616_vm15 = vcmp.eq.f32.partialorder %v2615_v34, 8.507059e+37 }
 0x18b   :  { %v2594_v16 = vmul.f32 %v4899_v3, %v2593_v10  ;;  %v976_v17 = vmax.f32 %v659_v12, 0.0  ;;  %v1537_v18 = vadd.f32 %v5586_v27, %v1536_v15  ;;  %4484 = vmatmul.msk.f32.gmra.mxu0 %vm153_vm1, %v69_v9  ;;  %v5808_v12 = vld [vmem:[%s7133_s4] ss:$0 sm:$0xff] }
 0x18d   :  { %v4901_v19 = vpop.eup %4900  ;;  %v2595_v20 = vadd.f32 %v4899_v3, %v2594_v16  ;;  %v4708_v21 = vmul.f32 -1.442695, %v1537_v18  ;;  %4596 = vmatmul.msk.f32.gmra.mxu1 %vm1083_vm2, %v976_v17 }
 0x18e   :  { %v4903_v22 = vpop.eup %4902  ;;  %v2269_v24 = vadd.f32 1.0, %v4901_v19 }
 0x18f   :  { %v2599_v26 = vsel %vm2598_vm10, %v4899_v3, %v2595_v20  ;;  %v2607_v28 = vmul.f32 %v4903_v22, %v2268_v25  ;;  %4904 = vpow2.f32 %v4708_v21  ;;  %vm2612_vm12 = vweird.f32 %v4903_v22 }
 0x190   :  { %v2604_v29 = vsel %vm2601_vm11, %v2603_v23, %v2599_v26  ;;  %4906 = vrcp.f32 %v2269_v24  ;;  %v661_v30 = vpop.f32.mrf.mxu0  ;;  %vm2613_vm14 = vmor %vm2611_vm13, %vm2612_vm12  ;;  %v2630_v53 = vand.u32 2147483647, %v2269_v24  ;;  %v2632_v54 = vand.u32 2147483648, %v2269_v24 }
 0x191   :  { %4316 = vst.msk [vmem:[%s7134_s5 + $0x70] sm:$0xff] %vm4301_vm6, %v2604_v29  ;;  %v2608_v32 = vsub.f32 1.0, %v2607_v28  ;;  %v662_v33 = vadd.f32 %v5769_v11, %v661_v30  ;;  %vm2626_vm3 = vweird.f32 %v2269_v24 }
 0x192   :  { %v1539_v36 = vpop.f32.mrf.mxu1  ;;  %v2633_v63 = vor.u32 1.1754944e-38, %v2632_v54  ;;  %vm2631_vm5 = vcmp.eq.f32.partialorder %v2630_v53, 8.507059e+37 }
 0x193   :  { %v2609_v37 = vmul.f32 %v4903_v22, %v2608_v32  ;;  %v977_v38 = vmax.f32 %v662_v33, 0.0  ;;  %v1540_v39 = vadd.f32 %v5586_v27, %v1539_v36  ;;  %4485 = vmatmul.msk.f32.gmra.mxu0 %vm153_vm1, %v70_v31 }
 0x195   :  { %v4905_v40 = vpop.eup %4904  ;;  %v2610_v41 = vadd.f32 %v4903_v22, %v2609_v37  ;;  %v4709_v42 = vmul.f32 -1.442695, %v1540_v39  ;;  %4597 = vmatmul.msk.f32.gmra.mxu1 %vm1083_vm2, %v977_v38 }
 0x196   :  { %v4907_v43 = vpop.eup %4906  ;;  %v2270_v45 = vadd.f32 1.0, %v4905_v40 }
 0x197   :  { %v2614_v46 = vsel %vm2613_vm14, %v4903_v22, %v2610_v41  ;;  %v2622_v47 = vmul.f32 %v4907_v43, %v2269_v24  ;;  %4908 = vpow2.f32 %v4709_v42  ;;  %vm2627_vm0 = vweird.f32 %v4907_v43  ;;  %v73_v24 = vld [vmem:[%s7130_s0 + $0x1a8] sm:$0xff] }
 0x198   :  { %v2619_v48 = vsel %vm2616_vm15, %v2618_v44, %v2614_v46  ;;  %4910 = vrcp.f32 %v2270_v45  ;;  %v664_v49 = vpop.f32.mrf.mxu0  ;;  %vm2628_vm4 = vmor %vm2626_vm3, %vm2627_vm0  ;;  %v2645_v6 = vand.u32 2147483647, %v2270_v45  ;;  %v2647_v7 = vand.u32 2147483648, %v2270_v45 }
 0x199   :  { %4317 = vst.msk [vmem:[%s7134_s5 + $0x78] sm:$0xff] %vm4301_vm6, %v2619_v48  ;;  %v2623_v51 = vsub.f32 1.0, %v2622_v47  ;;  %v665_v52 = vadd.f32 %v5769_v11, %v664_v49  ;;  %vm2641_vm8 = vweird.f32 %v2270_v45 }
 0x19a   :  { %v1542_v55 = vpop.f32.mrf.mxu1  ;;  %v2648_v18 = vor.u32 1.1754944e-38, %v2647_v7  ;;  %vm2646_vm10 = vcmp.eq.f32.partialorder %v2645_v6, 8.507059e+37 }
 0x19b   :  { %v2624_v56 = vmul.f32 %v4907_v43, %v2623_v51  ;;  %v978_v57 = vmax.f32 %v665_v52, 0.0  ;;  %v1543_v58 = vadd.f32 %v5586_v27, %v1542_v55  ;;  %4486 = vmatmul.msk.f32.gmra.mxu0 %vm153_vm1, %v71_v50  ;;  %v72_v27 = vld [vmem:[%s7130_s0 + $0x1a0] sm:$0xff] }
 0x19d   :  { %v4909_v59 = vpop.eup %4908  ;;  %v2625_v60 = vadd.f32 %v4907_v43, %v2624_v56  ;;  %v4710_v61 = vmul.f32 -1.442695, %v1543_v58  ;;  %4598 = vmatmul.msk.f32.gmra.mxu1 %vm1083_vm2, %v978_v57 }
 0x19e   :  { %v4911_v62 = vpop.eup %4910  ;;  %v2271_v0 = vadd.f32 1.0, %v4909_v59 }
 0x19f   :  { %v2629_v1 = vsel %vm2628_vm4, %v4907_v43, %v2625_v60  ;;  %v2637_v2 = vmul.f32 %v4911_v62, %v2270_v45  ;;  %4912 = vpow2.f32 %v4710_v61  ;;  %vm2642_vm7 = vweird.f32 %v4911_v62  ;;  %v74_v45 = vld [vmem:[%s7130_s0 + $0x1b0] sm:$0xff] }
 0x1a0   :  { %v2634_v3 = vsel %vm2631_vm5, %v2633_v63, %v2629_v1  ;;  %4914 = vrcp.f32 %v2271_v0  ;;  %v667_v4 = vpop.f32.mrf.mxu0  ;;  %vm2643_vm9 = vmor %vm2641_vm8, %vm2642_vm7  ;;  %v2660_v29 = vand.u32 2147483647, %v2271_v0  ;;  %v2662_v30 = vand.u32 2147483648, %v2271_v0 }
 0x1a1   :  { %4318 = vst.msk [vmem:[%s7134_s5 + $0x80] sm:$0xff] %vm4301_vm6, %v2634_v3  ;;  %v2638_v25 = vsub.f32 1.0, %v2637_v2  ;;  %v668_v5 = vadd.f32 %v5769_v11, %v667_v4  ;;  %vm2656_vm12 = vweird.f32 %v2271_v0 }
 0x1a2   :  { %v1545_v8 = vpop.f32.mrf.mxu1  ;;  %v2663_v39 = vor.u32 1.1754944e-38, %v2662_v30  ;;  %vm2661_vm14 = vcmp.eq.f32.partialorder %v2660_v29, 8.507059e+37 }
 0x1a3   :  { %v2639_v9 = vmul.f32 %v4911_v62, %v2638_v25  ;;  %v979_v10 = vmax.f32 %v668_v5, 0.0  ;;  %v1546_v13 = vadd.f32 %v5808_v12, %v1545_v8  ;;  %4487 = vmatmul.msk.f32.gmra.mxu0 %vm153_vm1, %v72_v27 }
 0x1a5   :  { %v4913_v14 = vpop.eup %4912  ;;  %v2640_v15 = vadd.f32 %v4911_v62, %v2639_v9  ;;  %v4711_v16 = vmul.f32 -1.442695, %v1546_v13  ;;  %4599 = vmatmul.msk.f32.gmra.mxu1 %vm1083_vm2, %v979_v10 }
 0x1a6   :  { %v4915_v17 = vpop.eup %4914  ;;  %v2272_v19 = vadd.f32 1.0, %v4913_v14 }
 0x1a7   :  { %v2644_v20 = vsel %vm2643_vm9, %v4911_v62, %v2640_v15  ;;  %v2652_v21 = vmul.f32 %v4915_v17, %v2271_v0  ;;  %4916 = vpow2.f32 %v4711_v16  ;;  %vm2657_vm11 = vweird.f32 %v4915_v17  ;;  %v75_v0 = vld [vmem:[%s7130_s0 + $0x1b8] sm:$0xff] }
 0x1a8   :  { %v2649_v22 = vsel %vm2646_vm10, %v2648_v18, %v2644_v20  ;;  %4918 = vrcp.f32 %v2272_v19  ;;  %v670_v23 = vpop.f32.mrf.mxu0  ;;  %vm2658_vm13 = vmor %vm2656_vm12, %vm2657_vm11  ;;  %v2675_v48 = vand.u32 2147483647, %v2272_v19  ;;  %v2677_v49 = vand.u32 2147483648, %v2272_v19 }
 0x1a9   :  { %4319 = vst.msk [vmem:[%s7134_s5 + $0x88] sm:$0xff] %vm4301_vm6, %v2649_v22  ;;  %v2653_v26 = vsub.f32 1.0, %v2652_v21  ;;  %v671_v28 = vadd.f32 %v5769_v11, %v670_v23  ;;  %vm2671_vm0 = vweird.f32 %v2272_v19 }
 0x1aa   :  { %v1548_v31 = vpop.f32.mrf.mxu1  ;;  %v2678_v58 = vor.u32 1.1754944e-38, %v2677_v49  ;;  %vm2676_vm4 = vcmp.eq.f32.partialorder %v2675_v48, 8.507059e+37 }
 0x1ab   :  { %v2654_v32 = vmul.f32 %v4915_v17, %v2653_v26  ;;  %v980_v33 = vmax.f32 %v671_v28, 0.0  ;;  %v1549_v34 = vadd.f32 %v5808_v12, %v1548_v31  ;;  %4488 = vmatmul.msk.f32.gmra.mxu0 %vm153_vm1, %v73_v24 }
 0x1ad   :  { %v4917_v35 = vpop.eup %4916  ;;  %v2655_v36 = vadd.f32 %v4915_v17, %v2654_v32  ;;  %v4712_v37 = vmul.f32 -1.442695, %v1549_v34  ;;  %4600 = vmatmul.msk.f32.gmra.mxu1 %vm1083_vm2, %v980_v33 }
 0x1ae   :  { %v4919_v38 = vpop.eup %4918  ;;  %v2273_v40 = vadd.f32 1.0, %v4917_v35 }
 0x1af   :  { %v2659_v41 = vsel %vm2658_vm13, %v4915_v17, %v2655_v36  ;;  %v2667_v42 = vmul.f32 %v4919_v38, %v2272_v19  ;;  %4920 = vpow2.f32 %v4712_v37  ;;  %vm2672_vm15 = vweird.f32 %v4919_v38  ;;  %v76_v19 = vld [vmem:[%s7130_s0 + $0x1c0] sm:$0xff] }
 0x1b0   :  { %v2664_v43 = vsel %vm2661_vm14, %v2663_v39, %v2659_v41  ;;  %4922 = vrcp.f32 %v2273_v40  ;;  %v673_v44 = vpop.f32.mrf.mxu0  ;;  %vm2673_vm3 = vmor %vm2671_vm0, %vm2672_vm15  ;;  %v2690_v3 = vand.u32 2147483647, %v2273_v40  ;;  %v2692_v4 = vand.u32 2147483648, %v2273_v40 }
 0x1b1   :  { %4320 = vst.msk [vmem:[%s7134_s5 + $0x90] sm:$0xff] %vm4301_vm6, %v2664_v43  ;;  %v2668_v46 = vsub.f32 1.0, %v2667_v42  ;;  %v674_v47 = vadd.f32 %v5769_v11, %v673_v44  ;;  %vm2686_vm7 = vweird.f32 %v2273_v40 }
 0x1b2   :  { %v1551_v50 = vpop.f32.mrf.mxu1  ;;  %v2693_v13 = vor.u32 1.1754944e-38, %v2692_v4  ;;  %vm2691_vm9 = vcmp.eq.f32.partialorder %v2690_v3, 8.507059e+37 }
 0x1b3   :  { %v2669_v51 = vmul.f32 %v4919_v38, %v2668_v46  ;;  %v981_v52 = vmax.f32 %v674_v47, 0.0  ;;  %v1552_v53 = vadd.f32 %v5808_v12, %v1551_v50  ;;  %4489 = vmatmul.msk.f32.gmra.mxu0 %vm153_vm1, %v74_v45 }
 0x1b5   :  { %v4921_v54 = vpop.eup %4920  ;;  %v2670_v55 = vadd.f32 %v4919_v38, %v2669_v51  ;;  %v4713_v56 = vmul.f32 -1.442695, %v1552_v53  ;;  %4601 = vmatmul.msk.f32.gmra.mxu1 %vm1083_vm2, %v981_v52 }
 0x1b6   :  { %v4923_v57 = vpop.eup %4922  ;;  %v2274_v59 = vadd.f32 1.0, %v4921_v54 }
 0x1b7   :  { %v2674_v60 = vsel %vm2673_vm3, %v4919_v38, %v2670_v55  ;;  %v2682_v61 = vmul.f32 %v4923_v57, %v2273_v40  ;;  %4924 = vpow2.f32 %v4713_v56  ;;  %vm2687_vm5 = vweird.f32 %v4923_v57  ;;  %v77_v40 = vld [vmem:[%s7130_s0 + $0x1c8] sm:$0xff] }
 0x1b8   :  { %v2679_v62 = vsel %vm2676_vm4, %v2678_v58, %v2674_v60  ;;  %4926 = vrcp.f32 %v2274_v59  ;;  %v676_v63 = vpop.f32.mrf.mxu0  ;;  %vm2688_vm8 = vmor %vm2686_vm7, %vm2687_vm5  ;;  %v2705_v22 = vand.u32 2147483647, %v2274_v59  ;;  %v2707_v23 = vand.u32 2147483648, %v2274_v59  ;;  %v85_v60 = vld [vmem:[%s7130_s0 + $0x208] sm:$0xff] }
 0x1b9   :  { %4321 = vst.msk [vmem:[%s7134_s5 + $0x98] sm:$0xff] %vm4301_vm6, %v2679_v62  ;;  %v2683_v1 = vsub.f32 1.0, %v2682_v61  ;;  %v677_v2 = vadd.f32 %v5769_v11, %v676_v63  ;;  %vm2701_vm11 = vweird.f32 %v2274_v59  ;;  %4500 = vmatmul.msk.f32.vlgmr.msra.gmra.mxu3 %vm153_vm1, %v85_v60 }
 0x1ba   :  { %v1554_v27 = vpop.f32.mrf.mxu1  ;;  %v2708_v34 = vor.u32 1.1754944e-38, %v2707_v23  ;;  %vm2706_vm13 = vcmp.eq.f32.partialorder %v2705_v22, 8.507059e+37 }
 0x1bb   :  { %v2684_v25 = vmul.f32 %v4923_v57, %v2683_v1  ;;  %v982_v5 = vmax.f32 %v677_v2, 0.0  ;;  %v1555_v6 = vadd.f32 %v5808_v12, %v1554_v27  ;;  %4490 = vmatmul.msk.f32.gmra.mxu0 %vm153_vm1, %v75_v0 }
 0x1bd   :  { %v4925_v7 = vpop.eup %4924  ;;  %v2685_v8 = vadd.f32 %v4923_v57, %v2684_v25  ;;  %v4714_v9 = vmul.f32 -1.442695, %v1555_v6  ;;  %4602 = vmatmul.msk.f32.gmra.mxu1 %vm1083_vm2, %v982_v5 }
 0x1be   :  { %v4927_v10 = vpop.eup %4926  ;;  %v2275_v14 = vadd.f32 1.0, %v4925_v7 }
 0x1bf   :  { %v2689_v15 = vsel %vm2688_vm8, %v4923_v57, %v2685_v8  ;;  %v2697_v16 = vmul.f32 %v4927_v10, %v2274_v59  ;;  %4928 = vpow2.f32 %v4714_v9  ;;  %vm2702_vm10 = vweird.f32 %v4927_v10  ;;  %v78_v59 = vld [vmem:[%s7130_s0 + $0x1d0] sm:$0xff] }
 0x1c0   :  { %v2694_v17 = vsel %vm2691_vm9, %v2693_v13, %v2689_v15  ;;  %4930 = vrcp.f32 %v2275_v14  ;;  %v679_v18 = vpop.f32.mrf.mxu0  ;;  %vm2703_vm12 = vmor %vm2701_vm11, %vm2702_vm10  ;;  %v2720_v43 = vand.u32 2147483647, %v2275_v14  ;;  %v2722_v44 = vand.u32 2147483648, %v2275_v14  ;;  %v79_v15 = vld [vmem:[%s7130_s0 + $0x1d8] sm:$0xff] }
 0x1c1   :  { %4322 = vst.msk [vmem:[%s7134_s5 + $0xa0] sm:$0xff] %vm4301_vm6, %v2694_v17  ;;  %v2698_v20 = vsub.f32 1.0, %v2697_v16  ;;  %v680_v21 = vadd.f32 %v5769_v11, %v679_v18  ;;  %vm2716_vm15 = vweird.f32 %v2275_v14  ;;  %v86_v16 = vld [vmem:[%s7130_s0 + $0x210] sm:$0xff] }
 0x1c2   :  { %v1557_v24 = vpop.f32.mrf.mxu1  ;;  %v2723_v53 = vor.u32 1.1754944e-38, %v2722_v44  ;;  %vm2721_vm3 = vcmp.eq.f32.partialorder %v2720_v43, 8.507059e+37  ;;  %4501 = vmatmul.msk.f32.gmra.mxu3 %vm153_vm1, %v86_v16 }
 0x1c3   :  { %v2699_v26 = vmul.f32 %v4927_v10, %v2698_v20  ;;  %v983_v28 = vmax.f32 %v680_v21, 0.0  ;;  %v1558_v29 = vadd.f32 %v5808_v12, %v1557_v24  ;;  %4491 = vmatmul.msk.f32.gmra.mxu0 %vm153_vm1, %v76_v19 }
 0x1c5   :  { %v4929_v30 = vpop.eup %4928  ;;  %v2700_v31 = vadd.f32 %v4927_v10, %v2699_v26  ;;  %v4715_v32 = vmul.f32 -1.442695, %v1558_v29  ;;  %4603 = vmatmul.msk.f32.gmra.mxu1 %vm1083_vm2, %v983_v28 }
 0x1c6   :  { %v4931_v33 = vpop.eup %4930  ;;  %v2276_v35 = vadd.f32 1.0, %v4929_v30 }
 0x1c7   :  { %v2704_v36 = vsel %vm2703_vm12, %v4927_v10, %v2700_v31  ;;  %v2712_v37 = vmul.f32 %v4931_v33, %v2275_v14  ;;  %4932 = vpow2.f32 %v4715_v32  ;;  %vm2717_vm14 = vweird.f32 %v4931_v33 }
 0x1c8   :  { %v2709_v38 = vsel %vm2706_vm13, %v2708_v34, %v2704_v36  ;;  %4934 = vrcp.f32 %v2276_v35  ;;  %v682_v39 = vpop.f32.mrf.mxu0  ;;  %vm2718_vm0 = vmor %vm2716_vm15, %vm2717_vm14  ;;  %v2735_v63 = vand.u32 2147483647, %v2276_v35  ;;  %v2737_v0 = vand.u32 2147483648, %v2276_v35 }
 0x1c9   :  { %4323 = vst.msk [vmem:[%s7134_s5 + $0xa8] sm:$0xff] %vm4301_vm6, %v2709_v38  ;;  %v2713_v41 = vsub.f32 1.0, %v2712_v37  ;;  %v683_v42 = vadd.f32 %v5769_v11, %v682_v39  ;;  %vm2731_vm5 = vweird.f32 %v2276_v35  ;;  %v80_v37 = vld [vmem:[%s7130_s0 + $0x1e0] sm:$0xff]  ;;  %v87_v38 = vld [vmem:[%s7130_s0 + $0x218] sm:$0xff] }
 0x1ca   :  { %v1560_v45 = vpop.f32.mrf.mxu1  ;;  %v2738_v7 = vor.u32 1.1754944e-38, %v2737_v0  ;;  %vm2736_vm8 = vcmp.eq.f32.partialorder %v2735_v63, 8.507059e+37  ;;  %4502 = vmatmul.msk.f32.gmra.mxu3 %vm153_vm1, %v87_v38 }
 0x1cb   :  { %v2714_v46 = vmul.f32 %v4931_v33, %v2713_v41  ;;  %v984_v47 = vmax.f32 %v683_v42, 0.0  ;;  %v1561_v48 = vadd.f32 %v5808_v12, %v1560_v45  ;;  %4492 = vmatmul.msk.f32.gmra.mxu0 %vm153_vm1, %v77_v40 }
 0x1cd   :  { %v4933_v49 = vpop.eup %4932  ;;  %v2715_v50 = vadd.f32 %v4931_v33, %v2714_v46  ;;  %v4716_v51 = vmul.f32 -1.442695, %v1561_v48  ;;  %4604 = vmatmul.msk.f32.gmra.mxu1 %vm1083_vm2, %v984_v47 }
 0x1ce   :  { %v4935_v52 = vpop.eup %4934  ;;  %v5868_v54 = vadd.f32 1.0, %v4933_v49 }
 0x1cf   :  { %v2719_v55 = vsel %vm2718_vm0, %v4931_v33, %v2715_v50  ;;  %v2727_v56 = vmul.f32 %v4935_v52, %v2276_v35  ;;  %4936 = vpow2.f32 %v4716_v51  ;;  %vm2732_vm4 = vweird.f32 %v4935_v52 }
 0x1d0   :  { %v2724_v57 = vsel %vm2721_vm3, %v2723_v53, %v2719_v55  ;;  %4938 = vrcp.f32 %v5868_v54  ;;  %v685_v58 = vpop.f32.mrf.mxu0  ;;  %vm2733_vm7 = vmor %vm2731_vm5, %vm2732_vm4  ;;  %v2750_v19 = vand.u32 2147483647, %v5868_v54  ;;  %v2752_v20 = vand.u32 2147483648, %v5868_v54 }
 0x1d1   :  { %4324 = vst.msk [vmem:[%s7134_s5 + $0xb0] sm:$0xff] %vm4301_vm6, %v2724_v57  ;;  %v2728_v61 = vsub.f32 1.0, %v2727_v56  ;;  %v686_v62 = vadd.f32 %v5769_v11, %v685_v58  ;;  %vm2746_vm10 = vweird.f32 %v5868_v54  ;;  %v81_v57 = vld [vmem:[%s7130_s0 + $0x1e8] sm:$0xff]  ;;  %v88_v58 = vld [vmem:[%s7130_s0 + $0x220] sm:$0xff] }
 0x1d2   :  { %v1563_v1 = vpop.f32.mrf.mxu1  ;;  %v2753_v31 = vor.u32 1.1754944e-38, %v2752_v20  ;;  %vm2751_vm12 = vcmp.eq.f32.partialorder %v2750_v19, 8.507059e+37  ;;  %4503 = vmatmul.msk.f32.gmra.mxu3 %vm153_vm1, %v88_v58 }
 0x1d3   :  { %v2729_v2 = vmul.f32 %v4935_v52, %v2728_v61  ;;  %v985_v3 = vmax.f32 %v686_v62, 0.0  ;;  %v1564_v4 = vadd.f32 %v5808_v12, %v1563_v1  ;;  %4493 = vmatmul.msk.f32.gmra.mxu0 %vm153_vm1, %v78_v59 }
 0x1d5   :  { %v4937_v27 = vpop.eup %4936  ;;  %v2730_v25 = vadd.f32 %v4935_v52, %v2729_v2  ;;  %v4717_v5 = vmul.f32 -1.442695, %v1564_v4  ;;  %4605 = vmatmul.msk.f32.gmra.mxu1 %vm1083_vm2, %v985_v3 }
 0x1d6   :  { %v4939_v6 = vpop.eup %4938  ;;  %v5886_v8 = vadd.f32 1.0, %v4937_v27 }
 0x1d7   :  { %v2734_v9 = vsel %vm2733_vm7, %v4935_v52, %v2730_v25  ;;  %v2742_v10 = vmul.f32 %v4939_v6, %v5868_v54  ;;  %4940 = vpow2.f32 %v4717_v5  ;;  %vm2747_vm9 = vweird.f32 %v4939_v6 }
 0x1d8   :  { %v2739_v13 = vsel %vm2736_vm8, %v2738_v7, %v2734_v9  ;;  %4942 = vrcp.f32 %v5886_v8  ;;  %v688_v14 = vpop.f32.mrf.mxu0  ;;  %vm2748_vm11 = vmor %vm2746_vm10, %vm2747_vm9  ;;  %v2765_v41 = vand.u32 2147483647, %v5886_v8  ;;  %v2767_v42 = vand.u32 2147483648, %v5886_v8 }
 0x1d9   :  { %4325 = vst.msk [vmem:[%s7134_s5 + $0xb8] sm:$0xff] %vm4301_vm6, %v2739_v13  ;;  %v2743_v17 = vsub.f32 1.0, %v2742_v10  ;;  %v689_v18 = vadd.f32 %v5769_v11, %v688_v14  ;;  %vm2761_vm14 = vweird.f32 %v5886_v8  ;;  %v82_v13 = vld [vmem:[%s7130_s0 + $0x1f0] sm:$0xff]  ;;  %v89_v14 = vld [vmem:[%s7130_s0 + $0x228] sm:$0xff] }
 0x1da   :  { %v1566_v21 = vpop.f32.mrf.mxu1  ;;  %v2768_v51 = vor.u32 1.1754944e-38, %v2767_v42  ;;  %vm2766_vm0 = vcmp.eq.f32.partialorder %v2765_v41, 8.507059e+37  ;;  %4504 = vmatmul.msk.f32.gmra.mxu3 %vm153_vm1, %v89_v14 }
 0x1db   :  { %v2744_v22 = vmul.f32 %v4939_v6, %v2743_v17  ;;  %v986_v23 = vmax.f32 %v689_v18, 0.0  ;;  %v1567_v24 = vadd.f32 %v5808_v12, %v1566_v21  ;;  %4494 = vmatmul.msk.f32.gmra.mxu0 %vm153_vm1, %v79_v15 }
 0x1dd   :  { %v4941_v26 = vpop.eup %4940  ;;  %v2745_v28 = vadd.f32 %v4939_v6, %v2744_v22  ;;  %v4718_v29 = vmul.f32 -1.442695, %v1567_v24  ;;  %4606 = vmatmul.msk.f32.gmra.mxu1 %vm1083_vm2, %v986_v23 }
 0x1de   :  { %v4943_v30 = vpop.eup %4942  ;;  %v5908_v32 = vadd.f32 1.0, %v4941_v26 }
 0x1df   :  { %v2749_v33 = vsel %vm2748_vm11, %v4939_v6, %v2745_v28  ;;  %v2757_v34 = vmul.f32 %v4943_v30, %v5886_v8  ;;  %4944 = vpow2.f32 %v4718_v29  ;;  %vm2762_vm13 = vweird.f32 %v4943_v30 }
 0x1e0   :  { %v2754_v35 = vsel %vm2751_vm12, %v2753_v31, %v2749_v33  ;;  %4946 = vrcp.f32 %v5908_v32  ;;  %v691_v36 = vpop.f32.mrf.mxu0  ;;  %vm2763_vm15 = vmor %vm2761_vm14, %vm2762_vm13  ;;  %v2780_v61 = vand.u32 2147483647, %v5908_v32  ;;  %v2782_v62 = vand.u32 2147483648, %v5908_v32 }
 0x1e1   :  { %4326 = vst.msk [vmem:[%s7134_s5 + $0xc0] sm:$0xff] %vm4301_vm6, %v2754_v35  ;;  %v2758_v39 = vsub.f32 1.0, %v2757_v34  ;;  %v692_v40 = vadd.f32 %v5769_v11, %v691_v36  ;;  %vm2776_vm4 = vweird.f32 %v5908_v32  ;;  %v83_v35 = vld [vmem:[%s7130_s0 + $0x1f8] sm:$0xff]  ;;  %v90_v36 = vld [vmem:[%s7130_s0 + $0x230] sm:$0xff] }
 0x1e2   :  { %v1569_v43 = vpop.f32.mrf.mxu1  ;;  %v2783_v5 = vor.u32 1.1754944e-38, %v2782_v62  ;;  %vm2781_vm7 = vcmp.eq.f32.partialorder %v2780_v61, 8.507059e+37  ;;  %4505 = vmatmul.msk.f32.gmra.mxu3 %vm153_vm1, %v90_v36 }
 0x1e3   :  { %v2759_v44 = vmul.f32 %v4943_v30, %v2758_v39  ;;  %v987_v45 = vmax.f32 %v692_v40, 0.0  ;;  %v1570_v46 = vadd.f32 %v5808_v12, %v1569_v43  ;;  %4495 = vmatmul.msk.f32.gmra.mxu0 %vm153_vm1, %v80_v37 }
 0x1e5   :  { %v4945_v47 = vpop.eup %4944  ;;  %v2760_v48 = vadd.f32 %v4943_v30, %v2759_v44  ;;  %v4719_v49 = vmul.f32 -1.442695, %v1570_v46  ;;  %4607 = vmatmul.msk.f32.gmra.mxu1 %vm1083_vm2, %v987_v45 }
 0x1e6   :  { %v4947_v50 = vpop.eup %4946  ;;  %v5930_v52 = vadd.f32 1.0, %v4945_v47 }
 0x1e7   :  { %v2764_v53 = vsel %vm2763_vm15, %v4943_v30, %v2760_v48  ;;  %v2772_v54 = vmul.f32 %v4947_v50, %v5908_v32  ;;  %4948 = vpow2.f32 %v4719_v49  ;;  %vm2777_vm3 = vweird.f32 %v4947_v50 }
 0x1e8   :  { %v2769_v55 = vsel %vm2766_vm0, %v2768_v51, %v2764_v53  ;;  %4950 = vrcp.f32 %v5930_v52  ;;  %v694_v56 = vpop.f32.mrf.mxu0  ;;  %vm2778_vm5 = vmor %vm2776_vm4, %vm2777_vm3  ;;  %v2795_v17 = vand.u32 2147483647, %v5930_v52  ;;  %v2797_v18 = vand.u32 2147483648, %v5930_v52 }
 0x1e9   :  { %4327 = vst.msk [vmem:[%s7134_s5 + $0xc8] sm:$0xff] %vm4301_vm6, %v2769_v55  ;;  %v2773_v59 = vsub.f32 1.0, %v2772_v54  ;;  %v695_v60 = vadd.f32 %v5769_v11, %v694_v56  ;;  %vm2791_vm9 = vweird.f32 %v5930_v52  ;;  %v84_v55 = vld [vmem:[%s7130_s0 + $0x200] sm:$0xff]  ;;  %v91_v56 = vld [vmem:[%s7130_s0 + $0x238] sm:$0xff] }
 0x1ea   :  { %v1572_v63 = vpop.f32.mrf.mxu1  ;;  %v2798_v29 = vor.u32 1.1754944e-38, %v2797_v18  ;;  %vm2796_vm11 = vcmp.eq.f32.partialorder %v2795_v17, 8.507059e+37  ;;  %4506 = vmatmul.msk.f32.gmra.mxu3 %vm153_vm1, %v91_v56 }
 0x1eb   :  { %v2774_v0 = vmul.f32 %v4947_v50, %v2773_v59  ;;  %v988_v1 = vmax.f32 %v695_v60, 0.0  ;;  %v1573_v2 = vadd.f32 %v5808_v12, %v1572_v63  ;;  %4496 = vmatmul.msk.f32.gmra.mxu0 %vm153_vm1, %v81_v57 }
 0x1ed   :  { %v4949_v3 = vpop.eup %4948  ;;  %v2775_v4 = vadd.f32 %v4947_v50, %v2774_v0  ;;  %v4720_v27 = vmul.f32 -1.442695, %v1573_v2  ;;  %4608 = vmatmul.msk.f32.gmra.mxu1 %vm1083_vm2, %v988_v1 }
 0x1ee   :  { %v4951_v25 = vpop.eup %4950  ;;  %v5952_v6 = vadd.f32 1.0, %v4949_v3 }
 0x1ef   :  { %v2779_v7 = vsel %vm2778_vm5, %v4947_v50, %v2775_v4  ;;  %v2787_v8 = vmul.f32 %v4951_v25, %v5930_v52  ;;  %4952 = vpow2.f32 %v4720_v27  ;;  %vm2792_vm8 = vweird.f32 %v4951_v25 }
 0x1f0   :  { %v2784_v9 = vsel %vm2781_vm7, %v2783_v5, %v2779_v7  ;;  %4954 = vrcp.f32 %v5952_v6  ;;  %v697_v10 = vpop.f32.mrf.mxu0  ;;  %vm2793_vm10 = vmor %vm2791_vm9, %vm2792_vm8  ;;  %v2810_v39 = vand.u32 2147483647, %v5952_v6  ;;  %v2812_v40 = vand.u32 2147483648, %v5952_v6 }
 0x1f1   :  { %4328 = vst.msk [vmem:[%s7134_s5 + $0xd0] sm:$0xff] %vm4301_vm6, %v2784_v9  ;;  %v2788_v15 = vsub.f32 1.0, %v2787_v8  ;;  %v698_v16 = vadd.f32 %v5769_v11, %v697_v10  ;;  %vm2806_vm13 = vweird.f32 %v5952_v6  ;;  %v92_v9 = vld [vmem:[%s7130_s0 + $0x240] sm:$0xff] }
 0x1f2   :  { %v1575_v19 = vpop.f32.mrf.mxu1  ;;  %v2813_v49 = vor.u32 1.1754944e-38, %v2812_v40  ;;  %vm2811_vm15 = vcmp.eq.f32.partialorder %v2810_v39, 8.507059e+37  ;;  %4507 = vmatmul.msk.f32.gmra.mxu3 %vm153_vm1, %v92_v9 }
 0x1f3   :  { %v2789_v20 = vmul.f32 %v4951_v25, %v2788_v15  ;;  %v989_v21 = vmax.f32 %v698_v16, 0.0  ;;  %v1576_v22 = vadd.f32 %v5808_v12, %v1575_v19  ;;  %4497 = vmatmul.msk.f32.gmra.mxu0 %vm153_vm1, %v82_v13 }
 0x1f5   :  { %v4953_v23 = vpop.eup %4952  ;;  %v2790_v24 = vadd.f32 %v4951_v25, %v2789_v20  ;;  %v4721_v26 = vmul.f32 -1.442695, %v1576_v22  ;;  %4609 = vmatmul.msk.f32.gmra.mxu1 %vm1083_vm2, %v989_v21 }
 0x1f6   :  { %v4955_v28 = vpop.eup %4954  ;;  %v5974_v30 = vadd.f32 1.0, %v4953_v23 }
 0x1f7   :  { %v2794_v31 = vsel %vm2793_vm10, %v4951_v25, %v2790_v24  ;;  %v2802_v32 = vmul.f32 %v4955_v28, %v5952_v6  ;;  %4956 = vpow2.f32 %v4721_v26  ;;  %vm2807_vm12 = vweird.f32 %v4955_v28 }
 0x1f8   :  { %v2799_v33 = vsel %vm2796_vm11, %v2798_v29, %v2794_v31  ;;  %4958 = vrcp.f32 %v5974_v30  ;;  %v700_v34 = vpop.f32.mrf.mxu0  ;;  %vm2808_vm14 = vmor %vm2806_vm13, %vm2807_vm12  ;;  %v2825_v59 = vand.u32 2147483647, %v5974_v30  ;;  %v2827_v60 = vand.u32 2147483648, %v5974_v30 }
 0x1f9   :  { %4329 = vst.msk [vmem:[%s7134_s5 + $0xd8] sm:$0xff] %vm4301_vm6, %v2799_v33  ;;  %v2803_v37 = vsub.f32 1.0, %v2802_v32  ;;  %v701_v38 = vadd.f32 %v5769_v11, %v700_v34  ;;  %vm2821_vm3 = vweird.f32 %v5974_v30  ;;  %v93_v32 = vld [vmem:[%s7130_s0 + $0x248] sm:$0xff] }
 0x1fa   :  { %v1578_v41 = vpop.f32.mrf.mxu1  ;;  %v2828_v27 = vor.u32 1.1754944e-38, %v2827_v60  ;;  %vm2826_vm5 = vcmp.eq.f32.partialorder %v2825_v59, 8.507059e+37  ;;  %4508 = vmatmul.msk.f32.gmra.mxu3 %vm153_vm1, %v93_v32 }
 0x1fb   :  { %v2804_v42 = vmul.f32 %v4955_v28, %v2803_v37  ;;  %v990_v43 = vmax.f32 %v701_v38, 0.0  ;;  %v1579_v44 = vadd.f32 %v5808_v12, %v1578_v41  ;;  %4498 = vmatmul.msk.f32.gmra.mxu0 %vm153_vm1, %v83_v35 }
 0x1fd   :  { %v4957_v45 = vpop.eup %4956  ;;  %v2805_v46 = vadd.f32 %v4955_v28, %v2804_v42  ;;  %v4722_v47 = vmul.f32 -1.442695, %v1579_v44  ;;  %4610 = vmatmul.msk.f32.gmra.mxu1 %vm1083_vm2, %v990_v43 }
 0x1fe   :  { %v4959_v48 = vpop.eup %4958  ;;  %v2283_v50 = vadd.f32 1.0, %v4957_v45 }
 0x1ff   :  { %v2809_v51 = vsel %vm2808_vm14, %v4955_v28, %v2805_v46  ;;  %v2817_v52 = vmul.f32 %v4959_v48, %v5974_v30  ;;  %4960 = vpow2.f32 %v4722_v47  ;;  %vm2822_vm0 = vweird.f32 %v4959_v48 }
 0x200   :  { %v2814_v53 = vsel %vm2811_vm15, %v2813_v49, %v2809_v51  ;;  %4962 = vrcp.f32 %v2283_v50  ;;  %v703_v54 = vpop.f32.mrf.mxu0  ;;  %vm2823_vm4 = vmor %vm2821_vm3, %vm2822_vm0  ;;  %v2840_v14 = vand.u32 2147483647, %v2283_v50  ;;  %v2842_v15 = vand.u32 2147483648, %v2283_v50 }
 0x201   :  { %4330 = vst.msk [vmem:[%s7134_s5 + $0xe0] sm:$0xff] %vm4301_vm6, %v2814_v53  ;;  %v2818_v57 = vsub.f32 1.0, %v2817_v52  ;;  %v704_v58 = vadd.f32 %v5769_v11, %v703_v54  ;;  %vm2836_vm8 = vweird.f32 %v2283_v50  ;;  %v6047_v52 = vld [vmem:[%s7131_s2] ss:$0 sm:$0xff] }
 0x202   :  { %v1581_v61 = vpop.f32.mrf.mxu1  ;;  %v2843_v24 = vor.u32 1.1754944e-38, %v2842_v15  ;;  %vm2841_vm10 = vcmp.eq.f32.partialorder %v2840_v14, 8.507059e+37 }
 0x203   :  { %v2819_v62 = vmul.f32 %v4959_v48, %v2818_v57  ;;  %v991_v63 = vmax.f32 %v704_v58, 0.0  ;;  %v1582_v0 = vadd.f32 %v5808_v12, %v1581_v61  ;;  %4499 = vmatmul.msk.f32.gmra.mxu0 %vm153_vm1, %v84_v55 }
 0x205   :  { %v4961_v1 = vpop.eup %4960  ;;  %v2820_v2 = vadd.f32 %v4959_v48, %v2819_v62  ;;  %v4723_v3 = vmul.f32 -1.442695, %v1582_v0  ;;  %4611 = vmatmul.msk.f32.gmra.mxu1 %vm1083_vm2, %v991_v63 }
 0x206   :  { %v4963_v4 = vpop.eup %4962  ;;  %v2284_v25 = vadd.f32 1.0, %v4961_v1 }
 0x207   :  { %v2824_v5 = vsel %vm2823_vm4, %v4959_v48, %v2820_v2  ;;  %v2832_v6 = vmul.f32 %v4963_v4, %v2283_v50  ;;  %4964 = vpow2.f32 %v4723_v3  ;;  %vm2837_vm7 = vweird.f32 %v4963_v4  ;;  %v94_v50 = vld [vmem:[%s7130_s0 + $0x250] sm:$0xff] }
 0x208   :  { %v2829_v7 = vsel %vm2826_vm5, %v2828_v27, %v2824_v5  ;;  %4966 = vrcp.f32 %v2284_v25  ;;  %v706_v8 = vpop.f32.mrf.mxu0  ;;  %vm2838_vm9 = vmor %vm2836_vm8, %vm2837_vm7  ;;  %v2855_v35 = vand.u32 2147483647, %v2284_v25  ;;  %v2857_v36 = vand.u32 2147483648, %v2284_v25  ;;  %4509 = vmatmul.msk.f32.gmra.mxu3 %vm153_vm1, %v94_v50 }
 0x209   :  { %4331 = vst.msk [vmem:[%s7134_s5 + $0xe8] sm:$0xff] %vm4301_vm6, %v2829_v7  ;;  %v2833_v10 = vsub.f32 1.0, %v2832_v6  ;;  %v707_v13 = vadd.f32 %v5769_v11, %v706_v8  ;;  %vm2851_vm12 = vweird.f32 %v2284_v25 }
 0x20a   :  { %v1584_v16 = vpop.f32.mrf.mxu1  ;;  %v2858_v45 = vor.u32 1.1754944e-38, %v2857_v36  ;;  %vm2856_vm14 = vcmp.eq.f32.partialorder %v2855_v35, 8.507059e+37 }
 0x20b   :  { %v2834_v17 = vmul.f32 %v4963_v4, %v2833_v10  ;;  %v992_v18 = vmax.f32 %v707_v13, 0.0  ;;  %v1585_v19 = vadd.f32 %v5808_v12, %v1584_v16 }
 0x20d   :  { %v4965_v20 = vpop.eup %4964  ;;  %v2835_v21 = vadd.f32 %v4963_v4, %v2834_v17  ;;  %v4724_v22 = vmul.f32 -1.442695, %v1585_v19  ;;  %4612 = vmatmul.msk.f32.gmra.mxu1 %vm1083_vm2, %v992_v18 }
 0x20e   :  { %v4967_v23 = vpop.eup %4966  ;;  %v2285_v26 = vadd.f32 1.0, %v4965_v20 }
 0x20f   :  { %v2839_v28 = vsel %vm2838_vm9, %v4963_v4, %v2835_v21  ;;  %v2847_v29 = vmul.f32 %v4967_v23, %v2284_v25  ;;  %4968 = vpow2.f32 %v4724_v22  ;;  %vm2852_vm11 = vweird.f32 %v4967_v23  ;;  %v95_v25 = vld [vmem:[%s7130_s0 + $0x258] sm:$0xff] }
 0x210   :  { %v2844_v30 = vsel %vm2841_vm10, %v2843_v24, %v2839_v28  ;;  %4970 = vrcp.f32 %v2285_v26  ;;  %v709_v31 = vpop.f32.mrf.mxu0  ;;  %vm2853_vm13 = vmor %vm2851_vm12, %vm2852_vm11  ;;  %v2870_v54 = vand.u32 2147483647, %v2285_v26  ;;  %v2872_v55 = vand.u32 2147483648, %v2285_v26  ;;  %4510 = vmatmul.msk.f32.gmra.mxu3 %vm153_vm1, %v95_v25 }
 0x211   :  { %4332 = vst.msk [vmem:[%s7134_s5 + $0xf0] sm:$0xff] %vm4301_vm6, %v2844_v30  ;;  %v2848_v33 = vsub.f32 1.0, %v2847_v29  ;;  %v710_v34 = vadd.f32 %v5769_v11, %v709_v31  ;;  %vm2866_vm0 = vweird.f32 %v2285_v26 }
 0x212   :  { %v1587_v37 = vpop.f32.mrf.mxu1  ;;  %v2873_v0 = vor.u32 1.1754944e-38, %v2872_v55  ;;  %vm2871_vm4 = vcmp.eq.f32.partialorder %v2870_v54, 8.507059e+37 }
 0x213   :  { %v2849_v38 = vmul.f32 %v4967_v23, %v2848_v33  ;;  %v993_v39 = vmax.f32 %v710_v34, 0.0  ;;  %v1588_v40 = vadd.f32 %v5808_v12, %v1587_v37 }
 0x215   :  { %v4969_v41 = vpop.eup %4968  ;;  %v2850_v42 = vadd.f32 %v4967_v23, %v2849_v38  ;;  %v4725_v43 = vmul.f32 -1.442695, %v1588_v40  ;;  %4613 = vmatmul.msk.f32.gmra.mxu1 %vm1083_vm2, %v993_v39 }
 0x216   :  { %v4971_v44 = vpop.eup %4970  ;;  %v2286_v11 = vadd.f32 1.0, %v4969_v41 }
 0x217   :  { %v2854_v46 = vsel %vm2853_vm13, %v4967_v23, %v2850_v42  ;;  %v2862_v47 = vmul.f32 %v4971_v44, %v2285_v26  ;;  %4972 = vpow2.f32 %v4725_v43  ;;  %vm2867_vm15 = vweird.f32 %v4971_v44  ;;  %v96_v26 = vld [vmem:[%s7130_s0 + $0x260] sm:$0xff] }
 0x218   :  { %v2859_v48 = vsel %vm2856_vm14, %v2858_v45, %v2854_v46  ;;  %4974 = vrcp.f32 %v2286_v11  ;;  %v712_v49 = vpop.f32.mrf.mxu0  ;;  %vm2868_vm3 = vmor %vm2866_vm0, %vm2867_vm15  ;;  %v2885_v7 = vand.u32 2147483647, %v2286_v11  ;;  %v2887_v8 = vand.u32 2147483648, %v2286_v11  ;;  %4511 = vmatmul.msk.f32.gmra.mxu3 %vm153_vm1, %v96_v26 }
 0x219   :  { %4333 = vst.msk [vmem:[%s7134_s5 + $0xf8] sm:$0xff] %vm4301_vm6, %v2859_v48  ;;  %v2863_v51 = vsub.f32 1.0, %v2862_v47  ;;  %v713_v53 = vadd.f32 %v6047_v52, %v712_v49  ;;  %vm2881_vm7 = vweird.f32 %v2286_v11 }
 0x21a   :  { %v1590_v56 = vpop.f32.mrf.mxu1  ;;  %v2888_v19 = vor.u32 1.1754944e-38, %v2887_v8  ;;  %vm2886_vm9 = vcmp.eq.f32.partialorder %v2885_v7, 8.507059e+37 }
 0x21b   :  { %v2864_v57 = vmul.f32 %v4971_v44, %v2863_v51  ;;  %v994_v58 = vmax.f32 %v713_v53, 0.0  ;;  %v1591_v59 = vadd.f32 %v5808_v12, %v1590_v56  ;;  %v6087_v53 = vld [vmem:[%s7133_s4] ss:$0 sm:$0xff] }
 0x21d   :  { %v4973_v60 = vpop.eup %4972  ;;  %v2865_v61 = vadd.f32 %v4971_v44, %v2864_v57  ;;  %v4726_v62 = vmul.f32 -1.442695, %v1591_v59  ;;  %4614 = vmatmul.msk.f32.gmra.mxu1 %vm1083_vm2, %v994_v58 }
 0x21e   :  { %v4975_v63 = vpop.eup %4974  ;;  %v2287_v1 = vadd.f32 1.0, %v4973_v60 }
 0x21f   :  { %v2869_v2 = vsel %vm2868_vm3, %v4971_v44, %v2865_v61  ;;  %v2877_v3 = vmul.f32 %v4975_v63, %v2286_v11  ;;  %4976 = vpow2.f32 %v4726_v62  ;;  %vm2882_vm5 = vweird.f32 %v4975_v63 }
 0x220   :  { %v2874_v4 = vsel %vm2871_vm4, %v2873_v0, %v2869_v2  ;;  %4978 = vrcp.f32 %v2287_v1  ;;  %v715_v27 = vpop.f32.mrf.mxu0  ;;  %vm2883_vm8 = vmor %vm2881_vm7, %vm2882_vm5  ;;  %v2900_v30 = vand.u32 2147483647, %v2287_v1  ;;  %v2902_v31 = vand.u32 2147483648, %v2287_v1 }
 0x221   :  { %4334 = vst.msk [vmem:[%s7134_s5 + $0x100] sm:$0xff] %vm4301_vm6, %v2874_v4  ;;  %v2878_v5 = vsub.f32 1.0, %v2877_v3  ;;  %v716_v6 = vadd.f32 %v6047_v52, %v715_v27  ;;  %vm2896_vm11 = vweird.f32 %v2287_v1 }
 0x222   :  { %v1593_v9 = vpop.f32.mrf.mxu1  ;;  %v2903_v40 = vor.u32 1.1754944e-38, %v2902_v31  ;;  %vm2901_vm13 = vcmp.eq.f32.partialorder %v2900_v30, 8.507059e+37 }
 0x223   :  { %v2879_v10 = vmul.f32 %v4975_v63, %v2878_v5  ;;  %v995_v13 = vmax.f32 %v716_v6, 0.0  ;;  %v1594_v14 = vadd.f32 %v5808_v12, %v1593_v9 }
 0x225   :  { %v4977_v15 = vpop.eup %4976  ;;  %v2880_v16 = vadd.f32 %v4975_v63, %v2879_v10  ;;  %v4727_v17 = vmul.f32 -1.442695, %v1594_v14  ;;  %4615 = vmatmul.msk.f32.gmra.mxu1 %vm1083_vm2, %v995_v13 }
 0x226   :  { %v4979_v18 = vpop.eup %4978  ;;  %v2288_v20 = vadd.f32 1.0, %v4977_v15 }
 0x227   :  { %v2884_v21 = vsel %vm2883_vm8, %v4975_v63, %v2880_v16  ;;  %v2892_v22 = vmul.f32 %v4979_v18, %v2287_v1  ;;  %4980 = vpow2.f32 %v4727_v17  ;;  %vm2897_vm10 = vweird.f32 %v4979_v18  ;;  %v98_v1 = vld [vmem:[%s7130_s0 + $0x270] sm:$0xff] }
 0x228   :  { %v2889_v23 = vsel %vm2886_vm9, %v2888_v19, %v2884_v21  ;;  %4982 = vrcp.f32 %v2288_v20  ;;  %v718_v24 = vpop.f32.mrf.mxu0  ;;  %vm2898_vm12 = vmor %vm2896_vm11, %vm2897_vm10  ;;  %v2915_v47 = vand.u32 2147483647, %v2288_v20  ;;  %v2917_v48 = vand.u32 2147483648, %v2288_v20 }
 0x229   :  { %4335 = vst.msk [vmem:[%s7134_s5 + $0x108] sm:$0xff] %vm4301_vm6, %v2889_v23  ;;  %v2893_v28 = vsub.f32 1.0, %v2892_v22  ;;  %v719_v29 = vadd.f32 %v6047_v52, %v718_v24  ;;  %vm2911_vm15 = vweird.f32 %v2288_v20 }
 0x22a   :  { %v1596_v32 = vpop.f32.mrf.mxu1  ;;  %v2918_v59 = vor.u32 1.1754944e-38, %v2917_v48  ;;  %vm2916_vm3 = vcmp.eq.f32.partialorder %v2915_v47, 8.507059e+37 }
 0x22b   :  { %v2894_v33 = vmul.f32 %v4979_v18, %v2893_v28  ;;  %v996_v34 = vmax.f32 %v719_v29, 0.0  ;;  %v1597_v35 = vadd.f32 %v5808_v12, %v1596_v32  ;;  %v97_v12 = vld [vmem:[%s7130_s0 + $0x268] sm:$0xff] }
 0x22c   :  { %4512 = vmatmul.msk.f32.gmra.mxu3 %vm153_vm1, %v97_v12 }
 0x22d   :  { %v4981_v36 = vpop.eup %4980  ;;  %v2895_v37 = vadd.f32 %v4979_v18, %v2894_v33  ;;  %v4728_v38 = vmul.f32 -1.442695, %v1597_v35  ;;  %4616 = vmatmul.msk.f32.gmra.mxu1 %vm1083_vm2, %v996_v34 }
 0x22e   :  { %v4983_v39 = vpop.eup %4982  ;;  %v2289_v41 = vadd.f32 1.0, %v4981_v36 }
 0x22f   :  { %v2899_v42 = vsel %vm2898_vm12, %v4979_v18, %v2895_v37  ;;  %v2907_v43 = vmul.f32 %v4983_v39, %v2288_v20  ;;  %4984 = vpow2.f32 %v4728_v38  ;;  %vm2912_vm14 = vweird.f32 %v4983_v39  ;;  %v99_v20 = vld [vmem:[%s7130_s0 + $0x278] sm:$0xff] }
 0x230   :  { %v2904_v44 = vsel %vm2901_vm13, %v2903_v40, %v2899_v42  ;;  %4986 = vrcp.f32 %v2289_v41  ;;  %v721_v45 = vpop.f32.mrf.mxu0  ;;  %vm2913_vm0 = vmor %vm2911_vm15, %vm2912_vm14  ;;  %v2930_v4 = vand.u32 2147483647, %v2289_v41  ;;  %v2932_v27 = vand.u32 2147483648, %v2289_v41 }
 0x231   :  { %4336 = vst.msk [vmem:[%s7134_s5 + $0x110] sm:$0xff] %vm4301_vm6, %v2904_v44  ;;  %v2908_v11 = vsub.f32 1.0, %v2907_v43  ;;  %v722_v46 = vadd.f32 %v6047_v52, %v721_v45  ;;  %vm2926_vm5 = vweird.f32 %v2289_v41 }
 0x232   :  { %v1599_v49 = vpop.f32.mrf.mxu1  ;;  %v2933_v14 = vor.u32 1.1754944e-38, %v2932_v27  ;;  %vm2931_vm8 = vcmp.eq.f32.partialorder %v2930_v4, 8.507059e+37 }
 0x233   :  { %v2909_v50 = vmul.f32 %v4983_v39, %v2908_v11  ;;  %v997_v51 = vmax.f32 %v722_v46, 0.0  ;;  %v1600_v54 = vadd.f32 %v6087_v53, %v1599_v49 }
 0x234   :  { %4513 = vmatmul.msk.f32.gmra.mxu3 %vm153_vm1, %v98_v1 }
 0x235   :  { %v4985_v55 = vpop.eup %4984  ;;  %v2910_v56 = vadd.f32 %v4983_v39, %v2909_v50  ;;  %v4729_v57 = vmul.f32 -1.442695, %v1600_v54  ;;  %4617 = vmatmul.msk.f32.gmra.mxu1 %vm1083_vm2, %v997_v51 }
 0x236   :  { %v4987_v58 = vpop.eup %4986  ;;  %v2290_v60 = vadd.f32 1.0, %v4985_v55 }
 0x237   :  { %v2914_v61 = vsel %vm2913_vm0, %v4983_v39, %v2910_v56  ;;  %v2922_v62 = vmul.f32 %v4987_v58, %v2289_v41  ;;  %4988 = vpow2.f32 %v4729_v57  ;;  %vm2927_vm4 = vweird.f32 %v4987_v58  ;;  %v100_v41 = vld [vmem:[%s7130_s0 + $0x280] sm:$0xff] }
 0x238   :  { %v2919_v63 = vsel %vm2916_vm3, %v2918_v59, %v2914_v61  ;;  %4990 = vrcp.f32 %v2290_v60  ;;  %v724_v0 = vpop.f32.mrf.mxu0  ;;  %vm2928_vm7 = vmor %vm2926_vm5, %vm2927_vm4  ;;  %v2945_v23 = vand.u32 2147483647, %v2290_v60  ;;  %v2947_v24 = vand.u32 2147483648, %v2290_v60 }
 0x239   :  { %4337 = vst.msk [vmem:[%s7134_s5 + $0x118] sm:$0xff] %vm4301_vm6, %v2919_v63  ;;  %v2923_v2 = vsub.f32 1.0, %v2922_v62  ;;  %v725_v3 = vadd.f32 %v6047_v52, %v724_v0  ;;  %vm2941_vm10 = vweird.f32 %v2290_v60 }
 0x23a   :  { %v1602_v25 = vpop.f32.mrf.mxu1  ;;  %v2948_v35 = vor.u32 1.1754944e-38, %v2947_v24  ;;  %vm2946_vm12 = vcmp.eq.f32.partialorder %v2945_v23, 8.507059e+37 }
 0x23b   :  { %v2924_v5 = vmul.f32 %v4987_v58, %v2923_v2  ;;  %v998_v6 = vmax.f32 %v725_v3, 0.0  ;;  %v1603_v7 = vadd.f32 %v6087_v53, %v1602_v25 }
 0x23c   :  { %4514 = vmatmul.msk.f32.gmra.mxu3 %vm153_vm1, %v99_v20  ;;  %v6134_v27 = vpop.f32.mrf.mxu3 }
 0x23d   :  { %v4989_v8 = vpop.eup %4988  ;;  %v2925_v9 = vadd.f32 %v4987_v58, %v2924_v5  ;;  %v4730_v10 = vmul.f32 -1.442695, %v1603_v7  ;;  %4618 = vmatmul.msk.f32.gmra.mxu1 %vm1083_vm2, %v998_v6 }
 0x23e   :  { %v4991_v13 = vpop.eup %4990  ;;  %v2291_v15 = vadd.f32 1.0, %v4989_v8 }
 0x23f   :  { %v2929_v16 = vsel %vm2928_vm7, %v4987_v58, %v2925_v9  ;;  %v2937_v17 = vmul.f32 %v4991_v13, %v2290_v60  ;;  %4992 = vpow2.f32 %v4730_v10  ;;  %vm2942_vm9 = vweird.f32 %v4991_v13  ;;  %v101_v60 = vld [vmem:[%s7130_s0 + $0x288] sm:$0xff] }
 0x240   :  { %v2934_v18 = vsel %vm2931_vm8, %v2933_v14, %v2929_v16  ;;  %4994 = vrcp.f32 %v2291_v15  ;;  %v727_v19 = vpop.f32.mrf.mxu0  ;;  %vm2943_vm11 = vmor %vm2941_vm10, %vm2942_vm9  ;;  %v2960_v44 = vand.u32 2147483647, %v2291_v15  ;;  %v2962_v45 = vand.u32 2147483648, %v2291_v15  ;;  %v102_v16 = vld [vmem:[%s7130_s0 + $0x290] sm:$0xff] }
 0x241   :  { %4338 = vst.msk [vmem:[%s7134_s5 + $0x120] sm:$0xff] %vm4301_vm6, %v2934_v18  ;;  %v2938_v21 = vsub.f32 1.0, %v2937_v17  ;;  %v728_v22 = vadd.f32 %v6047_v52, %v727_v19  ;;  %vm2956_vm14 = vweird.f32 %v2291_v15 }
 0x242   :  { %v1605_v26 = vpop.f32.mrf.mxu1  ;;  %v2963_v54 = vor.u32 1.1754944e-38, %v2962_v45  ;;  %vm2961_vm0 = vcmp.eq.f32.partialorder %v2960_v44, 8.507059e+37 }
 0x243   :  { %v2939_v28 = vmul.f32 %v4991_v13, %v2938_v21  ;;  %v999_v29 = vmax.f32 %v728_v22, 0.0  ;;  %v1606_v30 = vadd.f32 %v6087_v53, %v1605_v26 }
 0x244   :  { %4515 = vmatmul.msk.f32.gmra.mxu3 %vm153_vm1, %v100_v41 }
 0x245   :  { %v4993_v31 = vpop.eup %4992  ;;  %v2940_v32 = vadd.f32 %v4991_v13, %v2939_v28  ;;  %v4731_v33 = vmul.f32 -1.442695, %v1606_v30  ;;  %4619 = vmatmul.msk.f32.gmra.mxu1 %vm1083_vm2, %v999_v29  ;;  %v6147_v26 = vpop.f32.mrf.mxu3 }
 0x246   :  { %v4995_v34 = vpop.eup %4994  ;;  %v2292_v36 = vadd.f32 1.0, %v4993_v31 }
 0x247   :  { %v2944_v37 = vsel %vm2943_vm11, %v4991_v13, %v2940_v32  ;;  %v2952_v38 = vmul.f32 %v4995_v34, %v2291_v15  ;;  %4996 = vpow2.f32 %v4731_v33  ;;  %vm2957_vm13 = vweird.f32 %v4995_v34 }
 0x248   :  { %v2949_v39 = vsel %vm2946_vm12, %v2948_v35, %v2944_v37  ;;  %4998 = vrcp.f32 %v2292_v36  ;;  %v730_v40 = vpop.f32.mrf.mxu0  ;;  %vm2958_vm15 = vmor %vm2956_vm14, %vm2957_vm13  ;;  %v2975_v63 = vand.u32 2147483647, %v2292_v36  ;;  %v2977_v0 = vand.u32 2147483648, %v2292_v36 }
 0x249   :  { %4339 = vst.msk [vmem:[%s7134_s5 + $0x128] sm:$0xff] %vm4301_vm6, %v2949_v39  ;;  %v2953_v42 = vsub.f32 1.0, %v2952_v38  ;;  %v731_v43 = vadd.f32 %v6047_v52, %v730_v40  ;;  %vm2971_vm4 = vweird.f32 %v2292_v36  ;;  %v103_v38 = vld [vmem:[%s7130_s0 + $0x298] sm:$0xff] }
 0x24a   :  { %v1608_v12 = vpop.f32.mrf.mxu1  ;;  %v2978_v8 = vor.u32 1.1754944e-38, %v2977_v0  ;;  %vm2976_vm7 = vcmp.eq.f32.partialorder %v2975_v63, 8.507059e+37 }
 0x24b   :  { %v2954_v11 = vmul.f32 %v4995_v34, %v2953_v42  ;;  %v1000_v46 = vmax.f32 %v731_v43, 0.0  ;;  %v1609_v47 = vadd.f32 %v6087_v53, %v1608_v12 }
 0x24c   :  { %4516 = vmatmul.msk.f32.gmra.mxu3 %vm153_vm1, %v101_v60 }
 0x24d   :  { %v4997_v48 = vpop.eup %4996  ;;  %v2955_v49 = vadd.f32 %v4995_v34, %v2954_v11  ;;  %v4732_v50 = vmul.f32 -1.442695, %v1609_v47  ;;  %4620 = vmatmul.msk.f32.gmra.mxu1 %vm1083_vm2, %v1000_v46  ;;  %v6160_v11 = vpop.f32.mrf.mxu3 }
 0x24e   :  { %v4999_v51 = vpop.eup %4998  ;;  %v2293_v55 = vadd.f32 1.0, %v4997_v48 }
 0x24f   :  { %v2959_v56 = vsel %vm2958_vm15, %v4995_v34, %v2955_v49  ;;  %v2967_v57 = vmul.f32 %v4999_v51, %v2292_v36  ;;  %5000 = vpow2.f32 %v4732_v50  ;;  %vm2972_vm3 = vweird.f32 %v4999_v51 }
 0x250   :  { %v2964_v58 = vsel %vm2961_vm0, %v2963_v54, %v2959_v56  ;;  %5002 = vrcp.f32 %v2293_v55  ;;  %v733_v59 = vpop.f32.mrf.mxu0  ;;  %vm2973_vm5 = vmor %vm2971_vm4, %vm2972_vm3  ;;  %v2990_v19 = vand.u32 2147483647, %v2293_v55  ;;  %v2992_v20 = vand.u32 2147483648, %v2293_v55 }
 0x251   :  { %4340 = vst.msk [vmem:[%s7134_s5 + $0x130] sm:$0xff] %vm4301_vm6, %v2964_v58  ;;  %v2968_v61 = vsub.f32 1.0, %v2967_v57  ;;  %v734_v62 = vadd.f32 %v6047_v52, %v733_v59  ;;  %vm2986_vm9 = vweird.f32 %v2293_v55  ;;  %v104_v58 = vld [vmem:[%s7130_s0 + $0x2a0] sm:$0xff] }
 0x252   :  { %v1611_v1 = vpop.f32.mrf.mxu1  ;;  %v2993_v32 = vor.u32 1.1754944e-38, %v2992_v20  ;;  %vm2991_vm11 = vcmp.eq.f32.partialorder %v2990_v19, 8.507059e+37 }
 0x253   :  { %v2969_v2 = vmul.f32 %v4999_v51, %v2968_v61  ;;  %v1001_v3 = vmax.f32 %v734_v62, 0.0  ;;  %v1612_v4 = vadd.f32 %v6087_v53, %v1611_v1 }
 0x254   :  { %4517 = vmatmul.msk.f32.gmra.mxu3 %vm153_vm1, %v102_v16 }
 0x255   :  { %v5001_v25 = vpop.eup %5000  ;;  %v2970_v5 = vadd.f32 %v4999_v51, %v2969_v2  ;;  %v4733_v6 = vmul.f32 -1.442695, %v1612_v4  ;;  %4621 = vmatmul.msk.f32.gmra.mxu1 %vm1083_vm2, %v1001_v3  ;;  %v6173_v3 = vpop.f32.mrf.mxu3 }
 0x256   :  { %v5003_v7 = vpop.eup %5002  ;;  %v2294_v9 = vadd.f32 1.0, %v5001_v25 }
 0x257   :  { %v2974_v10 = vsel %vm2973_vm5, %v4999_v51, %v2970_v5  ;;  %v2982_v13 = vmul.f32 %v5003_v7, %v2293_v55  ;;  %5004 = vpow2.f32 %v4733_v6  ;;  %vm2987_vm8 = vweird.f32 %v5003_v7 }
 0x258   :  { %v2979_v14 = vsel %vm2976_vm7, %v2978_v8, %v2974_v10  ;;  %5006 = vrcp.f32 %v2294_v9  ;;  %v736_v15 = vpop.f32.mrf.mxu0  ;;  %vm2988_vm10 = vmor %vm2986_vm9, %vm2987_vm8  ;;  %v3005_v41 = vand.u32 2147483647, %v2294_v9  ;;  %v3007_v42 = vand.u32 2147483648, %v2294_v9 }
 0x259   :  { %4341 = vst.msk [vmem:[%s7134_s5 + $0x138] sm:$0xff] %vm4301_vm6, %v2979_v14  ;;  %v2983_v17 = vsub.f32 1.0, %v2982_v13  ;;  %v737_v18 = vadd.f32 %v6047_v52, %v736_v15  ;;  %vm3001_vm13 = vweird.f32 %v2294_v9  ;;  %v105_v15 = vld [vmem:[%s7130_s0 + $0x2a8] sm:$0xff] }
 0x25a   :  { %v1614_v21 = vpop.f32.mrf.mxu1  ;;  %v3008_v50 = vor.u32 1.1754944e-38, %v3007_v42  ;;  %vm3006_vm15 = vcmp.eq.f32.partialorder %v3005_v41, 8.507059e+37 }
 0x25b   :  { %v2984_v22 = vmul.f32 %v5003_v7, %v2983_v17  ;;  %v1002_v23 = vmax.f32 %v737_v18, 0.0  ;;  %v1615_v24 = vadd.f32 %v6087_v53, %v1614_v21 }
 0x25c   :  { %4518 = vmatmul.msk.f32.gmra.mxu3 %vm153_vm1, %v103_v38  ;;  %v106_v38 = vld [vmem:[%s7130_s0 + $0x2b0] sm:$0xff] }
 0x25d   :  { %v5005_v28 = vpop.eup %5004  ;;  %v2985_v29 = vadd.f32 %v5003_v7, %v2984_v22  ;;  %v4734_v30 = vmul.f32 -1.442695, %v1615_v24  ;;  %4622 = vmatmul.msk.f32.gmra.mxu1 %vm1083_vm2, %v1002_v23  ;;  %v6186_v24 = vpop.f32.mrf.mxu3 }
 0x25e   :  { %v5007_v31 = vpop.eup %5006  ;;  %v2295_v33 = vadd.f32 1.0, %v5005_v28 }
 0x25f   :  { %v2989_v34 = vsel %vm2988_vm10, %v5003_v7, %v2985_v29  ;;  %v2997_v35 = vmul.f32 %v5007_v31, %v2294_v9  ;;  %5008 = vpow2.f32 %v4734_v30  ;;  %vm3002_vm12 = vweird.f32 %v5007_v31 }
 0x260   :  { %v2994_v36 = vsel %vm2991_vm11, %v2993_v32, %v2989_v34  ;;  %5010 = vrcp.f32 %v2295_v33  ;;  %v739_v37 = vpop.f32.mrf.mxu0  ;;  %vm3003_vm14 = vmor %vm3001_vm13, %vm3002_vm12  ;;  %v3020_v61 = vand.u32 2147483647, %v2295_v33  ;;  %v3022_v62 = vand.u32 2147483648, %v2295_v33 }
 0x261   :  { %4342 = vst.msk [vmem:[%s7134_s5 + $0x140] sm:$0xff] %vm4301_vm6, %v2994_v36  ;;  %v2998_v39 = vsub.f32 1.0, %v2997_v35  ;;  %v740_v40 = vadd.f32 %v6047_v52, %v739_v37  ;;  %vm3016_vm3 = vweird.f32 %v2295_v33 }
 0x262   :  { %v1617_v43 = vpop.f32.mrf.mxu1  ;;  %v3023_v7 = vor.u32 1.1754944e-38, %v3022_v62  ;;  %vm3021_vm5 = vcmp.eq.f32.partialorder %v3020_v61, 8.507059e+37 }
 0x263   :  { %v2999_v44 = vmul.f32 %v5007_v31, %v2998_v39  ;;  %v1003_v45 = vmax.f32 %v740_v40, 0.0  ;;  %v1618_v12 = vadd.f32 %v6087_v53, %v1617_v43 }
 0x264   :  { %4519 = vmatmul.msk.f32.gmra.mxu3 %vm153_vm1, %v104_v58 }
 0x265   :  { %v5009_v46 = vpop.eup %5008  ;;  %v3000_v47 = vadd.f32 %v5007_v31, %v2999_v44  ;;  %v4735_v48 = vmul.f32 -1.442695, %v1618_v12  ;;  %4623 = vmatmul.msk.f32.gmra.mxu1 %vm1083_vm2, %v1003_v45 }
 0x266   :  { %v5011_v49 = vpop.eup %5010  ;;  %v2296_v51 = vadd.f32 1.0, %v5009_v46  ;;  %v6199_v46 = vpop.f32.mrf.mxu3 }
 0x267   :  { %v3004_v54 = vsel %vm3003_vm14, %v5007_v31, %v3000_v47  ;;  %v3012_v55 = vmul.f32 %v5011_v49, %v2295_v33  ;;  %5012 = vpow2.f32 %v4735_v48  ;;  %vm3017_vm0 = vweird.f32 %v5011_v49 }
 0x268   :  { %v3009_v56 = vsel %vm3006_vm15, %v3008_v50, %v3004_v54  ;;  %5014 = vrcp.f32 %v2296_v51  ;;  %v742_v57 = vpop.f32.mrf.mxu0  ;;  %vm3018_vm4 = vmor %vm3016_vm3, %vm3017_vm0  ;;  %v3035_v18 = vand.u32 2147483647, %v2296_v51  ;;  %v3037_v19 = vand.u32 2147483648, %v2296_v51 }
 0x269   :  { %4343 = vst.msk [vmem:[%s7134_s5 + $0x148] sm:$0xff] %vm4301_vm6, %v3009_v56  ;;  %v3013_v59 = vsub.f32 1.0, %v3012_v55  ;;  %v743_v60 = vadd.f32 %v6047_v52, %v742_v57  ;;  %vm3031_vm8 = vweird.f32 %v2296_v51 }
 0x26a   :  { %v1620_v63 = vpop.f32.mrf.mxu1  ;;  %v3038_v32 = vor.u32 1.1754944e-38, %v3037_v19  ;;  %vm3036_vm10 = vcmp.eq.f32.partialorder %v3035_v18, 8.507059e+37 }
 0x26b   :  { %v3014_v0 = vmul.f32 %v5011_v49, %v3013_v59  ;;  %v1004_v1 = vmax.f32 %v743_v60, 0.0  ;;  %v1621_v2 = vadd.f32 %v6087_v53, %v1620_v63  ;;  %v107_v59 = vld [vmem:[%s7130_s0 + $0x2b8] sm:$0xff] }
 0x26c   :  { %4520 = vmatmul.msk.f32.gmra.mxu3 %vm153_vm1, %v105_v15 }
 0x26d   :  { %v5013_v4 = vpop.eup %5012  ;;  %v3015_v25 = vadd.f32 %v5011_v49, %v3014_v0  ;;  %v4736_v5 = vmul.f32 -1.442695, %v1621_v2  ;;  %4624 = vmatmul.msk.f32.gmra.mxu1 %vm1083_vm2, %v1004_v1 }
 0x26e   :  { %v5015_v6 = vpop.eup %5014  ;;  %v2297_v8 = vadd.f32 1.0, %v5013_v4 }
 0x26f   :  { %v3019_v9 = vsel %vm3018_vm4, %v5011_v49, %v3015_v25  ;;  %v3027_v10 = vmul.f32 %v5015_v6, %v2296_v51  ;;  %5016 = vpow2.f32 %v4736_v5  ;;  %vm3032_vm7 = vweird.f32 %v5015_v6  ;;  %v6212_v25 = vpop.f32.mrf.mxu3 }
 0x270   :  { %v3024_v13 = vsel %vm3021_vm5, %v3023_v7, %v3019_v9  ;;  %5018 = vrcp.f32 %v2297_v8  ;;  %v745_v14 = vpop.f32.mrf.mxu0  ;;  %vm3033_vm9 = vmor %vm3031_vm8, %vm3032_vm7  ;;  %v3050_v41 = vand.u32 2147483647, %v2297_v8  ;;  %v3052_v42 = vand.u32 2147483648, %v2297_v8 }
 0x271   :  { %4344 = vst.msk [vmem:[%s7134_s5 + $0x150] sm:$0xff] %vm4301_vm6, %v3024_v13  ;;  %v3028_v16 = vsub.f32 1.0, %v3027_v10  ;;  %v746_v17 = vadd.f32 %v6047_v52, %v745_v14  ;;  %vm3046_vm12 = vweird.f32 %v2297_v8  ;;  %v755_v10 = vadd.f32 %v6047_v52, %v6134_v27 }
 0x272   :  { %v1623_v20 = vpop.f32.mrf.mxu1  ;;  %v3053_v51 = vor.u32 1.1754944e-38, %v3052_v42  ;;  %vm3051_vm14 = vcmp.eq.f32.partialorder %v3050_v41, 8.507059e+37 }
 0x273   :  { %v3029_v21 = vmul.f32 %v5015_v6, %v3028_v16  ;;  %v1005_v22 = vmax.f32 %v746_v17, 0.0  ;;  %v1624_v23 = vadd.f32 %v6087_v53, %v1623_v20  ;;  %v108_v17 = vld [vmem:[%s7130_s0 + $0x2c0] sm:$0xff]  ;;  %v1008_v19 = vmax.f32 %v755_v10, 0.0 }
 0x274   :  { %4521 = vmatmul.msk.f32.gmra.mxu3 %vm153_vm1, %v106_v38 }
 0x275   :  { %v5017_v28 = vpop.eup %5016  ;;  %v3030_v29 = vadd.f32 %v5015_v6, %v3029_v21  ;;  %v4737_v30 = vmul.f32 -1.442695, %v1624_v23  ;;  %4625 = vmatmul.msk.f32.gmra.mxu1 %vm1083_vm2, %v1005_v22 }
 0x276   :  { %v5019_v31 = vpop.eup %5018  ;;  %v2298_v33 = vadd.f32 1.0, %v5017_v28 }
 0x277   :  { %v3034_v34 = vsel %vm3033_vm9, %v5015_v6, %v3030_v29  ;;  %v3042_v35 = vmul.f32 %v5019_v31, %v2297_v8  ;;  %5020 = vpow2.f32 %v4737_v30  ;;  %vm3047_vm11 = vweird.f32 %v5019_v31  ;;  %v6226_v28 = vpop.f32.mrf.mxu3 }
 0x278   :  { %v3039_v36 = vsel %vm3036_vm10, %v3038_v32, %v3034_v34  ;;  %5022 = vrcp.f32 %v2298_v33  ;;  %v748_v37 = vpop.f32.mrf.mxu0  ;;  %vm3048_vm13 = vmor %vm3046_vm12, %vm3047_vm11  ;;  %v3065_v62 = vand.u32 2147483647, %v2298_v33  ;;  %v3067_v63 = vand.u32 2147483648, %v2298_v33 }
 0x279   :  { %4345 = vst.msk [vmem:[%s7134_s5 + $0x158] sm:$0xff] %vm4301_vm6, %v3039_v36  ;;  %v3043_v39 = vsub.f32 1.0, %v3042_v35  ;;  %v749_v40 = vadd.f32 %v6047_v52, %v748_v37  ;;  %vm3061_vm0 = vweird.f32 %v2298_v33  ;;  %v758_v34 = vadd.f32 %v6047_v52, %v6147_v26 }
 0x27a   :  { %v1626_v43 = vpop.f32.mrf.mxu1  ;;  %v3068_v9 = vor.u32 1.1754944e-38, %v3067_v63  ;;  %vm3066_vm4 = vcmp.eq.f32.partialorder %v3065_v62, 8.507059e+37 }
 0x27b   :  { %v3044_v44 = vmul.f32 %v5019_v31, %v3043_v39  ;;  %v1006_v45 = vmax.f32 %v749_v40, 0.0  ;;  %v1627_v12 = vadd.f32 %v6087_v53, %v1626_v43  ;;  %v109_v39 = vld [vmem:[%s7130_s0 + $0x2c8] sm:$0xff]  ;;  %v1009_v41 = vmax.f32 %v758_v34, 0.0 }
 0x27c   :  { %4522 = vmatmul.msk.f32.gmra.mxu3 %vm153_vm1, %v107_v59  ;;  %v110_v59 = vld [vmem:[%s7130_s0 + $0x2d0] sm:$0xff] }
 0x27d   :  { %v5021_v47 = vpop.eup %5020  ;;  %v3045_v48 = vadd.f32 %v5019_v31, %v3044_v44  ;;  %v4738_v49 = vmul.f32 -1.442695, %v1627_v12  ;;  %4626 = vmatmul.msk.f32.vlgmr.msra.gmra.mxu2 %vm1083_vm2, %v1006_v45 }
 0x27e   :  { %v5023_v50 = vpop.eup %5022  ;;  %v2299_v54 = vadd.f32 1.0, %v5021_v47 }
 0x27f   :  { %v3049_v55 = vsel %vm3048_vm13, %v5019_v31, %v3045_v48  ;;  %v3057_v56 = vmul.f32 %v5023_v50, %v2298_v33  ;;  %5024 = vpow2.f32 %v4738_v49  ;;  %vm3062_vm15 = vweird.f32 %v5023_v50  ;;  %v6240_v12 = vpop.f32.mrf.mxu3 }
 0x280   :  { %v3054_v57 = vsel %vm3051_vm14, %v3053_v51, %v3049_v55  ;;  %5026 = vrcp.f32 %v2299_v54  ;;  %v751_v58 = vpop.f32.mrf.mxu0  ;;  %vm3063_vm3 = vmor %vm3061_vm0, %vm3062_vm15  ;;  %v3082_v27 = vand.u32 2147483648, %v2299_v54  ;;  %v3080_v22 = vand.u32 2147483647, %v2299_v54 }
 0x281   :  { %4346 = vst.msk [vmem:[%s7134_s5 + $0x160] sm:$0xff] %vm4301_vm6, %v3054_v57  ;;  %v3058_v60 = vsub.f32 1.0, %v3057_v56  ;;  %v752_v61 = vadd.f32 %v6047_v52, %v751_v58  ;;  %vm3076_vm7 = vweird.f32 %v2299_v54 }
 0x282   :  { %v1629_v0 = vpop.f32.mrf.mxu1  ;;  %v3083_v33 = vor.u32 1.1754944e-38, %v3082_v27  ;;  %vm3081_vm9 = vcmp.eq.f32.partialorder %v3080_v22, 8.507059e+37 }
 0x283   :  { %v3059_v1 = vmul.f32 %v5023_v50, %v3058_v60  ;;  %v1007_v2 = vmax.f32 %v752_v61, 0.0  ;;  %v1630_v4 = vadd.f32 %v6087_v53, %v1629_v0 }
 0x284   :  { %4523 = vmatmul.msk.f32.gmra.mxu3 %vm153_vm1, %v108_v17 }
 0x285   :  { %v5025_v5 = vpop.eup %5024  ;;  %v3060_v6 = vadd.f32 %v5023_v50, %v3059_v1  ;;  %v4739_v7 = vmul.f32 -1.442695, %v1630_v4  ;;  %4627 = vmatmul.msk.f32.gmra.mxu2 %vm1083_vm2, %v1007_v2 }
 0x286   :  { %v5027_v8 = vpop.eup %5026  ;;  %v2300_v13 = vadd.f32 1.0, %v5025_v5 }
 0x287   :  { %v3064_v14 = vsel %vm3063_vm3, %v5023_v50, %v3060_v6  ;;  %v3072_v15 = vmul.f32 %v5027_v8, %v2299_v54  ;;  %5028 = vpow2.f32 %v4739_v7  ;;  %vm3077_vm5 = vweird.f32 %v5027_v8 }
 0x288   :  { %v3069_v16 = vsel %vm3066_vm4, %v3068_v9, %v3064_v14  ;;  %5030 = vrcp.f32 %v2300_v13  ;;  %vm3078_vm8 = vmor %vm3076_vm7, %vm3077_vm5  ;;  %v3097_v26 = vand.u32 2147483648, %v2300_v13  ;;  %v3095_v44 = vand.u32 2147483647, %v2300_v13 }
 0x289   :  { %4347 = vst.msk [vmem:[%s7134_s5 + $0x168] sm:$0xff] %vm4301_vm6, %v3069_v16  ;;  %v3073_v18 = vsub.f32 1.0, %v3072_v15  ;;  %vm3091_vm11 = vweird.f32 %v2300_v13  ;;  %v761_v54 = vadd.f32 %v6047_v52, %v6160_v11  ;;  %v764_v9 = vadd.f32 %v6047_v52, %v6173_v3  ;;  %v111_v16 = vld [vmem:[%s7130_s0 + $0x2d8] sm:$0xff] }
 0x28a   :  { %v1632_v20 = vpop.f32.mrf.mxu1  ;;  %v3098_v51 = vor.u32 1.1754944e-38, %v3097_v26  ;;  %vm3096_vm13 = vcmp.eq.f32.partialorder %v3095_v44, 8.507059e+37 }
 0x28b   :  { %v3074_v21 = vmul.f32 %v5027_v8, %v3073_v18  ;;  %v1633_v23 = vadd.f32 %v6087_v53, %v1632_v20  ;;  %v1010_v61 = vmax.f32 %v761_v54, 0.0  ;;  %v6254_v2 = vpop.f32.mrf.mxu3  ;;  %v1011_v18 = vmax.f32 %v764_v9, 0.0 }
 0x28c   :  { %4524 = vmatmul.msk.f32.gmra.mxu3 %vm153_vm1, %v109_v39 }
 0x28d   :  { %v5029_v29 = vpop.eup %5028  ;;  %v3075_v30 = vadd.f32 %v5027_v8, %v3074_v21  ;;  %v4740_v31 = vmul.f32 -1.442695, %v1633_v23  ;;  %4628 = vmatmul.msk.f32.gmra.mxu2 %vm1083_vm2, %v1008_v19 }
 0x28e   :  { %v5031_v32 = vpop.eup %5030  ;;  %v2301_v35 = vadd.f32 1.0, %v5029_v29 }
 0x28f   :  { %v3079_v36 = vsel %vm3078_vm8, %v5027_v8, %v3075_v30  ;;  %v3087_v37 = vmul.f32 %v5031_v32, %v2300_v13  ;;  %5032 = vpow2.f32 %v4740_v31  ;;  %vm3092_vm10 = vweird.f32 %v5031_v32 }
 0x290   :  { %v3084_v38 = vsel %vm3081_vm9, %v3083_v33, %v3079_v36  ;;  %5034 = vrcp.f32 %v2301_v35  ;;  %vm3093_vm12 = vmor %vm3091_vm11, %vm3092_vm10  ;;  %v3112_v11 = vand.u32 2147483648, %v2301_v35  ;;  %v3110_v0 = vand.u32 2147483647, %v2301_v35 }
 0x291   :  { %4348 = vst.msk [vmem:[%s7134_s5 + $0x170] sm:$0xff] %vm4301_vm6, %v3084_v38  ;;  %v3088_v40 = vsub.f32 1.0, %v3087_v37  ;;  %vm3106_vm15 = vweird.f32 %v2301_v35  ;;  %v767_v33 = vadd.f32 %v6047_v52, %v6186_v24  ;;  %v112_v38 = vld [vmem:[%s7130_s0 + $0x2e0] sm:$0xff] }
 0x292   :  { %v1635_v42 = vpop.f32.mrf.mxu1  ;;  %v3113_v8 = vor.u32 1.1754944e-38, %v3112_v11  ;;  %vm3111_vm3 = vcmp.eq.f32.partialorder %v3110_v0, 8.507059e+37 }
 0x293   :  { %v3089_v43 = vmul.f32 %v5031_v32, %v3088_v40  ;;  %v1636_v45 = vadd.f32 %v6087_v53, %v1635_v42  ;;  %v6268_v22 = vpop.f32.mrf.mxu3  ;;  %v1012_v24 = vmax.f32 %v767_v33, 0.0 }
 0x294   :  { %4525 = vmatmul.msk.f32.gmra.mxu3 %vm153_vm1, %v110_v59 }
 0x295   :  { %v5033_v47 = vpop.eup %5032  ;;  %v3090_v48 = vadd.f32 %v5031_v32, %v3089_v43  ;;  %v4741_v49 = vmul.f32 -1.442695, %v1636_v45  ;;  %4629 = vmatmul.msk.f32.gmra.mxu2 %vm1083_vm2, %v1009_v41 }
 0x296   :  { %v5035_v50 = vpop.eup %5034  ;;  %v2302_v55 = vadd.f32 1.0, %v5033_v47 }
 0x297   :  { %v3094_v56 = vsel %vm3093_vm12, %v5031_v32, %v3090_v48  ;;  %v3102_v57 = vmul.f32 %v5035_v50, %v2301_v35  ;;  %5036 = vpow2.f32 %v4741_v49  ;;  %vm3107_vm14 = vweird.f32 %v5035_v50 }
 0x298   :  { %v3099_v58 = vsel %vm3096_vm13, %v3098_v51, %v3094_v56  ;;  %5038 = vrcp.f32 %v2302_v55  ;;  %vm3108_vm0 = vmor %vm3106_vm15, %vm3107_vm14  ;;  %v3127_v3 = vand.u32 2147483648, %v2302_v55  ;;  %v3125_v20 = vand.u32 2147483647, %v2302_v55 }
 0x299   :  { %4349 = vst.msk [vmem:[%s7134_s5 + $0x178] sm:$0xff] %vm4301_vm6, %v3099_v58  ;;  %v3103_v60 = vsub.f32 1.0, %v3102_v57  ;;  %vm3121_vm5 = vweird.f32 %v2302_v55  ;;  %v113_v58 = vld [vmem:[%s7130_s0 + $0x2e8] sm:$0xff] }
 0x29a   :  { %v1638_v62 = vpop.f32.mrf.mxu1  ;;  %v3128_v32 = vor.u32 1.1754944e-38, %v3127_v3  ;;  %vm3126_vm8 = vcmp.eq.f32.partialorder %v3125_v20, 8.507059e+37 }
 0x29b   :  { %v3104_v63 = vmul.f32 %v5035_v50, %v3103_v60  ;;  %v1639_v1 = vadd.f32 %v6087_v53, %v1638_v62  ;;  %v6282_v43 = vpop.f32.mrf.mxu3 }
 0x29c   :  { %4526 = vmatmul.msk.f32.gmra.mxu3 %vm153_vm1, %v111_v16 }
 0x29d   :  { %v5037_v4 = vpop.eup %5036  ;;  %v3105_v5 = vadd.f32 %v5035_v50, %v3104_v63  ;;  %v4742_v6 = vmul.f32 -1.442695, %v1639_v1  ;;  %4630 = vmatmul.msk.f32.gmra.mxu2 %vm1083_vm2, %v1010_v61 }
 0x29e   :  { %v5039_v7 = vpop.eup %5038  ;;  %v2303_v10 = vadd.f32 1.0, %v5037_v4 }
 0x29f   :  { %v3109_v13 = vsel %vm3108_vm0, %v5035_v50, %v3105_v5  ;;  %v3117_v14 = vmul.f32 %v5039_v7, %v2302_v55  ;;  %5040 = vpow2.f32 %v4742_v6  ;;  %vm3122_vm4 = vweird.f32 %v5039_v7  ;;  %v6288_v50 = vld [vmem:[%s7131_s2] ss:$0 sm:$0xff] }
 0x2a0   :  { %v3114_v15 = vsel %vm3111_vm3, %v3113_v8, %v3109_v13  ;;  %5042 = vrcp.f32 %v2303_v10  ;;  %vm3123_vm7 = vmor %vm3121_vm5, %vm3122_vm4  ;;  %v3142_v52 = vand.u32 2147483648, %v2303_v10  ;;  %v3140_v41 = vand.u32 2147483647, %v2303_v10 }
 0x2a1   :  { %4350 = vst.msk [vmem:[%s7134_s5 + $0x180] sm:$0xff] %vm4301_vm6, %v3114_v15  ;;  %v3118_v17 = vsub.f32 1.0, %v3117_v14  ;;  %vm3136_vm10 = vweird.f32 %v2303_v10  ;;  %v770_v51 = vadd.f32 %v6288_v50, %v6199_v46  ;;  %v773_v8 = vadd.f32 %v6288_v50, %v6212_v25  ;;  %v114_v15 = vld [vmem:[%s7130_s0 + $0x2f0] sm:$0xff] }
 0x2a2   :  { %v1641_v27 = vpop.f32.mrf.mxu1  ;;  %v3143_v49 = vor.u32 1.1754944e-38, %v3142_v52  ;;  %vm3141_vm12 = vcmp.eq.f32.partialorder %v3140_v41, 8.507059e+37 }
 0x2a3   :  { %v3119_v19 = vmul.f32 %v5039_v7, %v3118_v17  ;;  %v1642_v21 = vadd.f32 %v6087_v53, %v1641_v27  ;;  %v1013_v60 = vmax.f32 %v770_v51, 0.0  ;;  %v1014_v17 = vmax.f32 %v773_v8, 0.0 }
 0x2a4   :  { %4527 = vmatmul.msk.f32.gmra.mxu3 %vm153_vm1, %v112_v38 }
 0x2a5   :  { %v5041_v23 = vpop.eup %5040  ;;  %v3120_v29 = vadd.f32 %v5039_v7, %v3119_v19  ;;  %v4743_v30 = vmul.f32 -1.442695, %v1642_v21  ;;  %4631 = vmatmul.msk.f32.gmra.mxu2 %vm1083_vm2, %v1011_v18 }
 0x2a6   :  { %v5043_v31 = vpop.eup %5042  ;;  %v2304_v34 = vadd.f32 1.0, %v5041_v23 }
 0x2a7   :  { %v3124_v35 = vsel %vm3123_vm7, %v5039_v7, %v3120_v29  ;;  %v3132_v36 = vmul.f32 %v5043_v31, %v2303_v10  ;;  %5044 = vpow2.f32 %v4743_v30  ;;  %vm3137_vm9 = vweird.f32 %v5043_v31 }
 0x2a8   :  { %v3129_v37 = vsel %vm3126_vm8, %v3128_v32, %v3124_v35  ;;  %5046 = vrcp.f32 %v2304_v34  ;;  %vm3138_vm11 = vmor %vm3136_vm10, %vm3137_vm9  ;;  %v3157_v46 = vand.u32 2147483648, %v2304_v34  ;;  %v3155_v62 = vand.u32 2147483647, %v2304_v34 }
 0x2a9   :  { %4351 = vst.msk [vmem:[%s7134_s5 + $0x188] sm:$0xff] %vm4301_vm6, %v3129_v37  ;;  %v3133_v39 = vsub.f32 1.0, %v3132_v36  ;;  %vm3151_vm14 = vweird.f32 %v2304_v34  ;;  %v776_v32 = vadd.f32 %v6288_v50, %v6226_v28  ;;  %v115_v37 = vld [vmem:[%s7130_s0 + $0x2f8] sm:$0xff] }
 0x2aa   :  { %v1644_v40 = vpop.f32.mrf.mxu1  ;;  %v3158_v7 = vor.u32 1.1754944e-38, %v3157_v46  ;;  %vm3156_vm0 = vcmp.eq.f32.partialorder %v3155_v62, 8.507059e+37 }
 0x2ab   :  { %v3134_v26 = vmul.f32 %v5043_v31, %v3133_v39  ;;  %v1645_v42 = vadd.f32 %v6087_v53, %v1644_v40  ;;  %v1015_v39 = vmax.f32 %v776_v32, 0.0 }
 0x2ac   :  { %4528 = vmatmul.msk.f32.gmra.mxu3 %vm153_vm1, %v113_v58 }
 0x2ad   :  { %v5045_v44 = vpop.eup %5044  ;;  %v3135_v45 = vadd.f32 %v5043_v31, %v3134_v26  ;;  %v4744_v47 = vmul.f32 -1.442695, %v1645_v42  ;;  %4632 = vmatmul.msk.f32.gmra.mxu2 %vm1083_vm2, %v1012_v24 }
 0x2ae   :  { %v5047_v48 = vpop.eup %5046  ;;  %v2305_v54 = vadd.f32 1.0, %v5045_v44 }
 0x2af   :  { %v3139_v55 = vsel %vm3138_vm11, %v5043_v31, %v3135_v45  ;;  %v3147_v56 = vmul.f32 %v5047_v48, %v2304_v34  ;;  %5048 = vpow2.f32 %v4744_v47  ;;  %vm3152_vm13 = vweird.f32 %v5047_v48  ;;  %v6301_v0 = vpop.f32.mrf.mxu3 }
 0x2b0   :  { %v3144_v57 = vsel %vm3141_vm12, %v3143_v49, %v3139_v55  ;;  %5050 = vrcp.f32 %v2305_v54  ;;  %vm3153_vm15 = vmor %vm3151_vm14, %vm3152_vm13  ;;  %v3172_v25 = vand.u32 2147483648, %v2305_v54  ;;  %v3170_v27 = vand.u32 2147483647, %v2305_v54 }
 0x2b1   :  { %4352 = vst.msk [vmem:[%s7134_s5 + $0x190] sm:$0xff] %vm4301_vm6, %v3144_v57  ;;  %v3148_v59 = vsub.f32 1.0, %v3147_v56  ;;  %vm3166_vm4 = vweird.f32 %v2305_v54  ;;  %v779_v49 = vadd.f32 %v6288_v50, %v6240_v12  ;;  %v116_v56 = vld [vmem:[%s7130_s0 + $0x300] sm:$0xff] }
 0x2b2   :  { %v1647_v11 = vpop.f32.mrf.mxu1  ;;  %v3173_v31 = vor.u32 1.1754944e-38, %v3172_v25  ;;  %vm3171_vm7 = vcmp.eq.f32.partialorder %v3170_v27, 8.507059e+37 }
 0x2b3   :  { %v3149_v61 = vmul.f32 %v5047_v48, %v3148_v59  ;;  %v1648_v63 = vadd.f32 %v6087_v53, %v1647_v11  ;;  %v1016_v58 = vmax.f32 %v779_v49, 0.0  ;;  %v6345_v11 = vld [vmem:[%s7133_s4] ss:$0 sm:$0xff] }
 0x2b4   :  { %4529 = vmatmul.msk.f32.gmra.mxu3 %vm153_vm1, %v114_v15 }
 0x2b5   :  { %v5049_v1 = vpop.eup %5048  ;;  %v3150_v4 = vadd.f32 %v5047_v48, %v3149_v61  ;;  %v4745_v5 = vmul.f32 -1.442695, %v1648_v63  ;;  %4633 = vmatmul.msk.f32.gmra.mxu2 %vm1083_vm2, %v1013_v60 }
 0x2b6   :  { %v5051_v6 = vpop.eup %5050  ;;  %v2306_v9 = vadd.f32 1.0, %v5049_v1 }
 0x2b7   :  { %v3154_v10 = vsel %vm3153_vm15, %v5047_v48, %v3150_v4  ;;  %v3162_v13 = vmul.f32 %v5051_v6, %v2305_v54  ;;  %5052 = vpow2.f32 %v4745_v5  ;;  %vm3167_vm3 = vweird.f32 %v5051_v6  ;;  %v6315_v20 = vpop.f32.mrf.mxu3 }
 0x2b8   :  { %v3159_v14 = vsel %vm3156_vm0, %v3158_v7, %v3154_v10  ;;  %5054 = vrcp.f32 %v2306_v9  ;;  %vm3168_vm5 = vmor %vm3166_vm4, %vm3167_vm3  ;;  %v3187_v28 = vand.u32 2147483648, %v2306_v9  ;;  %v3185_v40 = vand.u32 2147483647, %v2306_v9 }
 0x2b9   :  { %4353 = vst.msk [vmem:[%s7134_s5 + $0x198] sm:$0xff] %vm4301_vm6, %v3159_v14  ;;  %v3163_v16 = vsub.f32 1.0, %v3162_v13  ;;  %vm3181_vm9 = vweird.f32 %v2306_v9  ;;  %v782_v7 = vadd.f32 %v6288_v50, %v6254_v2  ;;  %v117_v14 = vld [vmem:[%s7130_s0 + $0x308] sm:$0xff] }
 0x2ba   :  { %v1650_v3 = vpop.f32.mrf.mxu1  ;;  %v3188_v48 = vor.u32 1.1754944e-38, %v3187_v28  ;;  %vm3186_vm11 = vcmp.eq.f32.partialorder %v3185_v40, 8.507059e+37 }
 0x2bb   :  { %v3164_v18 = vmul.f32 %v5051_v6, %v3163_v16  ;;  %v1651_v19 = vadd.f32 %v6087_v53, %v1650_v3  ;;  %v1017_v16 = vmax.f32 %v782_v7, 0.0 }
 0x2bc   :  { %4530 = vmatmul.msk.f32.gmra.mxu3 %vm153_vm1, %v115_v37 }
 0x2bd   :  { %v5053_v21 = vpop.eup %5052  ;;  %v3165_v23 = vadd.f32 %v5051_v6, %v3164_v18  ;;  %v4746_v29 = vmul.f32 -1.442695, %v1651_v19  ;;  %4634 = vmatmul.msk.f32.gmra.mxu2 %vm1083_vm2, %v1014_v17 }
 0x2be   :  { %v5055_v30 = vpop.eup %5054  ;;  %v2307_v33 = vadd.f32 1.0, %v5053_v21 }
 0x2bf   :  { %v3169_v34 = vsel %vm3168_vm5, %v5051_v6, %v3165_v23  ;;  %v3177_v35 = vmul.f32 %v5055_v30, %v2306_v9  ;;  %5056 = vpow2.f32 %v4746_v29  ;;  %vm3182_vm8 = vweird.f32 %v5055_v30  ;;  %v6329_v41 = vpop.f32.mrf.mxu3 }
 0x2c0   :  { %v3174_v36 = vsel %vm3171_vm7, %v3173_v31, %v3169_v34  ;;  %5058 = vrcp.f32 %v2307_v33  ;;  %vm3183_vm10 = vmor %vm3181_vm9, %vm3182_vm8  ;;  %v3202_v12 = vand.u32 2147483648, %v2307_v33  ;;  %v3200_v60 = vand.u32 2147483647, %v2307_v33 }
 0x2c1   :  { %4354 = vst.msk [vmem:[%s7134_s5 + $0x1a0] sm:$0xff] %vm4301_vm6, %v3174_v36  ;;  %v3178_v38 = vsub.f32 1.0, %v3177_v35  ;;  %vm3196_vm13 = vweird.f32 %v2307_v33  ;;  %v785_v31 = vadd.f32 %v6288_v50, %v6268_v22  ;;  %v118_v36 = vld [vmem:[%s7130_s0 + $0x310] sm:$0xff] }
 0x2c2   :  { %v1653_v52 = vpop.f32.mrf.mxu1  ;;  %v3203_v6 = vor.u32 1.1754944e-38, %v3202_v12  ;;  %vm3201_vm15 = vcmp.eq.f32.partialorder %v3200_v60, 8.507059e+37 }
 0x2c3   :  { %v3179_v24 = vmul.f32 %v5055_v30, %v3178_v38  ;;  %v1654_v26 = vadd.f32 %v6087_v53, %v1653_v52  ;;  %v1018_v38 = vmax.f32 %v785_v31, 0.0 }
 0x2c4   :  { %4531 = vmatmul.msk.f32.gmra.mxu3 %vm153_vm1, %v116_v56 }
 0x2c5   :  { %v5057_v42 = vpop.eup %5056  ;;  %v3180_v44 = vadd.f32 %v5055_v30, %v3179_v24  ;;  %v4747_v45 = vmul.f32 -1.442695, %v1654_v26  ;;  %4635 = vmatmul.msk.f32.gmra.mxu2 %vm1083_vm2, %v1015_v39 }
 0x2c6   :  { %v5059_v47 = vpop.eup %5058  ;;  %v2308_v51 = vadd.f32 1.0, %v5057_v42 }
 0x2c7   :  { %v3184_v54 = vsel %vm3183_vm10, %v5055_v30, %v3180_v44  ;;  %v3192_v55 = vmul.f32 %v5059_v47, %v2307_v33  ;;  %5060 = vpow2.f32 %v4747_v45  ;;  %vm3197_vm12 = vweird.f32 %v5059_v47  ;;  %v6348_v62 = vpop.f32.mrf.mxu3 }
 0x2c8   :  { %v3189_v53 = vsel %vm3186_vm11, %v3188_v48, %v3184_v54  ;;  %5062 = vrcp.f32 %v2308_v51  ;;  %vm3198_vm14 = vmor %vm3196_vm13, %vm3197_vm12  ;;  %v3217_v2 = vand.u32 2147483648, %v2308_v51  ;;  %v3215_v3 = vand.u32 2147483647, %v2308_v51 }
 0x2c9   :  { %4355 = vst.msk [vmem:[%s7134_s5 + $0x1a8] sm:$0xff] %vm4301_vm6, %v3189_v53  ;;  %v3193_v57 = vsub.f32 1.0, %v3192_v55  ;;  %vm3211_vm3 = vweird.f32 %v2308_v51  ;;  %v788_v48 = vadd.f32 %v6288_v50, %v6282_v43  ;;  %v119_v53 = vld [vmem:[%s7130_s0 + $0x318] sm:$0xff] }
 0x2ca   :  { %v1656_v59 = vpop.f32.mrf.mxu1  ;;  %v3218_v30 = vor.u32 1.1754944e-38, %v3217_v2  ;;  %vm3216_vm5 = vcmp.eq.f32.partialorder %v3215_v3, 8.507059e+37 }
 0x2cb   :  { %v3194_v46 = vmul.f32 %v5059_v47, %v3193_v57  ;;  %v1657_v61 = vadd.f32 %v6345_v11, %v1656_v59  ;;  %v1019_v57 = vmax.f32 %v788_v48, 0.0 }
 0x2cc   :  { %4532 = vmatmul.msk.f32.gmra.mxu3 %vm153_vm1, %v117_v14 }
 0x2cd   :  { %v5061_v63 = vpop.eup %5060  ;;  %v3195_v1 = vadd.f32 %v5059_v47, %v3194_v46  ;;  %v4748_v4 = vmul.f32 -1.442695, %v1657_v61  ;;  %4636 = vmatmul.msk.f32.gmra.mxu2 %vm1083_vm2, %v1016_v58 }
 0x2ce   :  { %v5063_v5 = vpop.eup %5062  ;;  %v2309_v8 = vadd.f32 1.0, %v5061_v63 }
 0x2cf   :  { %v3199_v9 = vsel %vm3198_vm14, %v5059_v47, %v3195_v1  ;;  %v3207_v10 = vmul.f32 %v5063_v5, %v2308_v51  ;;  %5064 = vpow2.f32 %v4748_v4  ;;  %vm3212_vm0 = vweird.f32 %v5063_v5  ;;  %v6362_v27 = vpop.f32.mrf.mxu3 }
 0x2d0   :  { %v3204_v13 = vsel %vm3201_vm15, %v3203_v6, %v3199_v9  ;;  %5066 = vrcp.f32 %v2309_v8  ;;  %vm3213_vm4 = vmor %vm3211_vm3, %vm3212_vm0  ;;  %v3232_v22 = vand.u32 2147483648, %v2309_v8  ;;  %v3230_v52 = vand.u32 2147483647, %v2309_v8 }
 0x2d1   :  { %4356 = vst.msk [vmem:[%s7134_s5 + $0x1b0] sm:$0xff] %vm4301_vm6, %v3204_v13  ;;  %v3208_v15 = vsub.f32 1.0, %v3207_v10  ;;  %vm3226_vm8 = vweird.f32 %v2309_v8  ;;  %v791_v6 = vadd.f32 %v6288_v50, %v6301_v0  ;;  %v120_v13 = vld [vmem:[%s7130_s0 + $0x320] sm:$0xff] }
 0x2d2   :  { %v1659_v25 = vpop.f32.mrf.mxu1  ;;  %v3233_v47 = vor.u32 1.1754944e-38, %v3232_v22  ;;  %vm3231_vm10 = vcmp.eq.f32.partialorder %v3230_v52, 8.507059e+37 }
 0x2d3   :  { %v3209_v17 = vmul.f32 %v5063_v5, %v3208_v15  ;;  %v1660_v18 = vadd.f32 %v6345_v11, %v1659_v25  ;;  %v1020_v15 = vmax.f32 %v791_v6, 0.0 }
 0x2d4   :  { %4533 = vmatmul.msk.f32.gmra.mxu3 %vm153_vm1, %v118_v36 }
 0x2d5   :  { %v5065_v19 = vpop.eup %5064  ;;  %v3210_v21 = vadd.f32 %v5063_v5, %v3209_v17  ;;  %v4749_v23 = vmul.f32 -1.442695, %v1660_v18  ;;  %4637 = vmatmul.msk.f32.gmra.mxu2 %vm1083_vm2, %v1017_v16 }
 0x2d6   :  { %v5067_v29 = vpop.eup %5066  ;;  %v2310_v32 = vadd.f32 1.0, %v5065_v19 }
 0x2d7   :  { %v3214_v33 = vsel %vm3213_vm4, %v5063_v5, %v3210_v21  ;;  %v3222_v34 = vmul.f32 %v5067_v29, %v2309_v8  ;;  %5068 = vpow2.f32 %v4749_v23  ;;  %vm3227_vm7 = vweird.f32 %v5067_v29  ;;  %v6376_v40 = vpop.f32.mrf.mxu3 }
 0x2d8   :  { %v3219_v35 = vsel %vm3216_vm5, %v3218_v30, %v3214_v33  ;;  %5070 = vrcp.f32 %v2310_v32  ;;  %vm3228_vm9 = vmor %vm3226_vm8, %vm3227_vm7  ;;  %v3247_v43 = vand.u32 2147483648, %v2310_v32  ;;  %v3245_v59 = vand.u32 2147483647, %v2310_v32 }
 0x2d9   :  { %4357 = vst.msk [vmem:[%s7134_s5 + $0x1b8] sm:$0xff] %vm4301_vm6, %v3219_v35  ;;  %v3223_v37 = vsub.f32 1.0, %v3222_v34  ;;  %vm3241_vm12 = vweird.f32 %v2310_v32  ;;  %v794_v30 = vadd.f32 %v6288_v50, %v6315_v20  ;;  %v121_v35 = vld [vmem:[%s7130_s0 + $0x328] sm:$0xff] }
 0x2da   :  { %v1662_v28 = vpop.f32.mrf.mxu1  ;;  %v3248_v5 = vor.u32 1.1754944e-38, %v3247_v43  ;;  %vm3246_vm14 = vcmp.eq.f32.partialorder %v3245_v59, 8.507059e+37 }
 0x2db   :  { %v3224_v39 = vmul.f32 %v5067_v29, %v3223_v37  ;;  %v1663_v24 = vadd.f32 %v6345_v11, %v1662_v28  ;;  %v1021_v37 = vmax.f32 %v794_v30, 0.0  ;;  %v124_v30 = vld [vmem:[%s7130_s0 + $0x340] sm:$0xff] }
 0x2dc   :  { %4534 = vmatmul.msk.f32.gmra.mxu3 %vm153_vm1, %v119_v53 }
 0x2dd   :  { %v5069_v26 = vpop.eup %5068  ;;  %v3225_v42 = vadd.f32 %v5067_v29, %v3224_v39  ;;  %v4750_v44 = vmul.f32 -1.442695, %v1663_v24  ;;  %4638 = vmatmul.msk.f32.gmra.mxu2 %vm1083_vm2, %v1018_v38 }
 0x2de   :  { %v5071_v45 = vpop.eup %5070  ;;  %v2311_v49 = vadd.f32 1.0, %v5069_v26 }
 0x2df   :  { %v3229_v51 = vsel %vm3228_vm9, %v5067_v29, %v3225_v42  ;;  %v3237_v54 = vmul.f32 %v5071_v45, %v2310_v32  ;;  %5072 = vpow2.f32 %v4750_v44  ;;  %vm3242_vm11 = vweird.f32 %v5071_v45  ;;  %v6390_v60 = vpop.f32.mrf.mxu3 }
 0x2e0   :  { %v3234_v55 = vsel %vm3231_vm10, %v3233_v47, %v3229_v51  ;;  %5074 = vrcp.f32 %v2311_v49  ;;  %vm3243_vm13 = vmor %vm3241_vm12, %vm3242_vm11  ;;  %v3262_v0 = vand.u32 2147483648, %v2311_v49  ;;  %v3260_v25 = vand.u32 2147483647, %v2311_v49 }
 0x2e1   :  { %4358 = vst.msk [vmem:[%s7134_s5 + $0x1c0] sm:$0xff] %vm4301_vm6, %v3234_v55  ;;  %v3238_v56 = vsub.f32 1.0, %v3237_v54  ;;  %vm3256_vm0 = vweird.f32 %v2311_v49  ;;  %v797_v47 = vadd.f32 %v6288_v50, %v6329_v41  ;;  %v122_v55 = vld [vmem:[%s7130_s0 + $0x330] sm:$0xff] }
 0x2e2   :  { %v1665_v12 = vpop.f32.mrf.mxu1  ;;  %v3263_v29 = vor.u32 1.1754944e-38, %v3262_v0  ;;  %vm3261_vm4 = vcmp.eq.f32.partialorder %v3260_v25, 8.507059e+37 }
 0x2e3   :  { %v3239_v58 = vmul.f32 %v5071_v45, %v3238_v56  ;;  %v1666_v46 = vadd.f32 %v6345_v11, %v1665_v12 }
 0x2e4   :  { %4535 = vmatmul.msk.f32.gmra.mxu3 %vm153_vm1, %v120_v13 }
 0x2e5   :  { %v5073_v61 = vpop.eup %5072  ;;  %v3240_v63 = vadd.f32 %v5071_v45, %v3239_v58  ;;  %v4751_v1 = vmul.f32 -1.442695, %v1666_v46  ;;  %4639 = vmatmul.msk.f32.gmra.mxu2 %vm1083_vm2, %v1019_v57  ;;  %v1022_v57 = vmax.f32 %v797_v47, 0.0 }
 0x2e6   :  { %v5075_v4 = vpop.eup %5074  ;;  %v2312_v7 = vadd.f32 1.0, %v5073_v61 }
 0x2e7   :  { %v3244_v8 = vsel %vm3243_vm13, %v5071_v45, %v3240_v63  ;;  %v3252_v9 = vmul.f32 %v5075_v4, %v2311_v49  ;;  %5076 = vpow2.f32 %v4751_v1  ;;  %vm3257_vm15 = vweird.f32 %v5075_v4  ;;  %v6404_v3 = vpop.f32.mrf.mxu3 }
 0x2e8   :  { %v3249_v10 = vsel %vm3246_vm14, %v3248_v5, %v3244_v8  ;;  %5078 = vrcp.f32 %v2312_v7  ;;  %vm3258_vm3 = vmor %vm3256_vm0, %vm3257_vm15  ;;  %v3277_v20 = vand.u32 2147483648, %v2312_v7  ;;  %v3275_v28 = vand.u32 2147483647, %v2312_v7  ;;  %v123_v8 = vld [vmem:[%s7130_s0 + $0x338] sm:$0xff] }
 0x2e9   :  { %4359 = vst.msk [vmem:[%s7134_s5 + $0x1c8] sm:$0xff] %vm4301_vm6, %v3249_v10  ;;  %v3253_v14 = vsub.f32 1.0, %v3252_v9  ;;  %vm3271_vm7 = vweird.f32 %v2312_v7  ;;  %v800_v63 = vadd.f32 %v6288_v50, %v6348_v62 }
 0x2ea   :  { %v1668_v2 = vpop.f32.mrf.mxu1  ;;  %v3278_v45 = vor.u32 1.1754944e-38, %v3277_v20  ;;  %vm3276_vm9 = vcmp.eq.f32.partialorder %v3275_v28, 8.507059e+37 }
 0x2eb   :  { %v3254_v16 = vmul.f32 %v5075_v4, %v3253_v14  ;;  %v1669_v17 = vadd.f32 %v6345_v11, %v1668_v2  ;;  %v1023_v13 = vmax.f32 %v800_v63, 0.0 }
 0x2ec   :  { %4536 = vmatmul.msk.f32.gmra.mxu3 %vm153_vm1, %v121_v35 }
 0x2ed   :  { %v5077_v18 = vpop.eup %5076  ;;  %v3255_v19 = vadd.f32 %v5075_v4, %v3254_v16  ;;  %v4752_v21 = vmul.f32 -1.442695, %v1669_v17  ;;  %4640 = vmatmul.msk.f32.gmra.mxu2 %vm1083_vm2, %v1020_v15 }
 0x2ee   :  { %v5079_v23 = vpop.eup %5078  ;;  %v2313_v31 = vadd.f32 1.0, %v5077_v18  ;;  %v803_v18 = vadd.f32 %v6288_v50, %v6362_v27 }
 0x2ef   :  { %v3259_v32 = vsel %vm3258_vm3, %v5075_v4, %v3255_v19  ;;  %v3267_v33 = vmul.f32 %v5079_v23, %v2312_v7  ;;  %5080 = vpow2.f32 %v4752_v21  ;;  %vm3272_vm5 = vweird.f32 %v5079_v23  ;;  %v6418_v52 = vpop.f32.mrf.mxu3 }
 0x2f0   :  { %v3264_v34 = vsel %vm3261_vm4, %v3263_v29, %v3259_v32  ;;  %5082 = vrcp.f32 %v2313_v31  ;;  %vm3273_vm8 = vmor %vm3271_vm7, %vm3272_vm5  ;;  %v3292_v41 = vand.u32 2147483648, %v2313_v31  ;;  %v3290_v43 = vand.u32 2147483647, %v2313_v31 }
 0x2f1   :  { %4360 = vst.msk [vmem:[%s7134_s5 + $0x1d0] sm:$0xff] %vm4301_vm6, %v3264_v34  ;;  %v3268_v36 = vsub.f32 1.0, %v3267_v33  ;;  %vm3286_vm11 = vweird.f32 %v2313_v31  ;;  %v1024_v33 = vmax.f32 %v803_v18, 0.0 }
 0x2f2   :  { %v1671_v22 = vpop.f32.mrf.mxu1  ;;  %v3293_v61 = vor.u32 1.1754944e-38, %v3292_v41  ;;  %vm3291_vm13 = vcmp.eq.f32.partialorder %v3290_v43, 8.507059e+37  ;;  %v809_v41 = vadd.f32 %v6288_v50, %v6390_v60 }
 0x2f3   :  { %v3269_v38 = vmul.f32 %v5079_v23, %v3268_v36  ;;  %v1672_v39 = vadd.f32 %v6345_v11, %v1671_v22 }
 0x2f4   :  { %4537 = vmatmul.msk.f32.gmra.mxu3 %vm153_vm1, %v122_v55 }
 0x2f5   :  { %v5081_v24 = vpop.eup %5080  ;;  %v3270_v26 = vadd.f32 %v5079_v23, %v3269_v38  ;;  %v4753_v42 = vmul.f32 -1.442695, %v1672_v39  ;;  %4641 = vmatmul.msk.f32.gmra.mxu2 %vm1083_vm2, %v1021_v37 }
 0x2f6   :  { %v5083_v44 = vpop.eup %5082  ;;  %v2314_v48 = vadd.f32 1.0, %v5081_v24  ;;  %v806_v24 = vadd.f32 %v6288_v50, %v6376_v40 }
 0x2f7   :  { %v3274_v49 = vsel %vm3273_vm8, %v5079_v23, %v3270_v26  ;;  %v3282_v51 = vmul.f32 %v5083_v44, %v2313_v31  ;;  %5084 = vpow2.f32 %v4753_v42  ;;  %vm3287_vm10 = vweird.f32 %v5083_v44  ;;  %v6431_v12 = vpop.f32.mrf.mxu3 }
 0x2f8   :  { %v3279_v54 = vsel %vm3276_vm9, %v3278_v45, %v3274_v49  ;;  %5086 = vrcp.f32 %v2314_v48  ;;  %vm3288_vm12 = vmor %vm3286_vm11, %vm3287_vm10  ;;  %v3307_v62 = vand.u32 2147483648, %v2314_v48  ;;  %v3305_v0 = vand.u32 2147483647, %v2314_v48 }
 0x2f9   :  { %4361 = vst.msk [vmem:[%s7134_s5 + $0x1d8] sm:$0xff] %vm4301_vm6, %v3279_v54  ;;  %v3283_v53 = vsub.f32 1.0, %v3282_v51  ;;  %vm3301_vm15 = vweird.f32 %v2314_v48 }
 0x2fa   :  { %v3308_v17 = vor.u32 1.1754944e-38, %v3307_v62  ;;  %vm3306_vm3 = vcmp.eq.f32.partialorder %v3305_v0, 8.507059e+37 }
 0x2fb   :  { %v3284_v56 = vmul.f32 %v5083_v44, %v3283_v53 }
 0x2fc   :  { %4538 = vmatmul.msk.f32.gmra.mxu3 %vm153_vm1, %v123_v8 }
 0x2fd   :  { %v5085_v58 = vpop.eup %5084  ;;  %v3285_v59 = vadd.f32 %v5083_v44, %v3284_v56  ;;  %4642 = vmatmul.msk.f32.gmra.mxu2 %vm1083_vm2, %v1022_v57  ;;  %v126_v57 = vld [vmem:[%s7130_s0 + $0x350] sm:$0xff] }
 0x2fe   :  { %v5087_v46 = vpop.eup %5086  ;;  %v2315_v1 = vadd.f32 1.0, %v5085_v58 }
 0x2ff   :  { %v3289_v4 = vsel %vm3288_vm12, %v5083_v44, %v3285_v59  ;;  %v3297_v5 = vmul.f32 %v5087_v46, %v2314_v48  ;;  %vm3302_vm14 = vweird.f32 %v5087_v46  ;;  %v6445_v2 = vpop.f32.mrf.mxu3  ;;  %v125_v44 = vld [vmem:[%s7130_s0 + $0x348] sm:$0xff]  ;;  %v1025_v48 = vmax.f32 %v806_v24, 0.0 }
 0x300   :  { %v3294_v6 = vsel %vm3291_vm13, %v3293_v61, %v3289_v4  ;;  %5088 = vrcp.f32 %v2315_v1  ;;  %v1674_v7 = vpop.f32.mrf.mxu2  ;;  %vm3303_vm0 = vmor %vm3301_vm15, %vm3302_vm14  ;;  %v3322_v27 = vand.u32 2147483648, %v2315_v1  ;;  %v3320_v36 = vand.u32 2147483647, %v2315_v1 }
 0x301   :  { %4362 = vst.msk [vmem:[%s7134_s5 + $0x1e0] sm:$0xff] %vm4301_vm6, %v3294_v6  ;;  %v3298_v9 = vsub.f32 1.0, %v3297_v5  ;;  %v1675_v10 = vadd.f32 %v6345_v11, %v1674_v7  ;;  %vm3316_vm5 = vweird.f32 %v2315_v1 }
 0x302   :  { %v3323_v28 = vor.u32 1.1754944e-38, %v3322_v27  ;;  %vm3321_vm8 = vcmp.eq.f32.partialorder %v3320_v36, 8.507059e+37 }
 0x303   :  { %v3299_v14 = vmul.f32 %v5087_v46, %v3298_v9  ;;  %v4754_v15 = vmul.f32 -1.442695, %v1675_v10 }
 0x304   :  { %4539 = vmatmul.msk.f32.gmra.mxu3 %vm153_vm1, %v124_v30 }
 0x305   :  { %v3300_v16 = vadd.f32 %v5087_v46, %v3299_v14  ;;  %5090 = vpow2.f32 %v4754_v15  ;;  %4643 = vmatmul.msk.f32.gmra.mxu2 %vm1083_vm2, %v1023_v13  ;;  %v812_v13 = vadd.f32 %v6288_v50, %v6404_v3  ;;  %v127_v15 = vld [vmem:[%s7130_s0 + $0x358] sm:$0xff] }
 0x306   :  { %v5089_v25 = vpop.eup %5088 }
 0x307   :  { %v3304_v19 = vsel %vm3303_vm0, %v5087_v46, %v3300_v16  ;;  %v3312_v21 = vmul.f32 %v5089_v25, %v2315_v1  ;;  %vm3317_vm4 = vweird.f32 %v5089_v25  ;;  %v6459_v22 = vpop.f32.mrf.mxu3  ;;  %v1026_v1 = vmax.f32 %v809_v41, 0.0 }
 0x308   :  { %v3309_v23 = vsel %vm3306_vm3, %v3308_v17, %v3304_v19  ;;  %v1677_v29 = vpop.f32.mrf.mxu2  ;;  %vm3318_vm7 = vmor %vm3316_vm5, %vm3317_vm4 }
 0x309   :  { %4363 = vst.msk [vmem:[%s7134_s5 + $0x1e8] sm:$0xff] %vm4301_vm6, %v3309_v23  ;;  %v3313_v31 = vsub.f32 1.0, %v3312_v21  ;;  %v1678_v32 = vadd.f32 %v6345_v11, %v1677_v29  ;;  %v1027_v21 = vmax.f32 %v812_v13, 0.0 }
 0x30b   :  { %v5091_v34 = vpop.eup %5090  ;;  %v3314_v35 = vmul.f32 %v5089_v25, %v3313_v31  ;;  %v4755_v20 = vmul.f32 -1.442695, %v1678_v32 }
 0x30c   :  { %v2316_v37 = vadd.f32 1.0, %v5091_v34  ;;  %4540 = vmatmul.msk.f32.gmra.mxu3 %vm153_vm1, %v125_v44 }
 0x30d   :  { %v3315_v38 = vadd.f32 %v5089_v25, %v3314_v35  ;;  %5092 = vpow2.f32 %v4755_v20  ;;  %4644 = vmatmul.msk.f32.gmra.mxu2 %vm1083_vm2, %v1024_v33  ;;  %v815_v35 = vadd.f32 %v6288_v50, %v6418_v52 }
 0x30e   :  { %5094 = vrcp.f32 %v2316_v37  ;;  %v3337_v56 = vand.u32 2147483648, %v2316_v37  ;;  %v3335_v59 = vand.u32 2147483647, %v2316_v37  ;;  %vm3331_vm10 = vweird.f32 %v2316_v37 }
 0x30f   :  { %v3319_v39 = vsel %vm3318_vm7, %v5089_v25, %v3315_v38  ;;  %v6473_v54 = vpop.f32.mrf.mxu3 }
 0x310   :  { %v3324_v26 = vsel %vm3321_vm8, %v3323_v28, %v3319_v39  ;;  %v1680_v42 = vpop.f32.mrf.mxu2  ;;  %v3338_v60 = vor.u32 1.1754944e-38, %v3337_v56  ;;  %vm3336_vm12 = vcmp.eq.f32.partialorder %v3335_v59, 8.507059e+37 }
 0x311   :  { %4364 = vst.msk [vmem:[%s7134_s5 + $0x1f0] sm:$0xff] %vm4301_vm6, %v3324_v26  ;;  %v1681_v45 = vadd.f32 %v6345_v11, %v1680_v42  ;;  %v1028_v42 = vmax.f32 %v815_v35, 0.0 }
 0x313   :  { %v5093_v47 = vpop.eup %5092  ;;  %v4756_v49 = vmul.f32 -1.442695, %v1681_v45 }
 0x314   :  { %v5095_v51 = vpop.eup %5094  ;;  %v2317_v40 = vadd.f32 1.0, %v5093_v47  ;;  %4541 = vmatmul.msk.f32.gmra.mxu3 %vm153_vm1, %v126_v57 }
 0x315   :  { %v3327_v55 = vmul.f32 %v5095_v51, %v2316_v37  ;;  %5096 = vpow2.f32 %v4756_v49  ;;  %4645 = vmatmul.msk.f32.gmra.mxu2 %vm1083_vm2, %v1025_v48  ;;  %vm3332_vm9 = vweird.f32 %v5095_v51  ;;  %v128_v37 = vld [vmem:[%s7130_s0 + $0x360] sm:$0xff] }
 0x316   :  { %5098 = vrcp.f32 %v2317_v40  ;;  %vm3333_vm11 = vmor %vm3331_vm10, %vm3332_vm9  ;;  %v3352_v14 = vand.u32 2147483648, %v2317_v40  ;;  %v3350_v25 = vand.u32 2147483647, %v2317_v40  ;;  %vm3346_vm14 = vweird.f32 %v2317_v40 }
 0x317   :  { %v3328_v53 = vsub.f32 1.0, %v3327_v55  ;;  %v6483_v7 = vpop.f32.mrf.mxu3 }
 0x318   :  { %v1683_v43 = vpop.f32.mrf.mxu2  ;;  %v3353_v3 = vor.u32 1.1754944e-38, %v3352_v14  ;;  %vm3351_vm0 = vcmp.eq.f32.partialorder %v3350_v25, 8.507059e+37 }
 0x319   :  { %v3329_v58 = vmul.f32 %v5095_v51, %v3328_v53  ;;  %v1684_v46 = vadd.f32 %v6345_v11, %v1683_v43  ;;  %v818_v53 = vadd.f32 %v6288_v50, %v6431_v12  ;;  %v129_v43 = vld [vmem:[%s7130_s0 + $0x368] sm:$0xff] }
 0x31b   :  { %v5097_v61 = vpop.eup %5096  ;;  %v3330_v63 = vadd.f32 %v5095_v51, %v3329_v58  ;;  %v4757_v4 = vmul.f32 -1.442695, %v1684_v46 }
 0x31c   :  { %v5099_v5 = vpop.eup %5098  ;;  %v2318_v6 = vadd.f32 1.0, %v5097_v61  ;;  %4542 = vmatmul.msk.f32.gmra.mxu3 %vm153_vm1, %v127_v15 }
 0x31d   :  { %v3334_v8 = vsel %vm3333_vm11, %v5095_v51, %v3330_v63  ;;  %v3342_v9 = vmul.f32 %v5099_v5, %v2317_v40  ;;  %5100 = vpow2.f32 %v4757_v4  ;;  %4646 = vmatmul.msk.f32.gmra.mxu2 %vm1083_vm2, %v1026_v1  ;;  %vm3347_vm13 = vweird.f32 %v5099_v5 }
 0x31e   :  { %v3339_v10 = vsel %vm3336_vm12, %v3338_v60, %v3334_v8  ;;  %5102 = vrcp.f32 %v2318_v6  ;;  %vm3348_vm15 = vmor %vm3346_vm14, %vm3347_vm13  ;;  %v3367_v36 = vand.u32 2147483648, %v2318_v6  ;;  %v3365_v28 = vand.u32 2147483647, %v2318_v6 }
 0x31f   :  { %4365 = vst.msk [vmem:[%s7134_s5 + $0x1f8] sm:$0xff] %vm4301_vm6, %v3339_v10  ;;  %v3343_v62 = vsub.f32 1.0, %v3342_v9  ;;  %v6497_v31 = vpop.f32.mrf.mxu3  ;;  %vm3361_vm4 = vweird.f32 %v2318_v6  ;;  %v1029_v63 = vmax.f32 %v818_v53, 0.0 }
 0x320   :  { %v1686_v0 = vpop.f32.mrf.mxu2  ;;  %v3368_v52 = vor.u32 1.1754944e-38, %v3367_v36  ;;  %vm3366_vm7 = vcmp.eq.f32.partialorder %v3365_v28, 8.507059e+37 }
 0x321   :  { %v3344_v16 = vmul.f32 %v5099_v5, %v3343_v62  ;;  %v1687_v17 = vadd.f32 %v6345_v11, %v1686_v0  ;;  %v821_v62 = vadd.f32 %v6288_v50, %v6445_v2  ;;  %v130_v0 = vld [vmem:[%s7130_s0 + $0x370] sm:$0xff] }
 0x323   :  { %v5101_v18 = vpop.eup %5100  ;;  %v3345_v19 = vadd.f32 %v5099_v5, %v3344_v16  ;;  %v4758_v23 = vmul.f32 -1.442695, %v1687_v17 }
 0x324   :  { %v5103_v29 = vpop.eup %5102  ;;  %v2319_v30 = vadd.f32 1.0, %v5101_v18  ;;  %4543 = vmatmul.msk.f32.gmra.mxu3 %vm153_vm1, %v128_v37 }
 0x325   :  { %v3349_v32 = vsel %vm3348_vm15, %v5099_v5, %v3345_v19  ;;  %v3357_v27 = vmul.f32 %v5103_v29, %v2318_v6  ;;  %5104 = vpow2.f32 %v4758_v23  ;;  %4647 = vmatmul.msk.f32.gmra.mxu2 %vm1083_vm2, %v1027_v21  ;;  %vm3362_vm3 = vweird.f32 %v5103_v29 }
 0x326   :  { %v3354_v33 = vsel %vm3351_vm0, %v3353_v3, %v3349_v32  ;;  %5106 = vrcp.f32 %v2319_v30  ;;  %vm3363_vm5 = vmor %vm3361_vm4, %vm3362_vm3  ;;  %v3382_v41 = vand.u32 2147483648, %v2319_v30  ;;  %v3380_v58 = vand.u32 2147483647, %v2319_v30 }
 0x327   :  { %4366 = vst.msk [vmem:[%s7134_s5 + $0x200] sm:$0xff] %vm4301_vm6, %v3354_v33  ;;  %v3358_v34 = vsub.f32 1.0, %v3357_v27  ;;  %v6511_v48 = vpop.f32.mrf.mxu3  ;;  %vm3376_vm9 = vweird.f32 %v2319_v30  ;;  %v1030_v19 = vmax.f32 %v821_v62, 0.0 }
 0x328   :  { %v1689_v20 = vpop.f32.mrf.mxu2  ;;  %v3383_v12 = vor.u32 1.1754944e-38, %v3382_v41  ;;  %vm3381_vm11 = vcmp.eq.f32.partialorder %v3380_v58, 8.507059e+37 }
 0x329   :  { %v3359_v38 = vmul.f32 %v5103_v29, %v3358_v34  ;;  %v1690_v39 = vadd.f32 %v6345_v11, %v1689_v20  ;;  %v824_v34 = vadd.f32 %v6288_v50, %v6459_v22  ;;  %v131_v20 = vld [vmem:[%s7130_s0 + $0x378] sm:$0xff] }
 0x32b   :  { %v5105_v24 = vpop.eup %5104  ;;  %v3360_v26 = vadd.f32 %v5103_v29, %v3359_v38  ;;  %v4759_v44 = vmul.f32 -1.442695, %v1690_v39 }
 0x32c   :  { %v5107_v45 = vpop.eup %5106  ;;  %v2320_v47 = vadd.f32 1.0, %v5105_v24  ;;  %4544 = vmatmul.msk.f32.gmra.mxu3 %vm153_vm1, %v129_v43 }
 0x32d   :  { %v3364_v49 = vsel %vm3363_vm5, %v5103_v29, %v3360_v26  ;;  %v3372_v51 = vmul.f32 %v5107_v45, %v2319_v30  ;;  %5108 = vpow2.f32 %v4759_v44  ;;  %4648 = vmatmul.msk.f32.gmra.mxu2 %vm1083_vm2, %v1028_v42  ;;  %vm3377_vm8 = vweird.f32 %v5107_v45 }
 0x32e   :  { %v3369_v40 = vsel %vm3366_vm7, %v3368_v52, %v3364_v49  ;;  %5110 = vrcp.f32 %v2320_v47  ;;  %vm3378_vm10 = vmor %vm3376_vm9, %vm3377_vm8  ;;  %v3397_v13 = vand.u32 2147483648, %v2320_v47  ;;  %v3395_v16 = vand.u32 2147483647, %v2320_v47 }
 0x32f   :  { %4367 = vst.msk [vmem:[%s7134_s5 + $0x208] sm:$0xff] %vm4301_vm6, %v3369_v40  ;;  %v3373_v55 = vsub.f32 1.0, %v3372_v51  ;;  %v6525_v60 = vpop.f32.mrf.mxu3  ;;  %vm3391_vm13 = vweird.f32 %v2320_v47  ;;  %v1031_v26 = vmax.f32 %v824_v34, 0.0  ;;  %v6563_v40 = vld [vmem:[%s7131_s2] ss:$0 sm:$0xff] }
 0x330   :  { %v1692_v56 = vpop.f32.mrf.mxu2  ;;  %v3398_v2 = vor.u32 1.1754944e-38, %v3397_v13  ;;  %vm3396_vm15 = vcmp.eq.f32.partialorder %v3395_v16, 8.507059e+37 }
 0x331   :  { %v3374_v57 = vmul.f32 %v5107_v45, %v3373_v55  ;;  %v1693_v59 = vadd.f32 %v6345_v11, %v1692_v56  ;;  %v827_v55 = vadd.f32 %v6563_v40, %v6473_v54  ;;  %v132_v56 = vld [vmem:[%s7130_s0 + $0x380] sm:$0xff] }
 0x333   :  { %v5109_v46 = vpop.eup %5108  ;;  %v3375_v61 = vadd.f32 %v5107_v45, %v3374_v57  ;;  %v4760_v1 = vmul.f32 -1.442695, %v1693_v59 }
 0x334   :  { %v5111_v4 = vpop.eup %5110  ;;  %v2321_v5 = vadd.f32 1.0, %v5109_v46  ;;  %4545 = vmatmul.msk.f32.gmra.mxu3 %vm153_vm1, %v130_v0 }
 0x335   :  { %v3379_v6 = vsel %vm3378_vm10, %v5107_v45, %v3375_v61  ;;  %v3387_v8 = vmul.f32 %v5111_v4, %v2320_v47  ;;  %5112 = vpow2.f32 %v4760_v1  ;;  %4649 = vmatmul.msk.f32.gmra.mxu2 %vm1083_vm2, %v1029_v63  ;;  %vm3392_vm12 = vweird.f32 %v5111_v4 }
 0x336   :  { %v3384_v9 = vsel %vm3381_vm11, %v3383_v12, %v3379_v6  ;;  %5114 = vrcp.f32 %v2321_v5  ;;  %vm3393_vm14 = vmor %vm3391_vm13, %vm3392_vm12  ;;  %v3412_v35 = vand.u32 2147483648, %v2321_v5  ;;  %v3410_v38 = vand.u32 2147483647, %v2321_v5 }
 0x337   :  { %4368 = vst.msk [vmem:[%s7134_s5 + $0x210] sm:$0xff] %vm4301_vm6, %v3384_v9  ;;  %v3388_v10 = vsub.f32 1.0, %v3387_v8  ;;  %v6539_v3 = vpop.f32.mrf.mxu3  ;;  %vm3406_vm3 = vweird.f32 %v2321_v5  ;;  %v1032_v61 = vmax.f32 %v827_v55, 0.0 }
 0x338   :  { %v1695_v14 = vpop.f32.mrf.mxu2  ;;  %v3413_v50 = vor.u32 1.1754944e-38, %v3412_v35  ;;  %vm3411_vm5 = vcmp.eq.f32.partialorder %v3410_v38, 8.507059e+37 }
 0x339   :  { %v3389_v15 = vmul.f32 %v5111_v4, %v3388_v10  ;;  %v1696_v25 = vadd.f32 %v6345_v11, %v1695_v14  ;;  %v830_v10 = vadd.f32 %v6563_v40, %v6483_v7  ;;  %v133_v14 = vld [vmem:[%s7130_s0 + $0x388] sm:$0xff] }
 0x33b   :  { %v5113_v17 = vpop.eup %5112  ;;  %v3390_v18 = vadd.f32 %v5111_v4, %v3389_v15  ;;  %v4761_v21 = vmul.f32 -1.442695, %v1696_v25 }
 0x33c   :  { %v5115_v23 = vpop.eup %5114  ;;  %v2322_v29 = vadd.f32 1.0, %v5113_v17  ;;  %4546 = vmatmul.msk.f32.gmra.mxu3 %vm153_vm1, %v131_v20 }
 0x33d   :  { %v3394_v30 = vsel %vm3393_vm14, %v5111_v4, %v3390_v18  ;;  %v3402_v32 = vmul.f32 %v5115_v23, %v2321_v5  ;;  %5116 = vpow2.f32 %v4761_v21  ;;  %4650 = vmatmul.msk.f32.gmra.mxu2 %vm1083_vm2, %v1030_v19  ;;  %vm3407_vm0 = vweird.f32 %v5115_v23 }
 0x33e   :  { %v3399_v27 = vsel %vm3396_vm15, %v3398_v2, %v3394_v30  ;;  %5118 = vrcp.f32 %v2322_v29  ;;  %vm3408_vm4 = vmor %vm3406_vm3, %vm3407_vm0  ;;  %v3427_v53 = vand.u32 2147483648, %v2322_v29  ;;  %v3425_v57 = vand.u32 2147483647, %v2322_v29 }
 0x33f   :  { %4369 = vst.msk [vmem:[%s7134_s5 + $0x218] sm:$0xff] %vm4301_vm6, %v3399_v27  ;;  %v3403_v33 = vsub.f32 1.0, %v3402_v32  ;;  %v6553_v45 = vpop.f32.mrf.mxu3  ;;  %vm3421_vm8 = vweird.f32 %v2322_v29  ;;  %v1033_v18 = vmax.f32 %v830_v10, 0.0 }
 0x340   :  { %v1698_v36 = vpop.f32.mrf.mxu2  ;;  %v3428_v54 = vor.u32 1.1754944e-38, %v3427_v53  ;;  %vm3426_vm10 = vcmp.eq.f32.partialorder %v3425_v57, 8.507059e+37 }
 0x341   :  { %v3404_v37 = vmul.f32 %v5115_v23, %v3403_v33  ;;  %v1699_v28 = vadd.f32 %v6345_v11, %v1698_v36  ;;  %v833_v33 = vadd.f32 %v6563_v40, %v6497_v31  ;;  %v134_v36 = vld [vmem:[%s7130_s0 + $0x390] sm:$0xff] }
 0x343   :  { %v5117_v39 = vpop.eup %5116  ;;  %v3405_v24 = vadd.f32 %v5115_v23, %v3404_v37  ;;  %v4762_v42 = vmul.f32 -1.442695, %v1699_v28 }
 0x344   :  { %v5119_v44 = vpop.eup %5118  ;;  %v2323_v22 = vadd.f32 1.0, %v5117_v39  ;;  %4547 = vmatmul.msk.f32.gmra.mxu3 %vm153_vm1, %v132_v56 }
 0x345   :  { %v3409_v52 = vsel %vm3408_vm4, %v5115_v23, %v3405_v24  ;;  %v3417_v47 = vmul.f32 %v5119_v44, %v2322_v29  ;;  %5120 = vpow2.f32 %v4762_v42  ;;  %4651 = vmatmul.msk.f32.gmra.mxu2 %vm1083_vm2, %v1031_v26  ;;  %vm3422_vm7 = vweird.f32 %v5119_v44 }
 0x346   :  { %v3414_v49 = vsel %vm3411_vm5, %v3413_v50, %v3409_v52  ;;  %5122 = vrcp.f32 %v2323_v22  ;;  %vm3423_vm9 = vmor %vm3421_vm8, %vm3422_vm7  ;;  %v3442_v62 = vand.u32 2147483648, %v2323_v22  ;;  %v3440_v15 = vand.u32 2147483647, %v2323_v22 }
 0x347   :  { %4370 = vst.msk [vmem:[%s7134_s5 + $0x220] sm:$0xff] %vm4301_vm6, %v3414_v49  ;;  %v3418_v51 = vsub.f32 1.0, %v3417_v47  ;;  %v6572_v12 = vpop.f32.mrf.mxu3  ;;  %vm3436_vm12 = vweird.f32 %v2323_v22  ;;  %v1034_v24 = vmax.f32 %v833_v33, 0.0 }
 0x348   :  { %v1701_v41 = vpop.f32.mrf.mxu2  ;;  %v3443_v7 = vor.u32 1.1754944e-38, %v3442_v62  ;;  %vm3441_vm14 = vcmp.eq.f32.partialorder %v3440_v15, 8.507059e+37  ;;  %v136_v62 = vld [vmem:[%s7130_s0 + $0x3a0] sm:$0xff] }
 0x349   :  { %v3419_v43 = vmul.f32 %v5119_v44, %v3418_v51  ;;  %v1702_v58 = vadd.f32 %v6345_v11, %v1701_v41  ;;  %v836_v51 = vadd.f32 %v6563_v40, %v6511_v48  ;;  %v135_v41 = vld [vmem:[%s7130_s0 + $0x398] sm:$0xff] }
 0x34b   :  { %v5121_v59 = vpop.eup %5120  ;;  %v3420_v46 = vadd.f32 %v5119_v44, %v3419_v43  ;;  %v4763_v63 = vmul.f32 -1.442695, %v1702_v58 }
 0x34c   :  { %v5123_v1 = vpop.eup %5122  ;;  %v2324_v4 = vadd.f32 1.0, %v5121_v59  ;;  %4548 = vmatmul.msk.f32.gmra.mxu3 %vm153_vm1, %v133_v14 }
 0x34d   :  { %v3424_v5 = vsel %vm3423_vm9, %v5119_v44, %v3420_v46  ;;  %v3432_v6 = vmul.f32 %v5123_v1, %v2323_v22  ;;  %5124 = vpow2.f32 %v4763_v63  ;;  %4652 = vmatmul.msk.f32.gmra.mxu2 %vm1083_vm2, %v1032_v61  ;;  %vm3437_vm11 = vweird.f32 %v5123_v1 }
 0x34e   :  { %v3429_v8 = vsel %vm3426_vm10, %v3428_v54, %v3424_v5  ;;  %5126 = vrcp.f32 %v2324_v4  ;;  %vm3438_vm13 = vmor %vm3436_vm12, %vm3437_vm11  ;;  %v3457_v34 = vand.u32 2147483648, %v2324_v4  ;;  %v3455_v37 = vand.u32 2147483647, %v2324_v4 }
 0x34f   :  { %4371 = vst.msk [vmem:[%s7134_s5 + $0x228] sm:$0xff] %vm4301_vm6, %v3429_v8  ;;  %v3433_v9 = vsub.f32 1.0, %v3432_v6  ;;  %v6586_v2 = vpop.f32.mrf.mxu3  ;;  %vm3451_vm0 = vweird.f32 %v2324_v4  ;;  %v1035_v46 = vmax.f32 %v836_v51, 0.0  ;;  %v839_v8 = vadd.f32 %v6563_v40, %v6525_v60 }
 0x350   :  { %v1704_v13 = vpop.f32.mrf.mxu2  ;;  %v3458_v31 = vor.u32 1.1754944e-38, %v3457_v34  ;;  %vm3456_vm4 = vcmp.eq.f32.partialorder %v3455_v37, 8.507059e+37 }
 0x351   :  { %v3434_v0 = vmul.f32 %v5123_v1, %v3433_v9  ;;  %v1705_v16 = vadd.f32 %v6345_v11, %v1704_v13 }
 0x353   :  { %v5125_v25 = vpop.eup %5124  ;;  %v3435_v17 = vadd.f32 %v5123_v1, %v3434_v0  ;;  %v4764_v19 = vmul.f32 -1.442695, %v1705_v16  ;;  %v6629_v0 = vld [vmem:[%s7133_s4] ss:$0 sm:$0xff] }
 0x354   :  { %v5127_v21 = vpop.eup %5126  ;;  %v2325_v23 = vadd.f32 1.0, %v5125_v25  ;;  %4549 = vmatmul.msk.f32.gmra.mxu3 %vm153_vm1, %v134_v36  ;;  %v1036_v25 = vmax.f32 %v839_v8, 0.0 }
 0x355   :  { %v3439_v29 = vsel %vm3438_vm13, %v5123_v1, %v3435_v17  ;;  %v3447_v30 = vmul.f32 %v5127_v21, %v2324_v4  ;;  %5128 = vpow2.f32 %v4764_v19  ;;  %4653 = vmatmul.msk.f32.gmra.mxu2 %vm1083_vm2, %v1033_v18  ;;  %vm3452_vm15 = vweird.f32 %v5127_v21 }
 0x356   :  { %v3444_v32 = vsel %vm3441_vm14, %v3443_v7, %v3439_v29  ;;  %5130 = vrcp.f32 %v2325_v23  ;;  %vm3453_vm3 = vmor %vm3451_vm0, %vm3452_vm15  ;;  %v3472_v55 = vand.u32 2147483648, %v2325_v23  ;;  %v3470_v43 = vand.u32 2147483647, %v2325_v23 }
 0x357   :  { %4372 = vst.msk [vmem:[%s7134_s5 + $0x230] sm:$0xff] %vm4301_vm6, %v3444_v32  ;;  %v3448_v27 = vsub.f32 1.0, %v3447_v30  ;;  %v6600_v50 = vpop.f32.mrf.mxu3  ;;  %vm3466_vm7 = vweird.f32 %v2325_v23 }
 0x358   :  { %v1707_v35 = vpop.f32.mrf.mxu2  ;;  %v3473_v48 = vor.u32 1.1754944e-38, %v3472_v55  ;;  %vm3471_vm9 = vcmp.eq.f32.partialorder %v3470_v43, 8.507059e+37 }
 0x359   :  { %v3449_v20 = vmul.f32 %v5127_v21, %v3448_v27  ;;  %v1708_v38 = vadd.f32 %v6345_v11, %v1707_v35  ;;  %v842_v27 = vadd.f32 %v6563_v40, %v6539_v3  ;;  %v137_v35 = vld [vmem:[%s7130_s0 + $0x3a8] sm:$0xff] }
 0x35b   :  { %v5129_v28 = vpop.eup %5128  ;;  %v3450_v39 = vadd.f32 %v5127_v21, %v3449_v20  ;;  %v4765_v26 = vmul.f32 -1.442695, %v1708_v38 }
 0x35c   :  { %v5131_v42 = vpop.eup %5130  ;;  %v2326_v44 = vadd.f32 1.0, %v5129_v28  ;;  %4550 = vmatmul.msk.f32.gmra.mxu3 %vm153_vm1, %v135_v41 }
 0x35d   :  { %v3454_v22 = vsel %vm3453_vm3, %v5127_v21, %v3450_v39  ;;  %v3462_v52 = vmul.f32 %v5131_v42, %v2325_v23  ;;  %5132 = vpow2.f32 %v4765_v26  ;;  %4654 = vmatmul.msk.f32.gmra.mxu2 %vm1083_vm2, %v1034_v24  ;;  %vm3467_vm5 = vweird.f32 %v5131_v42 }
 0x35e   :  { %v3459_v47 = vsel %vm3456_vm4, %v3458_v31, %v3454_v22  ;;  %5134 = vrcp.f32 %v2326_v44  ;;  %vm3468_vm8 = vmor %vm3466_vm7, %vm3467_vm5  ;;  %v3487_v9 = vand.u32 2147483648, %v2326_v44  ;;  %v3485_v14 = vand.u32 2147483647, %v2326_v44 }
 0x35f   :  { %4373 = vst.msk [vmem:[%s7134_s5 + $0x238] sm:$0xff] %vm4301_vm6, %v3459_v47  ;;  %v3463_v49 = vsub.f32 1.0, %v3462_v52  ;;  %v6614_v54 = vpop.f32.mrf.mxu3  ;;  %vm3481_vm11 = vweird.f32 %v2326_v44  ;;  %v1037_v39 = vmax.f32 %v842_v27, 0.0 }
 0x360   :  { %v1710_v53 = vpop.f32.mrf.mxu2  ;;  %v3488_v19 = vor.u32 1.1754944e-38, %v3487_v9  ;;  %vm3486_vm13 = vcmp.eq.f32.partialorder %v3485_v14, 8.507059e+37 }
 0x361   :  { %v3464_v56 = vmul.f32 %v5131_v42, %v3463_v49  ;;  %v1711_v57 = vadd.f32 %v6345_v11, %v1710_v53  ;;  %v845_v49 = vadd.f32 %v6563_v40, %v6553_v45  ;;  %v138_v53 = vld [vmem:[%s7130_s0 + $0x3b0] sm:$0xff] }
 0x363   :  { %v5133_v58 = vpop.eup %5132  ;;  %v3465_v59 = vadd.f32 %v5131_v42, %v3464_v56  ;;  %v4766_v61 = vmul.f32 -1.442695, %v1711_v57 }
 0x364   :  { %v5135_v63 = vpop.eup %5134  ;;  %v2327_v1 = vadd.f32 1.0, %v5133_v58  ;;  %4551 = vmatmul.msk.f32.gmra.mxu3 %vm153_vm1, %v136_v62 }
 0x365   :  { %v3469_v4 = vsel %vm3468_vm8, %v5131_v42, %v3465_v59  ;;  %v3477_v5 = vmul.f32 %v5135_v63, %v2326_v44  ;;  %5136 = vpow2.f32 %v4766_v61  ;;  %4655 = vmatmul.msk.f32.gmra.mxu2 %vm1083_vm2, %v1035_v46  ;;  %vm3482_vm10 = vweird.f32 %v5135_v63 }
 0x366   :  { %v3474_v11 = vsel %vm3471_vm9, %v3473_v48, %v3469_v4  ;;  %5138 = vrcp.f32 %v2327_v1  ;;  %vm3483_vm12 = vmor %vm3481_vm11, %vm3482_vm10  ;;  %v3502_v33 = vand.u32 2147483648, %v2327_v1  ;;  %v3500_v20 = vand.u32 2147483647, %v2327_v1 }
 0x367   :  { %4374 = vst.msk [vmem:[%s7134_s5 + $0x240] sm:$0xff] %vm4301_vm6, %v3474_v11  ;;  %v3478_v6 = vsub.f32 1.0, %v3477_v5  ;;  %v6633_v7 = vpop.f32.mrf.mxu3  ;;  %vm3496_vm15 = vweird.f32 %v2327_v1  ;;  %v1038_v59 = vmax.f32 %v845_v49, 0.0 }
 0x368   :  { %v1713_v10 = vpop.f32.mrf.mxu2  ;;  %v3503_v3 = vor.u32 1.1754944e-38, %v3502_v33  ;;  %vm3501_vm3 = vcmp.eq.f32.partialorder %v3500_v20, 8.507059e+37 }
 0x369   :  { %v3479_v13 = vmul.f32 %v5135_v63, %v3478_v6  ;;  %v1714_v15 = vadd.f32 %v6629_v0, %v1713_v10  ;;  %v848_v6 = vadd.f32 %v6563_v40, %v6572_v12  ;;  %v139_v10 = vld [vmem:[%s7130_s0 + $0x3b8] sm:$0xff] }
 0x36b   :  { %v5137_v16 = vpop.eup %5136  ;;  %v3480_v60 = vadd.f32 %v5135_v63, %v3479_v13  ;;  %v4767_v17 = vmul.f32 -1.442695, %v1714_v15 }
 0x36c   :  { %v5139_v18 = vpop.eup %5138  ;;  %v2328_v21 = vadd.f32 1.0, %v5137_v16  ;;  %4552 = vmatmul.msk.f32.gmra.mxu3 %vm153_vm1, %v137_v35 }
 0x36d   :  { %v3484_v23 = vsel %vm3483_vm12, %v5135_v63, %v3480_v60  ;;  %v3492_v29 = vmul.f32 %v5139_v18, %v2327_v1  ;;  %5140 = vpow2.f32 %v4767_v17  ;;  %4656 = vmatmul.msk.f32.gmra.mxu2 %vm1083_vm2, %v1036_v25  ;;  %vm3497_vm14 = vweird.f32 %v5139_v18 }
 0x36e   :  { %v3489_v30 = vsel %vm3486_vm13, %v3488_v19, %v3484_v23  ;;  %5142 = vrcp.f32 %v2328_v21  ;;  %vm3498_vm0 = vmor %vm3496_vm15, %vm3497_vm14  ;;  %v3517_v51 = vand.u32 2147483648, %v2328_v21  ;;  %v3515_v56 = vand.u32 2147483647, %v2328_v21 }
 0x36f   :  { %4375 = vst.msk [vmem:[%s7134_s5 + $0x248] sm:$0xff] %vm4301_vm6, %v3489_v30  ;;  %v3493_v32 = vsub.f32 1.0, %v3492_v29  ;;  %v6647_v31 = vpop.f32.mrf.mxu3  ;;  %vm3511_vm5 = vweird.f32 %v2328_v21  ;;  %v1039_v60 = vmax.f32 %v848_v6, 0.0 }
 0x370   :  { %v1716_v34 = vpop.f32.mrf.mxu2  ;;  %v3518_v45 = vor.u32 1.1754944e-38, %v3517_v51  ;;  %vm3516_vm8 = vcmp.eq.f32.partialorder %v3515_v56, 8.507059e+37 }
 0x371   :  { %v3494_v36 = vmul.f32 %v5139_v18, %v3493_v32  ;;  %v1717_v37 = vadd.f32 %v6629_v0, %v1716_v34  ;;  %v851_v32 = vadd.f32 %v6563_v40, %v6586_v2  ;;  %v140_v34 = vld [vmem:[%s7130_s0 + $0x3c0] sm:$0xff] }
 0x373   :  { %v5141_v38 = vpop.eup %5140  ;;  %v3495_v28 = vadd.f32 %v5139_v18, %v3494_v36  ;;  %v4768_v24 = vmul.f32 -1.442695, %v1717_v37 }
 0x374   :  { %v5143_v26 = vpop.eup %5142  ;;  %v2329_v42 = vadd.f32 1.0, %v5141_v38  ;;  %4553 = vmatmul.msk.f32.gmra.mxu3 %vm153_vm1, %v138_v53 }
 0x375   :  { %v3499_v44 = vsel %vm3498_vm0, %v5139_v18, %v3495_v28  ;;  %v3507_v22 = vmul.f32 %v5143_v26, %v2328_v21  ;;  %5144 = vpow2.f32 %v4768_v24  ;;  %4657 = vmatmul.msk.f32.gmra.mxu2 %vm1083_vm2, %v1037_v39  ;;  %vm3512_vm4 = vweird.f32 %v5143_v26 }
 0x376   :  { %v3504_v52 = vsel %vm3501_vm3, %v3503_v3, %v3499_v44  ;;  %5146 = vrcp.f32 %v2329_v42  ;;  %vm3513_vm7 = vmor %vm3511_vm5, %vm3512_vm4  ;;  %v3532_v8 = vand.u32 2147483648, %v2329_v42  ;;  %v3530_v13 = vand.u32 2147483647, %v2329_v42 }
 0x377   :  { %4376 = vst.msk [vmem:[%s7134_s5 + $0x250] sm:$0xff] %vm4301_vm6, %v3504_v52  ;;  %v3508_v47 = vsub.f32 1.0, %v3507_v22  ;;  %v6661_v48 = vpop.f32.mrf.mxu3  ;;  %vm3526_vm10 = vweird.f32 %v2329_v42  ;;  %v1040_v28 = vmax.f32 %v851_v32, 0.0 }
 0x378   :  { %v1719_v55 = vpop.f32.mrf.mxu2  ;;  %v3533_v12 = vor.u32 1.1754944e-38, %v3532_v8  ;;  %vm3531_vm12 = vcmp.eq.f32.partialorder %v3530_v13, 8.507059e+37 }
 0x379   :  { %v3509_v41 = vmul.f32 %v5143_v26, %v3508_v47  ;;  %v1720_v43 = vadd.f32 %v6629_v0, %v1719_v55  ;;  %v854_v47 = vadd.f32 %v6563_v40, %v6600_v50  ;;  %v141_v55 = vld [vmem:[%s7130_s0 + $0x3c8] sm:$0xff] }
 0x37b   :  { %v5145_v57 = vpop.eup %5144  ;;  %v3510_v58 = vadd.f32 %v5143_v26, %v3509_v41  ;;  %v4769_v46 = vmul.f32 -1.442695, %v1720_v43 }
 0x37c   :  { %v5147_v61 = vpop.eup %5146  ;;  %v2330_v63 = vadd.f32 1.0, %v5145_v57  ;;  %4554 = vmatmul.msk.f32.gmra.mxu3 %vm153_vm1, %v139_v10 }
 0x37d   :  { %v3514_v1 = vsel %vm3513_vm7, %v5143_v26, %v3510_v58  ;;  %v3522_v4 = vmul.f32 %v5147_v61, %v2329_v42  ;;  %5148 = vpow2.f32 %v4769_v46  ;;  %4658 = vmatmul.msk.f32.gmra.mxu2 %vm1083_vm2, %v1038_v59  ;;  %vm3527_vm9 = vweird.f32 %v5147_v61 }
 0x37e   :  { %v3519_v5 = vsel %vm3516_vm8, %v3518_v45, %v3514_v1  ;;  %5150 = vrcp.f32 %v2330_v63  ;;  %vm3528_vm11 = vmor %vm3526_vm10, %vm3527_vm9  ;;  %v3547_v27 = vand.u32 2147483648, %v2330_v63  ;;  %v3545_v36 = vand.u32 2147483647, %v2330_v63 }
 0x37f   :  { %4377 = vst.msk [vmem:[%s7134_s5 + $0x258] sm:$0xff] %vm4301_vm6, %v3519_v5  ;;  %v3523_v11 = vsub.f32 1.0, %v3522_v4  ;;  %v6675_v19 = vpop.f32.mrf.mxu3  ;;  %vm3541_vm14 = vweird.f32 %v2330_v63  ;;  %v1041_v58 = vmax.f32 %v854_v47, 0.0 }
 0x380   :  { %v1722_v9 = vpop.f32.mrf.mxu2  ;;  %v3548_v2 = vor.u32 1.1754944e-38, %v3547_v27  ;;  %vm3546_vm0 = vcmp.eq.f32.partialorder %v3545_v36, 8.507059e+37 }
 0x381   :  { %v3524_v62 = vmul.f32 %v5147_v61, %v3523_v11  ;;  %v1723_v14 = vadd.f32 %v6629_v0, %v1722_v9  ;;  %v857_v11 = vadd.f32 %v6563_v40, %v6614_v54  ;;  %v142_v9 = vld [vmem:[%s7130_s0 + $0x3d0] sm:$0xff] }
 0x383   :  { %v5149_v15 = vpop.eup %5148  ;;  %v3525_v16 = vadd.f32 %v5147_v61, %v3524_v62  ;;  %v4770_v25 = vmul.f32 -1.442695, %v1723_v14 }
 0x384   :  { %v5151_v17 = vpop.eup %5150  ;;  %v2331_v18 = vadd.f32 1.0, %v5149_v15  ;;  %4555 = vmatmul.msk.f32.gmra.mxu3 %vm153_vm1, %v140_v34 }
 0x385   :  { %v3529_v21 = vsel %vm3528_vm11, %v5147_v61, %v3525_v16  ;;  %v3537_v23 = vmul.f32 %v5151_v17, %v2330_v63  ;;  %5152 = vpow2.f32 %v4770_v25  ;;  %4659 = vmatmul.msk.f32.gmra.mxu2 %vm1083_vm2, %v1039_v60  ;;  %vm3542_vm13 = vweird.f32 %v5151_v17 }
 0x386   :  { %v3534_v29 = vsel %vm3531_vm12, %v3533_v12, %v3529_v21  ;;  %5154 = vrcp.f32 %v2331_v18  ;;  %vm3543_vm15 = vmor %vm3541_vm14, %vm3542_vm13  ;;  %v3562_v49 = vand.u32 2147483648, %v2331_v18  ;;  %v3560_v41 = vand.u32 2147483647, %v2331_v18 }
 0x387   :  { %4378 = vst.msk [vmem:[%s7134_s5 + $0x260] sm:$0xff] %vm4301_vm6, %v3534_v29  ;;  %v3538_v30 = vsub.f32 1.0, %v3537_v23  ;;  %v6689_v3 = vpop.f32.mrf.mxu3  ;;  %vm3556_vm4 = vweird.f32 %v2331_v18  ;;  %v1042_v16 = vmax.f32 %v857_v11, 0.0 }
 0x388   :  { %v1725_v33 = vpop.f32.mrf.mxu2  ;;  %v3563_v50 = vor.u32 1.1754944e-38, %v3562_v49  ;;  %vm3561_vm7 = vcmp.eq.f32.partialorder %v3560_v41, 8.507059e+37 }
 0x389   :  { %v3539_v35 = vmul.f32 %v5151_v17, %v3538_v30  ;;  %v1726_v20 = vadd.f32 %v6629_v0, %v1725_v33  ;;  %v860_v30 = vadd.f32 %v6563_v40, %v6633_v7  ;;  %v143_v33 = vld [vmem:[%s7130_s0 + $0x3d8] sm:$0xff] }
 0x38b   :  { %v5153_v37 = vpop.eup %5152  ;;  %v3540_v38 = vadd.f32 %v5151_v17, %v3539_v35  ;;  %v4771_v39 = vmul.f32 -1.442695, %v1726_v20 }
 0x38c   :  { %v5155_v24 = vpop.eup %5154  ;;  %v2332_v26 = vadd.f32 1.0, %v5153_v37  ;;  %4556 = vmatmul.msk.f32.gmra.mxu3 %vm153_vm1, %v141_v55 }
 0x38d   :  { %v3544_v42 = vsel %vm3543_vm15, %v5151_v17, %v3540_v38  ;;  %v3552_v44 = vmul.f32 %v5155_v24, %v2331_v18  ;;  %5156 = vpow2.f32 %v4771_v39  ;;  %4660 = vmatmul.msk.f32.gmra.mxu2 %vm1083_vm2, %v1040_v28  ;;  %vm3557_vm3 = vweird.f32 %v5155_v24 }
 0x38e   :  { %v3549_v22 = vsel %vm3546_vm0, %v3548_v2, %v3544_v42  ;;  %5158 = vrcp.f32 %v2332_v26  ;;  %vm3558_vm5 = vmor %vm3556_vm4, %vm3557_vm3  ;;  %v3577_v6 = vand.u32 2147483648, %v2332_v26  ;;  %v3575_v62 = vand.u32 2147483647, %v2332_v26 }
 0x38f   :  { %4379 = vst.msk [vmem:[%s7134_s5 + $0x268] sm:$0xff] %vm4301_vm6, %v3549_v22  ;;  %v3553_v52 = vsub.f32 1.0, %v3552_v44  ;;  %v6703_v45 = vpop.f32.mrf.mxu3  ;;  %vm3571_vm9 = vweird.f32 %v2332_v26  ;;  %v1043_v38 = vmax.f32 %v860_v30, 0.0 }
 0x390   :  { %v1728_v51 = vpop.f32.mrf.mxu2  ;;  %v3578_v54 = vor.u32 1.1754944e-38, %v3577_v6  ;;  %vm3576_vm11 = vcmp.eq.f32.partialorder %v3575_v62, 8.507059e+37 }
 0x391   :  { %v3554_v53 = vmul.f32 %v5155_v24, %v3553_v52  ;;  %v1729_v56 = vadd.f32 %v6629_v0, %v1728_v51  ;;  %v863_v52 = vadd.f32 %v6563_v40, %v6647_v31  ;;  %v144_v51 = vld [vmem:[%s7130_s0 + $0x3e0] sm:$0xff] }
 0x393   :  { %v5157_v43 = vpop.eup %5156  ;;  %v3555_v57 = vadd.f32 %v5155_v24, %v3554_v53  ;;  %v4772_v59 = vmul.f32 -1.442695, %v1729_v56 }
 0x394   :  { %v5159_v46 = vpop.eup %5158  ;;  %v2333_v61 = vadd.f32 1.0, %v5157_v43  ;;  %4557 = vmatmul.msk.f32.gmra.mxu3 %vm153_vm1, %v142_v9 }
 0x395   :  { %v3559_v63 = vsel %vm3558_vm5, %v5155_v24, %v3555_v57  ;;  %v3567_v1 = vmul.f32 %v5159_v46, %v2332_v26  ;;  %5160 = vpow2.f32 %v4772_v59  ;;  %4661 = vmatmul.msk.f32.gmra.mxu2 %vm1083_vm2, %v1041_v58  ;;  %vm3572_vm8 = vweird.f32 %v5159_v46 }
 0x396   :  { %v3564_v4 = vsel %vm3561_vm7, %v3563_v50, %v3559_v63  ;;  %5162 = vrcp.f32 %v2333_v61  ;;  %vm3573_vm10 = vmor %vm3571_vm9, %vm3572_vm8  ;;  %v3592_v32 = vand.u32 2147483648, %v2333_v61  ;;  %v3590_v35 = vand.u32 2147483647, %v2333_v61 }
 0x397   :  { %4380 = vst.msk [vmem:[%s7134_s5 + $0x270] sm:$0xff] %vm4301_vm6, %v3564_v4  ;;  %v3568_v5 = vsub.f32 1.0, %v3567_v1  ;;  %v6717_v12 = vpop.f32.mrf.mxu3  ;;  %vm3586_vm13 = vweird.f32 %v2333_v61  ;;  %v1044_v57 = vmax.f32 %v863_v52, 0.0 }
 0x398   :  { %v1731_v8 = vpop.f32.mrf.mxu2  ;;  %v3593_v7 = vor.u32 1.1754944e-38, %v3592_v32  ;;  %vm3591_vm15 = vcmp.eq.f32.partialorder %v3590_v35, 8.507059e+37 }
 0x399   :  { %v3569_v10 = vmul.f32 %v5159_v46, %v3568_v5  ;;  %v1732_v13 = vadd.f32 %v6629_v0, %v1731_v8  ;;  %v866_v5 = vadd.f32 %v6563_v40, %v6661_v48  ;;  %v145_v8 = vld [vmem:[%s7130_s0 + $0x3e8] sm:$0xff] }
 0x39b   :  { %v5161_v14 = vpop.eup %5160  ;;  %v3570_v15 = vadd.f32 %v5159_v46, %v3569_v10  ;;  %v4773_v60 = vmul.f32 -1.442695, %v1732_v13 }
 0x39c   :  { %v5163_v25 = vpop.eup %5162  ;;  %v2334_v17 = vadd.f32 1.0, %v5161_v14  ;;  %4558 = vmatmul.msk.f32.gmra.mxu3 %vm153_vm1, %v143_v33 }
 0x39d   :  { %v3574_v18 = vsel %vm3573_vm10, %v5159_v46, %v3570_v15  ;;  %v3582_v21 = vmul.f32 %v5163_v25, %v2333_v61  ;;  %5164 = vpow2.f32 %v4773_v60  ;;  %4662 = vmatmul.msk.f32.gmra.mxu2 %vm1083_vm2, %v1042_v16  ;;  %vm3587_vm12 = vweird.f32 %v5163_v25 }
 0x39e   :  { %v3579_v23 = vsel %vm3576_vm11, %v3578_v54, %v3574_v18  ;;  %5166 = vrcp.f32 %v2334_v17  ;;  %vm3588_vm14 = vmor %vm3586_vm13, %vm3587_vm12  ;;  %v3607_v47 = vand.u32 2147483648, %v2334_v17  ;;  %v3605_v53 = vand.u32 2147483647, %v2334_v17 }
 0x39f   :  { %4381 = vst.msk [vmem:[%s7134_s5 + $0x278] sm:$0xff] %vm4301_vm6, %v3579_v23  ;;  %v3583_v29 = vsub.f32 1.0, %v3582_v21  ;;  %v6731_v2 = vpop.f32.mrf.mxu3  ;;  %vm3601_vm3 = vweird.f32 %v2334_v17  ;;  %v1045_v15 = vmax.f32 %v866_v5, 0.0 }
 0x3a0   :  { %v1734_v27 = vpop.f32.mrf.mxu2  ;;  %v3608_v31 = vor.u32 1.1754944e-38, %v3607_v47  ;;  %vm3606_vm5 = vcmp.eq.f32.partialorder %v3605_v53, 8.507059e+37 }
 0x3a1   :  { %v3584_v34 = vmul.f32 %v5163_v25, %v3583_v29  ;;  %v1735_v36 = vadd.f32 %v6629_v0, %v1734_v27  ;;  %v869_v29 = vadd.f32 %v6563_v40, %v6675_v19  ;;  %v146_v27 = vld [vmem:[%s7130_s0 + $0x3f0] sm:$0xff] }
 0x3a3   :  { %v5165_v20 = vpop.eup %5164  ;;  %v3585_v37 = vadd.f32 %v5163_v25, %v3584_v34  ;;  %v4774_v28 = vmul.f32 -1.442695, %v1735_v36 }
 0x3a4   :  { %v5167_v39 = vpop.eup %5166  ;;  %v2335_v24 = vadd.f32 1.0, %v5165_v20  ;;  %4559 = vmatmul.msk.f32.gmra.mxu3 %vm153_vm1, %v144_v51 }
 0x3a5   :  { %v3589_v26 = vsel %vm3588_vm14, %v5163_v25, %v3585_v37  ;;  %v3597_v42 = vmul.f32 %v5167_v39, %v2334_v17  ;;  %5168 = vpow2.f32 %v4774_v28  ;;  %4663 = vmatmul.msk.f32.gmra.mxu2 %vm1083_vm2, %v1043_v38  ;;  %vm3602_vm0 = vweird.f32 %v5167_v39 }
 0x3a6   :  { %v3594_v44 = vsel %vm3591_vm15, %v3593_v7, %v3589_v26  ;;  %5170 = vrcp.f32 %v2335_v24  ;;  %vm3603_vm4 = vmor %vm3601_vm3, %vm3602_vm0  ;;  %v3622_v11 = vand.u32 2147483648, %v2335_v24  ;;  %v3620_v10 = vand.u32 2147483647, %v2335_v24 }
 0x3a7   :  { %4382 = vst.msk [vmem:[%s7134_s5 + $0x280] sm:$0xff] %vm4301_vm6, %v3594_v44  ;;  %v3598_v22 = vsub.f32 1.0, %v3597_v42  ;;  %v6745_v50 = vpop.f32.mrf.mxu3  ;;  %vm3616_vm8 = vweird.f32 %v2335_v24  ;;  %v1046_v37 = vmax.f32 %v869_v29, 0.0 }
 0x3a8   :  { %v1737_v49 = vpop.f32.mrf.mxu2  ;;  %v3623_v48 = vor.u32 1.1754944e-38, %v3622_v11  ;;  %vm3621_vm10 = vcmp.eq.f32.partialorder %v3620_v10, 8.507059e+37 }
 0x3a9   :  { %v3599_v55 = vmul.f32 %v5167_v39, %v3598_v22  ;;  %v1738_v41 = vadd.f32 %v6629_v0, %v1737_v49  ;;  %v872_v22 = vadd.f32 %v6563_v40, %v6689_v3  ;;  %v147_v49 = vld [vmem:[%s7130_s0 + $0x3f8] sm:$0xff] }
 0x3ab   :  { %v5169_v56 = vpop.eup %5168  ;;  %v3600_v43 = vadd.f32 %v5167_v39, %v3599_v55  ;;  %v4775_v58 = vmul.f32 -1.442695, %v1738_v41 }
 0x3ac   :  { %v5171_v59 = vpop.eup %5170  ;;  %v2336_v46 = vadd.f32 1.0, %v5169_v56  ;;  %4560 = vmatmul.msk.f32.gmra.mxu3 %vm153_vm1, %v145_v8 }
 0x3ad   :  { %v3604_v61 = vsel %vm3603_vm4, %v5167_v39, %v3600_v43  ;;  %v3612_v63 = vmul.f32 %v5171_v59, %v2335_v24  ;;  %5172 = vpow2.f32 %v4775_v58  ;;  %4664 = vmatmul.msk.f32.gmra.mxu2 %vm1083_vm2, %v1044_v57  ;;  %vm3617_vm7 = vweird.f32 %v5171_v59 }
 0x3ae   :  { %v3609_v1 = vsel %vm3606_vm5, %v3608_v31, %v3604_v61  ;;  %5174 = vrcp.f32 %v2336_v46  ;;  %vm3618_vm9 = vmor %vm3616_vm8, %vm3617_vm7  ;;  %v3637_v30 = vand.u32 2147483648, %v2336_v46  ;;  %v3635_v34 = vand.u32 2147483647, %v2336_v46 }
 0x3af   :  { %4383 = vst.msk [vmem:[%s7134_s5 + $0x288] sm:$0xff] %vm4301_vm6, %v3609_v1  ;;  %v3613_v4 = vsub.f32 1.0, %v3612_v63  ;;  %v6759_v54 = vpop.f32.mrf.mxu3  ;;  %vm3631_vm12 = vweird.f32 %v2336_v46  ;;  %v1047_v43 = vmax.f32 %v872_v22, 0.0 }
 0x3b0   :  { %v1740_v6 = vpop.f32.mrf.mxu2  ;;  %v3638_v19 = vor.u32 1.1754944e-38, %v3637_v30  ;;  %vm3636_vm14 = vcmp.eq.f32.partialorder %v3635_v34, 8.507059e+37 }
 0x3b1   :  { %v3614_v9 = vmul.f32 %v5171_v59, %v3613_v4  ;;  %v1741_v62 = vadd.f32 %v6629_v0, %v1740_v6  ;;  %v875_v4 = vadd.f32 %v6563_v40, %v6703_v45 }
 0x3b3   :  { %v5173_v13 = vpop.eup %5172  ;;  %v3615_v14 = vadd.f32 %v5171_v59, %v3614_v9  ;;  %v4776_v16 = vmul.f32 -1.442695, %v1741_v62 }
 0x3b4   :  { %v5175_v60 = vpop.eup %5174  ;;  %v2337_v25 = vadd.f32 1.0, %v5173_v13  ;;  %4561 = vmatmul.msk.f32.gmra.mxu3 %vm153_vm1, %v146_v27  ;;  %v1048_v13 = vmax.f32 %v875_v4, 0.0 }
 0x3b5   :  { %v3619_v17 = vsel %vm3618_vm9, %v5171_v59, %v3615_v14  ;;  %v3627_v18 = vmul.f32 %v5175_v60, %v2336_v46  ;;  %5176 = vpow2.f32 %v4776_v16  ;;  %4665 = vmatmul.msk.f32.gmra.mxu2 %vm1083_vm2, %v1045_v15  ;;  %vm3632_vm11 = vweird.f32 %v5175_v60 }
 0x3b6   :  { %v3624_v21 = vsel %vm3621_vm10, %v3623_v48, %v3619_v17  ;;  %5178 = vrcp.f32 %v2337_v25  ;;  %vm3633_vm13 = vmor %vm3631_vm12, %vm3632_vm11  ;;  %v3652_v52 = vand.u32 2147483648, %v2337_v25  ;;  %v3650_v55 = vand.u32 2147483647, %v2337_v25 }
 0x3b7   :  { %4384 = vst.msk [vmem:[%s7134_s5 + $0x290] sm:$0xff] %vm4301_vm6, %v3624_v21  ;;  %v3628_v23 = vsub.f32 1.0, %v3627_v18  ;;  %v6773_v7 = vpop.f32.mrf.mxu3  ;;  %vm3646_vm0 = vweird.f32 %v2337_v25  ;;  %v878_v21 = vadd.f32 %v6563_v40, %v6717_v12 }
 0x3b8   :  { %v1743_v32 = vpop.f32.mrf.mxu2  ;;  %v3653_v3 = vor.u32 1.1754944e-38, %v3652_v52  ;;  %vm3651_vm4 = vcmp.eq.f32.partialorder %v3650_v55, 8.507059e+37 }
 0x3b9   :  { %v3629_v33 = vmul.f32 %v5175_v60, %v3628_v23  ;;  %v1744_v35 = vadd.f32 %v6629_v0, %v1743_v32 }
 0x3bb   :  { %v5177_v36 = vpop.eup %5176  ;;  %v3630_v20 = vadd.f32 %v5175_v60, %v3629_v33  ;;  %v4777_v38 = vmul.f32 -1.442695, %v1744_v35  ;;  %v1049_v35 = vmax.f32 %v878_v21, 0.0 }
 0x3bc   :  { %v5179_v28 = vpop.eup %5178  ;;  %v2338_v39 = vadd.f32 1.0, %v5177_v36  ;;  %4562 = vmatmul.msk.f32.gmra.mxu3 %vm153_vm1, %v147_v49 }
 0x3bd   :  { %v3634_v24 = vsel %vm3633_vm13, %v5175_v60, %v3630_v20  ;;  %v3642_v26 = vmul.f32 %v5179_v28, %v2337_v25  ;;  %5180 = vpow2.f32 %v4777_v38  ;;  %4666 = vmatmul.msk.f32.gmra.mxu2 %vm1083_vm2, %v1046_v37  ;;  %vm3647_vm15 = vweird.f32 %v5179_v28 }
 0x3be   :  { %v3639_v42 = vsel %vm3636_vm14, %v3638_v19, %v3634_v24  ;;  %5182 = vrcp.f32 %v2338_v39  ;;  %vm3648_vm3 = vmor %vm3646_vm0, %vm3647_vm15  ;;  %v3667_v5 = vand.u32 2147483648, %v2338_v39  ;;  %v3665_v8 = vand.u32 2147483647, %v2338_v39 }
 0x3bf   :  { %4385 = vst.msk [vmem:[%s7134_s5 + $0x298] sm:$0xff] %vm4301_vm6, %v3639_v42  ;;  %v3643_v44 = vsub.f32 1.0, %v3642_v26  ;;  %v6787_v31 = vpop.f32.mrf.mxu3  ;;  %vm3661_vm5 = vweird.f32 %v2338_v39  ;;  %v881_v26 = vadd.f32 %v6563_v40, %v6731_v2 }
 0x3c0   :  { %v1746_v47 = vpop.f32.mrf.mxu2  ;;  %v3668_v16 = vor.u32 1.1754944e-38, %v3667_v5  ;;  %vm3666_vm8 = vcmp.eq.f32.partialorder %v3665_v8, 8.507059e+37 }
 0x3c1   :  { %v3644_v51 = vmul.f32 %v5179_v28, %v3643_v44  ;;  %v1747_v53 = vadd.f32 %v6629_v0, %v1746_v47  ;;  %v1050_v55 = vmax.f32 %v881_v26, 0.0 }
 0x3c3   :  { %v5181_v41 = vpop.eup %5180  ;;  %v3645_v56 = vadd.f32 %v5179_v28, %v3644_v51  ;;  %v4778_v57 = vmul.f32 -1.442695, %v1747_v53 }
 0x3c4   :  { %v5183_v58 = vpop.eup %5182  ;;  %v2339_v59 = vadd.f32 1.0, %v5181_v41 }
 0x3c5   :  { %v3649_v46 = vsel %vm3648_vm3, %v5179_v28, %v3645_v56  ;;  %v3657_v61 = vmul.f32 %v5183_v58, %v2338_v39  ;;  %5184 = vpow2.f32 %v4778_v57  ;;  %4667 = vmatmul.msk.f32.gmra.mxu2 %vm1083_vm2, %v1047_v43  ;;  %vm3662_vm1 = vweird.f32 %v5183_v58 }
 0x3c6   :  { %v3654_v63 = vsel %vm3651_vm4, %v3653_v3, %v3649_v46  ;;  %5186 = vrcp.f32 %v2339_v59  ;;  %vm3663_vm7 = vmor %vm3661_vm5, %vm3662_vm1  ;;  %v3682_v23 = vand.u32 2147483648, %v2339_v59  ;;  %v3680_v32 = vand.u32 2147483647, %v2339_v59 }
 0x3c7   :  { %4386 = vst.msk [vmem:[%s7134_s5 + $0x2a0] sm:$0xff] %vm4301_vm6, %v3654_v63  ;;  %v3658_v1 = vsub.f32 1.0, %v3657_v61  ;;  %v6797_v48 = vpop.f32.mrf.mxu3  ;;  %vm3676_vm10 = vweird.f32 %v2339_v59 }
 0x3c8   :  { %v1749_v11 = vpop.f32.mrf.mxu2  ;;  %v3683_v37 = vor.u32 1.1754944e-38, %v3682_v23  ;;  %vm3681_vm12 = vcmp.eq.f32.partialorder %v3680_v32, 8.507059e+37 }
 0x3c9   :  { %v3659_v6 = vmul.f32 %v5183_v58, %v3658_v1  ;;  %v1750_v9 = vadd.f32 %v6629_v0, %v1749_v11 }
 0x3cb   :  { %v5185_v10 = vpop.eup %5184  ;;  %v3660_v62 = vadd.f32 %v5183_v58, %v3659_v6  ;;  %v4779_v14 = vmul.f32 -1.442695, %v1750_v9 }
 0x3cc   :  { %v5187_v15 = vpop.eup %5186  ;;  %v2340_v60 = vadd.f32 1.0, %v5185_v10 }
 0x3cd   :  { %v3664_v25 = vsel %vm3663_vm7, %v5183_v58, %v3660_v62  ;;  %v3672_v45 = vmul.f32 %v5187_v15, %v2339_v59  ;;  %5188 = vpow2.f32 %v4779_v14  ;;  %4668 = vmatmul.msk.f32.gmra.mxu2 %vm1083_vm2, %v1048_v13  ;;  %vm3677_vm9 = vweird.f32 %v5187_v15  ;;  %v6827_v59 = vld [vmem:[%s7131_s2] ss:$0 sm:$0xff] }
 0x3ce   :  { %v3669_v17 = vsel %vm3666_vm8, %v3668_v16, %v3664_v25  ;;  %5190 = vrcp.f32 %v2340_v60  ;;  %vm3678_vm11 = vmor %vm3676_vm10, %vm3677_vm9  ;;  %v3697_v42 = vand.u32 2147483648, %v2340_v60  ;;  %v3695_v52 = vand.u32 2147483647, %v2340_v60 }
 0x3cf   :  { %4387 = vst.msk [vmem:[%s7134_s5 + $0x2a8] sm:$0xff] %vm4301_vm6, %v3669_v17  ;;  %v3673_v18 = vsub.f32 1.0, %v3672_v45  ;;  %v6807_v28 = vpop.f32.mrf.mxu3  ;;  %vm3691_vm14 = vweird.f32 %v2340_v60  ;;  %v884_v46 = vadd.f32 %v6827_v59, %v6745_v50  ;;  %v887_v25 = vadd.f32 %v6827_v59, %v6759_v54 }
 0x3d0   :  { %v1752_v29 = vpop.f32.mrf.mxu2  ;;  %v3698_v56 = vor.u32 1.1754944e-38, %v3697_v42  ;;  %vm3696_vm0 = vcmp.eq.f32.partialorder %v3695_v52, 8.507059e+37 }
 0x3d1   :  { %v3674_v30 = vmul.f32 %v5187_v15, %v3673_v18  ;;  %v1753_v27 = vadd.f32 %v6629_v0, %v1752_v29  ;;  %v1051_v8 = vmax.f32 %v884_v46, 0.0  ;;  %v1052_v32 = vmax.f32 %v887_v25, 0.0  ;;  %v6874_v25 = vld [vmem:[%s7133_s4] ss:$0 sm:$0xff] }
 0x3d3   :  { %v5189_v33 = vpop.eup %5188  ;;  %v3675_v34 = vadd.f32 %v5187_v15, %v3674_v30  ;;  %v4780_v36 = vmul.f32 -1.442695, %v1753_v27 }
 0x3d4   :  { %v5191_v20 = vpop.eup %5190  ;;  %v2341_v38 = vadd.f32 1.0, %v5189_v33 }
 0x3d5   :  { %v3679_v19 = vsel %vm3678_vm11, %v5187_v15, %v3675_v34  ;;  %v3687_v12 = vmul.f32 %v5191_v20, %v2340_v60  ;;  %5192 = vpow2.f32 %v4780_v36  ;;  %4669 = vmatmul.msk.f32.gmra.mxu2 %vm1083_vm2, %v1049_v35  ;;  %vm3692_vm13 = vweird.f32 %v5191_v20 }
 0x3d6   :  { %v3684_v39 = vsel %vm3681_vm12, %v3683_v37, %v3679_v19  ;;  %5194 = vrcp.f32 %v2341_v38  ;;  %vm3693_vm15 = vmor %vm3691_vm14, %vm3692_vm13  ;;  %v3712_v61 = vand.u32 2147483648, %v2341_v38  ;;  %v3710_v4 = vand.u32 2147483647, %v2341_v38 }
 0x3d7   :  { %4388 = vst.msk [vmem:[%s7134_s5 + $0x2b0] sm:$0xff] %vm4301_vm6, %v3684_v39  ;;  %v3688_v24 = vsub.f32 1.0, %v3687_v12  ;;  %v6817_v57 = vpop.f32.mrf.mxu3  ;;  %vm3706_vm4 = vweird.f32 %v2341_v38  ;;  %v890_v19 = vadd.f32 %v6827_v59, %v6773_v7 }
 0x3d8   :  { %v1755_v44 = vpop.f32.mrf.mxu2  ;;  %v3713_v62 = vor.u32 1.1754944e-38, %v3712_v61  ;;  %vm3711_vm5 = vcmp.eq.f32.partialorder %v3710_v4, 8.507059e+37 }
 0x3d9   :  { %v3689_v22 = vmul.f32 %v5191_v20, %v3688_v24  ;;  %v1756_v47 = vadd.f32 %v6629_v0, %v1755_v44  ;;  %v1053_v52 = vmax.f32 %v890_v19, 0.0 }
 0x3db   :  { %v5193_v49 = vpop.eup %5192  ;;  %v3690_v51 = vadd.f32 %v5191_v20, %v3689_v22  ;;  %v4781_v53 = vmul.f32 -1.442695, %v1756_v47 }
 0x3dc   :  { %v5195_v41 = vpop.eup %5194  ;;  %v2342_v43 = vadd.f32 1.0, %v5193_v49 }
 0x3dd   :  { %v3694_v58 = vsel %vm3693_vm15, %v5191_v20, %v3690_v51  ;;  %v3702_v40 = vmul.f32 %v5195_v41, %v2341_v38  ;;  %5196 = vpow2.f32 %v4781_v53  ;;  %4670 = vmatmul.msk.f32.gmra.mxu2 %vm1083_vm2, %v1050_v55  ;;  %vm3707_vm3 = vweird.f32 %v5195_v41 }
 0x3de   :  { %v3699_v2 = vsel %vm3696_vm0, %v3698_v56, %v3694_v58  ;;  %5198 = vrcp.f32 %v2342_v43  ;;  %vm3708_vm1 = vmor %vm3706_vm4, %vm3707_vm3  ;;  %v3727_v45 = vand.u32 2147483648, %v2342_v43  ;;  %v3725_v21 = vand.u32 2147483647, %v2342_v43 }
 0x3df   :  { %4389 = vst.msk [vmem:[%s7134_s5 + $0x2b8] sm:$0xff] %vm4301_vm6, %v3699_v2  ;;  %v3703_v3 = vsub.f32 1.0, %v3702_v40  ;;  %v6832_v14 = vpop.f32.mrf.mxu3  ;;  %vm3721_vm8 = vweird.f32 %v2342_v43  ;;  %v893_v58 = vadd.f32 %v6827_v59, %v6787_v31 }
 0x3e0   :  { %v1758_v63 = vpop.f32.mrf.mxu2  ;;  %v3728_v34 = vor.u32 1.1754944e-38, %v3727_v45  ;;  %vm3726_vm10 = vcmp.eq.f32.partialorder %v3725_v21, 8.507059e+37 }
 0x3e1   :  { %v3704_v1 = vmul.f32 %v5195_v41, %v3703_v3  ;;  %v1759_v5 = vadd.f32 %v6629_v0, %v1758_v63  ;;  %v1054_v4 = vmax.f32 %v893_v58, 0.0 }
 0x3e3   :  { %v5197_v11 = vpop.eup %5196  ;;  %v3705_v6 = vadd.f32 %v5195_v41, %v3704_v1  ;;  %v4782_v9 = vmul.f32 -1.442695, %v1759_v5 }
 0x3e4   :  { %v5199_v10 = vpop.eup %5198  ;;  %v2343_v13 = vadd.f32 1.0, %v5197_v11 }
 0x3e5   :  { %v3709_v15 = vsel %vm3708_vm1, %v5195_v41, %v3705_v6  ;;  %v3717_v50 = vmul.f32 %v5199_v10, %v2342_v43  ;;  %5200 = vpow2.f32 %v4782_v9  ;;  %4671 = vmatmul.msk.f32.gmra.mxu2 %vm1083_vm2, %v1051_v8  ;;  %vm3722_vm7 = vweird.f32 %v5199_v10 }
 0x3e6   :  { %v3714_v16 = vsel %vm3711_vm5, %v3713_v62, %v3709_v15  ;;  %5202 = vrcp.f32 %v2343_v13  ;;  %vm3723_vm9 = vmor %vm3721_vm8, %vm3722_vm7  ;;  %v3742_v12 = vand.u32 2147483648, %v2343_v13  ;;  %v3740_v26 = vand.u32 2147483647, %v2343_v13 }
 0x3e7   :  { %4390 = vst.msk [vmem:[%s7134_s5 + $0x2c0] sm:$0xff] %vm4301_vm6, %v3714_v16  ;;  %v3718_v60 = vsub.f32 1.0, %v3717_v50  ;;  %v6842_v36 = vpop.f32.mrf.mxu3  ;;  %vm3736_vm12 = vweird.f32 %v2343_v13 }
 0x3e8   :  { %v1761_v17 = vpop.f32.mrf.mxu2  ;;  %v3743_v51 = vor.u32 1.1754944e-38, %v3742_v12  ;;  %vm3741_vm14 = vcmp.eq.f32.partialorder %v3740_v26, 8.507059e+37 }
 0x3e9   :  { %v3719_v18 = vmul.f32 %v5199_v10, %v3718_v60  ;;  %v1762_v23 = vadd.f32 %v6629_v0, %v1761_v17 }
 0x3eb   :  { %v5201_v29 = vpop.eup %5200  ;;  %v3720_v30 = vadd.f32 %v5199_v10, %v3719_v18  ;;  %v4783_v27 = vmul.f32 -1.442695, %v1762_v23 }
 0x3ec   :  { %v5203_v33 = vpop.eup %5202  ;;  %v2344_v35 = vadd.f32 1.0, %v5201_v29 }
 0x3ed   :  { %v3724_v20 = vsel %vm3723_vm9, %v5199_v10, %v3720_v30  ;;  %v3732_v54 = vmul.f32 %v5203_v33, %v2343_v13  ;;  %5204 = vpow2.f32 %v4783_v27  ;;  %4672 = vmatmul.msk.f32.gmra.mxu2 %vm1083_vm2, %v1052_v32  ;;  %vm3737_vm11 = vweird.f32 %v5203_v33 }
 0x3ee   :  { %v3729_v37 = vsel %vm3726_vm10, %v3728_v34, %v3724_v20  ;;  %5206 = vrcp.f32 %v2344_v35  ;;  %vm3738_vm13 = vmor %vm3736_vm12, %vm3737_vm11  ;;  %v3757_v40 = vand.u32 2147483648, %v2344_v35  ;;  %v3755_v46 = vand.u32 2147483647, %v2344_v35 }
 0x3ef   :  { %4391 = vst.msk [vmem:[%s7134_s5 + $0x2c8] sm:$0xff] %vm4301_vm6, %v3729_v37  ;;  %v3733_v38 = vsub.f32 1.0, %v3732_v54  ;;  %v6852_v53 = vpop.f32.mrf.mxu3  ;;  %vm3751_vm0 = vweird.f32 %v2344_v35  ;;  %v896_v13 = vadd.f32 %v6827_v59, %v6797_v48  ;;  %v899_v20 = vadd.f32 %v6827_v59, %v6807_v28 }
 0x3f0   :  { %v1764_v39 = vpop.f32.mrf.mxu2  ;;  %v3758_v6 = vor.u32 1.1754944e-38, %v3757_v40  ;;  %vm3756_vm4 = vcmp.eq.f32.partialorder %v3755_v46, 8.507059e+37 }
 0x3f1   :  { %v3734_v24 = vmul.f32 %v5203_v33, %v3733_v38  ;;  %v1765_v42 = vadd.f32 %v6629_v0, %v1764_v39  ;;  %v1055_v21 = vmax.f32 %v896_v13, 0.0  ;;  %v1056_v26 = vmax.f32 %v899_v20, 0.0 }
 0x3f3   :  { %v5205_v44 = vpop.eup %5204  ;;  %v3735_v22 = vadd.f32 %v5203_v33, %v3734_v24  ;;  %v4784_v47 = vmul.f32 -1.442695, %v1765_v42 }
 0x3f4   :  { %v5207_v49 = vpop.eup %5206  ;;  %v2345_v55 = vadd.f32 1.0, %v5205_v44 }
 0x3f5   :  { %v3739_v41 = vsel %vm3738_vm13, %v5203_v33, %v3735_v22  ;;  %v3747_v7 = vmul.f32 %v5207_v49, %v2344_v35  ;;  %5208 = vpow2.f32 %v4784_v47  ;;  %4673 = vmatmul.msk.f32.gmra.mxu2 %vm1083_vm2, %v1053_v52  ;;  %vm3752_vm15 = vweird.f32 %v5207_v49 }
 0x3f6   :  { %v3744_v56 = vsel %vm3741_vm14, %v3743_v51, %v3739_v41  ;;  %5210 = vrcp.f32 %v2345_v55  ;;  %vm3753_vm3 = vmor %vm3751_vm0, %vm3752_vm15  ;;  %v3772_v15 = vand.u32 2147483648, %v2345_v55  ;;  %v3770_v60 = vand.u32 2147483647, %v2345_v55 }
 0x3f7   :  { %4392 = vst.msk [vmem:[%s7134_s5 + $0x2d0] sm:$0xff] %vm4301_vm6, %v3744_v56  ;;  %v3748_v43 = vsub.f32 1.0, %v3747_v7  ;;  %v6862_v9 = vpop.f32.mrf.mxu3  ;;  %vm3766_vm5 = vweird.f32 %v2345_v55  ;;  %v902_v41 = vadd.f32 %v6827_v59, %v6817_v57 }
 0x3f8   :  { %v1767_v2 = vpop.f32.mrf.mxu2  ;;  %v3773_v48 = vor.u32 1.1754944e-38, %v3772_v15  ;;  %vm3771_vm8 = vcmp.eq.f32.partialorder %v3770_v60, 8.507059e+37 }
 0x3f9   :  { %v3749_v3 = vmul.f32 %v5207_v49, %v3748_v43  ;;  %v1768_v61 = vadd.f32 %v6629_v0, %v1767_v2  ;;  %v1057_v46 = vmax.f32 %v902_v41, 0.0 }
 0x3fb   :  { %v5209_v63 = vpop.eup %5208  ;;  %v3750_v1 = vadd.f32 %v5207_v49, %v3749_v3  ;;  %v4785_v5 = vmul.f32 -1.442695, %v1768_v61 }
 0x3fc   :  { %v5211_v11 = vpop.eup %5210  ;;  %v2346_v8 = vadd.f32 1.0, %v5209_v63 }
 0x3fd   :  { %v3754_v10 = vsel %vm3753_vm3, %v5207_v49, %v3750_v1  ;;  %v3762_v31 = vmul.f32 %v5211_v11, %v2345_v55  ;;  %5212 = vpow2.f32 %v4785_v5  ;;  %4674 = vmatmul.msk.f32.gmra.mxu2 %vm1083_vm2, %v1054_v4  ;;  %vm3767_vm1 = vweird.f32 %v5211_v11 }
 0x3fe   :  { %v3759_v62 = vsel %vm3756_vm4, %v3758_v6, %v3754_v10  ;;  %5214 = vrcp.f32 %v2346_v8  ;;  %vm3768_vm7 = vmor %vm3766_vm5, %vm3767_vm1  ;;  %v3787_v54 = vand.u32 2147483648, %v2346_v8  ;;  %v3785_v19 = vand.u32 2147483647, %v2346_v8 }
 0x3ff   :  { %4393 = vst.msk [vmem:[%s7134_s5 + $0x2d8] sm:$0xff] %vm4301_vm6, %v3759_v62  ;;  %v3763_v0 = vsub.f32 1.0, %v3762_v31  ;;  %v6877_v32 = vpop.f32.mrf.mxu3  ;;  %vm3781_vm10 = vweird.f32 %v2346_v8  ;;  %v905_v10 = vadd.f32 %v6827_v59, %v6832_v14 }
 0x400   :  { %v1770_v50 = vpop.f32.mrf.mxu2  ;;  %v3788_v22 = vor.u32 1.1754944e-38, %v3787_v54  ;;  %vm3786_vm12 = vcmp.eq.f32.partialorder %v3785_v19, 8.507059e+37 }
 0x401   :  { %v3764_v16 = vmul.f32 %v5211_v11, %v3763_v0  ;;  %v1771_v45 = vadd.f32 %v6874_v25, %v1770_v50  ;;  %v1058_v60 = vmax.f32 %v905_v10, 0.0 }
 0x403   :  { %v5213_v17 = vpop.eup %5212  ;;  %v3765_v18 = vadd.f32 %v5211_v11, %v3764_v16  ;;  %v4786_v23 = vmul.f32 -1.442695, %v1771_v45 }
 0x404   :  { %v5215_v29 = vpop.eup %5214  ;;  %v2347_v30 = vadd.f32 1.0, %v5213_v17 }
 0x405   :  { %v3769_v27 = vsel %vm3768_vm7, %v5211_v11, %v3765_v18  ;;  %v3777_v33 = vmul.f32 %v5215_v29, %v2346_v8  ;;  %5216 = vpow2.f32 %v4786_v23  ;;  %4675 = vmatmul.msk.f32.gmra.mxu2 %vm1083_vm2, %v1055_v21  ;;  %vm3782_vm9 = vweird.f32 %v5215_v29 }
 0x406   :  { %v3774_v34 = vsel %vm3771_vm8, %v3773_v48, %v3769_v27  ;;  %5218 = vrcp.f32 %v2347_v30  ;;  %vm3783_vm11 = vmor %vm3781_vm10, %vm3782_vm9  ;;  %v3802_v7 = vand.u32 2147483648, %v2347_v30  ;;  %v3800_v58 = vand.u32 2147483647, %v2347_v30 }
 0x407   :  { %4394 = vst.msk [vmem:[%s7134_s5 + $0x2e0] sm:$0xff] %vm4301_vm6, %v3774_v34  ;;  %v3778_v35 = vsub.f32 1.0, %v3777_v33  ;;  %v6887_v47 = vpop.f32.mrf.mxu3  ;;  %vm3796_vm14 = vweird.f32 %v2347_v30  ;;  %v908_v27 = vadd.f32 %v6827_v59, %v6842_v36 }
 0x408   :  { %v1773_v37 = vpop.f32.mrf.mxu2  ;;  %v3803_v1 = vor.u32 1.1754944e-38, %v3802_v7  ;;  %vm3801_vm0 = vcmp.eq.f32.partialorder %v3800_v58, 8.507059e+37 }
 0x409   :  { %v3779_v38 = vmul.f32 %v5215_v29, %v3778_v35  ;;  %v1774_v12 = vadd.f32 %v6874_v25, %v1773_v37  ;;  %v1059_v19 = vmax.f32 %v908_v27, 0.0 }
 0x40b   :  { %v5217_v39 = vpop.eup %5216  ;;  %v3780_v24 = vadd.f32 %v5215_v29, %v3779_v38  ;;  %v4787_v42 = vmul.f32 -1.442695, %v1774_v12 }
 0x40c   :  { %v5219_v44 = vpop.eup %5218  ;;  %v2348_v52 = vadd.f32 1.0, %v5217_v39 }
 0x40d   :  { %v3784_v49 = vsel %vm3783_vm11, %v5215_v29, %v3780_v24  ;;  %v3792_v28 = vmul.f32 %v5219_v44, %v2347_v30  ;;  %5220 = vpow2.f32 %v4787_v42  ;;  %4676 = vmatmul.msk.f32.gmra.mxu2 %vm1083_vm2, %v1056_v26  ;;  %vm3797_vm13 = vweird.f32 %v5219_v44 }
 0x40e   :  { %v3789_v51 = vsel %vm3786_vm12, %v3788_v22, %v3784_v49  ;;  %5222 = vrcp.f32 %v2348_v52  ;;  %vm3798_vm15 = vmor %vm3796_vm14, %vm3797_vm13  ;;  %v3817_v31 = vand.u32 2147483648, %v2348_v52  ;;  %v3815_v13 = vand.u32 2147483647, %v2348_v52 }
 0x40f   :  { %4395 = vst.msk [vmem:[%s7134_s5 + $0x2e8] sm:$0xff] %vm4301_vm6, %v3789_v51  ;;  %v3793_v55 = vsub.f32 1.0, %v3792_v28  ;;  %v6897_v5 = vpop.f32.mrf.mxu3  ;;  %vm3811_vm4 = vweird.f32 %v2348_v52  ;;  %v911_v49 = vadd.f32 %v6827_v59, %v6852_v53 }
 0x410   :  { %v1776_v56 = vpop.f32.mrf.mxu2  ;;  %v3818_v18 = vor.u32 1.1754944e-38, %v3817_v31  ;;  %vm3816_vm5 = vcmp.eq.f32.partialorder %v3815_v13, 8.507059e+37 }
 0x411   :  { %v3794_v43 = vmul.f32 %v5219_v44, %v3793_v55  ;;  %v1777_v40 = vadd.f32 %v6874_v25, %v1776_v56  ;;  %v1060_v58 = vmax.f32 %v911_v49, 0.0 }
 0x413   :  { %v5221_v2 = vpop.eup %5220  ;;  %v3795_v3 = vadd.f32 %v5219_v44, %v3794_v43  ;;  %v4788_v61 = vmul.f32 -1.442695, %v1777_v40 }
 0x414   :  { %v5223_v63 = vpop.eup %5222  ;;  %v2349_v4 = vadd.f32 1.0, %v5221_v2 }
 0x415   :  { %v3799_v11 = vsel %vm3798_vm15, %v5219_v44, %v3795_v3  ;;  %v3807_v57 = vmul.f32 %v5223_v63, %v2348_v52  ;;  %5224 = vpow2.f32 %v4788_v61  ;;  %4677 = vmatmul.msk.f32.gmra.mxu2 %vm1083_vm2, %v1057_v46  ;;  %vm3812_vm3 = vweird.f32 %v5223_v63 }
 0x416   :  { %v3804_v6 = vsel %vm3801_vm0, %v3803_v1, %v3799_v11  ;;  %5226 = vrcp.f32 %v2349_v4  ;;  %vm3813_vm1 = vmor %vm3811_vm4, %vm3812_vm3  ;;  %v3832_v33 = vand.u32 2147483648, %v2349_v4  ;;  %v3830_v20 = vand.u32 2147483647, %v2349_v4 }
 0x417   :  { %4396 = vst.msk [vmem:[%s7134_s5 + $0x2f0] sm:$0xff] %vm4301_vm6, %v3804_v6  ;;  %v3808_v8 = vsub.f32 1.0, %v3807_v57  ;;  %v6907_v23 = vpop.f32.mrf.mxu3  ;;  %vm3826_vm8 = vweird.f32 %v2349_v4  ;;  %v914_v11 = vadd.f32 %v6827_v59, %v6862_v9 }
 0x418   :  { %v1779_v62 = vpop.f32.mrf.mxu2  ;;  %v3833_v24 = vor.u32 1.1754944e-38, %v3832_v33  ;;  %vm3831_vm10 = vcmp.eq.f32.partialorder %v3830_v20, 8.507059e+37 }
 0x419   :  { %v3809_v0 = vmul.f32 %v5223_v63, %v3808_v8  ;;  %v1780_v15 = vadd.f32 %v6874_v25, %v1779_v62  ;;  %v1061_v13 = vmax.f32 %v914_v11, 0.0 }
 0x41b   :  { %v5225_v50 = vpop.eup %5224  ;;  %v3810_v16 = vadd.f32 %v5223_v63, %v3809_v0  ;;  %v4789_v45 = vmul.f32 -1.442695, %v1780_v15 }
 0x41c   :  { %v5227_v17 = vpop.eup %5226  ;;  %v2350_v21 = vadd.f32 1.0, %v5225_v50 }
 0x41d   :  { %v3814_v29 = vsel %vm3813_vm1, %v5223_v63, %v3810_v16  ;;  %v3822_v14 = vmul.f32 %v5227_v17, %v2349_v4  ;;  %5228 = vpow2.f32 %v4789_v45  ;;  %4678 = vmatmul.msk.f32.gmra.mxu2 %vm1083_vm2, %v1058_v60  ;;  %vm3827_vm7 = vweird.f32 %v5227_v17 }
 0x41e   :  { %v3819_v48 = vsel %vm3816_vm5, %v3818_v18, %v3814_v29  ;;  %5230 = vrcp.f32 %v2350_v21  ;;  %vm3828_vm9 = vmor %vm3826_vm8, %vm3827_vm7  ;;  %v3847_v28 = vand.u32 2147483648, %v2350_v21  ;;  %v3845_v41 = vand.u32 2147483647, %v2350_v21 }
 0x41f   :  { %4397 = vst.msk [vmem:[%s7134_s5 + $0x2f8] sm:$0xff] %vm4301_vm6, %v3819_v48  ;;  %v3823_v30 = vsub.f32 1.0, %v3822_v14  ;;  %v6917_v42 = vpop.f32.mrf.mxu3  ;;  %vm3841_vm12 = vweird.f32 %v2350_v21  ;;  %v917_v29 = vadd.f32 %v6827_v59, %v6877_v32 }
 0x420   :  { %v1782_v34 = vpop.f32.mrf.mxu2  ;;  %v3848_v3 = vor.u32 1.1754944e-38, %v3847_v28  ;;  %vm3846_vm14 = vcmp.eq.f32.partialorder %v3845_v41, 8.507059e+37 }
 0x421   :  { %v3824_v35 = vmul.f32 %v5227_v17, %v3823_v30  ;;  %v1783_v54 = vadd.f32 %v6874_v25, %v1782_v34  ;;  %v1062_v20 = vmax.f32 %v917_v29, 0.0 }
 0x423   :  { %v5229_v37 = vpop.eup %5228  ;;  %v3825_v38 = vadd.f32 %v5227_v17, %v3824_v35  ;;  %v4790_v12 = vmul.f32 -1.442695, %v1783_v54 }
 0x424   :  { %v5231_v39 = vpop.eup %5230  ;;  %v2351_v26 = vadd.f32 1.0, %v5229_v37 }
 0x425   :  { %v3829_v44 = vsel %vm3828_vm9, %v5227_v17, %v3825_v38  ;;  %v3837_v36 = vmul.f32 %v5231_v39, %v2350_v21  ;;  %5232 = vpow2.f32 %v4790_v12  ;;  %4679 = vmatmul.msk.f32.gmra.mxu2 %vm1083_vm2, %v1059_v19  ;;  %vm3842_vm11 = vweird.f32 %v5231_v39 }
 0x426   :  { %v3834_v22 = vsel %vm3831_vm10, %v3833_v24, %v3829_v44  ;;  %5234 = vrcp.f32 %v2351_v26  ;;  %vm3843_vm13 = vmor %vm3841_vm12, %vm3842_vm11  ;;  %v3862_v57 = vand.u32 2147483648, %v2351_v26  ;;  %v3860_v10 = vand.u32 2147483647, %v2351_v26 }
 0x427   :  { %4398 = vst.msk [vmem:[%s7134_s5 + $0x300] sm:$0xff] %vm4301_vm6, %v3834_v22  ;;  %v3838_v52 = vsub.f32 1.0, %v3837_v36  ;;  %v6927_v61 = vpop.f32.mrf.mxu3  ;;  %vm3856_vm0 = vweird.f32 %v2351_v26  ;;  %v920_v44 = vadd.f32 %v6827_v59, %v6887_v47 }
 0x428   :  { %v1785_v51 = vpop.f32.mrf.mxu2  ;;  %v3863_v16 = vor.u32 1.1754944e-38, %v3862_v57  ;;  %vm3861_vm4 = vcmp.eq.f32.partialorder %v3860_v10, 8.507059e+37 }
 0x429   :  { %v3839_v55 = vmul.f32 %v5231_v39, %v3838_v52  ;;  %v1786_v7 = vadd.f32 %v6874_v25, %v1785_v51  ;;  %v1063_v41 = vmax.f32 %v920_v44, 0.0 }
 0x42b   :  { %v5233_v56 = vpop.eup %5232  ;;  %v3840_v43 = vadd.f32 %v5231_v39, %v3839_v55  ;;  %v4791_v40 = vmul.f32 -1.442695, %v1786_v7 }
 0x42c   :  { %v5235_v2 = vpop.eup %5234  ;;  %v2352_v46 = vadd.f32 1.0, %v5233_v56 }
 0x42d   :  { %v3844_v63 = vsel %vm3843_vm13, %v5231_v39, %v3840_v43  ;;  %v3852_v53 = vmul.f32 %v5235_v2, %v2351_v26  ;;  %5236 = vpow2.f32 %v4791_v40  ;;  %4680 = vmatmul.msk.f32.gmra.mxu2 %vm1083_vm2, %v1060_v58  ;;  %vm3857_vm15 = vweird.f32 %v5235_v2 }
 0x42e   :  { %v3849_v1 = vsel %vm3846_vm14, %v3848_v3, %v3844_v63  ;;  %5238 = vrcp.f32 %v2352_v46  ;;  %vm3858_vm3 = vmor %vm3856_vm0, %vm3857_vm15  ;;  %v3877_v14 = vand.u32 2147483648, %v2352_v46  ;;  %v3875_v27 = vand.u32 2147483647, %v2352_v46 }
 0x42f   :  { %4399 = vst.msk [vmem:[%s7134_s5 + $0x308] sm:$0xff] %vm4301_vm6, %v3849_v1  ;;  %v3853_v4 = vsub.f32 1.0, %v3852_v53  ;;  %v6937_v45 = vpop.f32.mrf.mxu3  ;;  %vm3871_vm5 = vweird.f32 %v2352_v46  ;;  %v923_v63 = vadd.f32 %v6827_v59, %v6897_v5 }
 0x430   :  { %v1788_v6 = vpop.f32.mrf.mxu2  ;;  %v3878_v38 = vor.u32 1.1754944e-38, %v3877_v14  ;;  %vm3876_vm8 = vcmp.eq.f32.partialorder %v3875_v27, 8.507059e+37 }
 0x431   :  { %v3854_v8 = vmul.f32 %v5235_v2, %v3853_v4  ;;  %v1789_v31 = vadd.f32 %v6874_v25, %v1788_v6 }
 0x433   :  { %v5237_v62 = vpop.eup %5236  ;;  %v3855_v0 = vadd.f32 %v5235_v2, %v3854_v8  ;;  %v4792_v15 = vmul.f32 -1.442695, %v1789_v31 }
 0x434   :  { %v5239_v50 = vpop.eup %5238  ;;  %v2353_v60 = vadd.f32 1.0, %v5237_v62  ;;  %v1064_v62 = vmax.f32 %v923_v63, 0.0 }
 0x435   :  { %v3859_v17 = vsel %vm3858_vm3, %v5235_v2, %v3855_v0  ;;  %v3867_v9 = vmul.f32 %v5239_v50, %v2352_v46  ;;  %5240 = vpow2.f32 %v4792_v15  ;;  %4681 = vmatmul.msk.f32.gmra.mxu2 %vm1083_vm2, %v1061_v13  ;;  %vm3872_vm1 = vweird.f32 %v5239_v50 }
 0x436   :  { %v3864_v18 = vsel %vm3861_vm4, %v3863_v16, %v3859_v17  ;;  %5242 = vrcp.f32 %v2353_v60  ;;  %vm3873_vm7 = vmor %vm3871_vm5, %vm3872_vm1  ;;  %v3892_v36 = vand.u32 2147483648, %v2353_v60  ;;  %v3890_v49 = vand.u32 2147483647, %v2353_v60 }
 0x437   :  { %4400 = vst.msk [vmem:[%s7134_s5 + $0x310] sm:$0xff] %vm4301_vm6, %v3864_v18  ;;  %v3868_v21 = vsub.f32 1.0, %v3867_v9  ;;  %v6947_v12 = vpop.f32.mrf.mxu3  ;;  %vm3886_vm10 = vweird.f32 %v2353_v60  ;;  %v926_v9 = vadd.f32 %v6827_v59, %v6907_v23 }
 0x438   :  { %v1791_v48 = vpop.f32.mrf.mxu2  ;;  %v3893_v43 = vor.u32 1.1754944e-38, %v3892_v36  ;;  %vm3891_vm12 = vcmp.eq.f32.partialorder %v3890_v49, 8.507059e+37 }
 0x439   :  { %v3869_v30 = vmul.f32 %v5239_v50, %v3868_v21  ;;  %v1792_v33 = vadd.f32 %v6874_v25, %v1791_v48 }
 0x43b   :  { %v5241_v34 = vpop.eup %5240  ;;  %v3870_v35 = vadd.f32 %v5239_v50, %v3869_v30  ;;  %v4793_v54 = vmul.f32 -1.442695, %v1792_v33  ;;  %v1065_v33 = vmax.f32 %v926_v9, 0.0 }
 0x43c   :  { %v5243_v37 = vpop.eup %5242  ;;  %v2354_v19 = vadd.f32 1.0, %v5241_v34 }
 0x43d   :  { %v3874_v39 = vsel %vm3873_vm7, %v5239_v50, %v3870_v35  ;;  %v3882_v32 = vmul.f32 %v5243_v37, %v2353_v60  ;;  %5244 = vpow2.f32 %v4793_v54  ;;  %4682 = vmatmul.msk.f32.gmra.mxu2 %vm1083_vm2, %v1062_v20  ;;  %vm3887_vm9 = vweird.f32 %v5243_v37 }
 0x43e   :  { %v3879_v24 = vsel %vm3876_vm8, %v3878_v38, %v3874_v39  ;;  %5246 = vrcp.f32 %v2354_v19  ;;  %vm3888_vm11 = vmor %vm3886_vm10, %vm3887_vm9  ;;  %v3905_v1 = vand.u32 2147483647, %v2354_v19  ;;  %v3907_v4 = vand.u32 2147483648, %v2354_v19 }
 0x43f   :  { %4401 = vst.msk [vmem:[%s7134_s5 + $0x318] sm:$0xff] %vm4301_vm6, %v3879_v24  ;;  %v3883_v26 = vsub.f32 1.0, %v3882_v32  ;;  %v940_v40 = vpop.f32.mrf.mxu3  ;;  %vm3901_vm14 = vweird.f32 %v2354_v19  ;;  %v929_v39 = vadd.f32 %v6827_v59, %v6917_v42 }
 0x440   :  { %v1794_v22 = vpop.f32.mrf.mxu2  ;;  %v941_v53 = vadd.f32 %v6827_v59, %v940_v40  ;;  %v3908_v5 = vor.u32 1.1754944e-38, %v3907_v4  ;;  %vm3906_vm0 = vcmp.eq.f32.partialorder %v3905_v1, 8.507059e+37 }
 0x441   :  { %v3884_v52 = vmul.f32 %v5243_v37, %v3883_v26  ;;  %v1795_v28 = vadd.f32 %v6874_v25, %v1794_v22  ;;  %v1066_v49 = vmax.f32 %v929_v39, 0.0 }
 0x442   :  { %v1070_v8 = vmax.f32 %v941_v53, 0.0 }
 0x443   :  { %v5245_v51 = vpop.eup %5244  ;;  %v3885_v55 = vadd.f32 %v5243_v37, %v3884_v52  ;;  %v4794_v7 = vmul.f32 -1.442695, %v1795_v28 }
 0x444   :  { %v5247_v56 = vpop.eup %5246  ;;  %v2355_v58 = vadd.f32 1.0, %v5245_v51  ;;  %4690 = vmatmul.msk.f32.vlgmr.msrb.gmra.mxu3 %vm1083_vm2, %v1070_v8 }
 0x445   :  { %v3889_v2 = vsel %vm3888_vm11, %v5243_v37, %v3885_v55  ;;  %v3897_v47 = vmul.f32 %v5247_v56, %v2354_v19  ;;  %5248 = vpow2.f32 %v4794_v7  ;;  %4683 = vmatmul.msk.f32.gmra.mxu2 %vm1083_vm2, %v1063_v41  ;;  %vm3902_vm13 = vweird.f32 %v5247_v56 }
 0x446   :  { %v3894_v3 = vsel %vm3891_vm12, %v3893_v43, %v3889_v2  ;;  %5250 = vrcp.f32 %v2355_v58  ;;  %vm3903_vm15 = vmor %vm3901_vm14, %vm3902_vm13  ;;  %v3922_v18 = vand.u32 2147483648, %v2355_v58  ;;  %v3920_v14 = vand.u32 2147483647, %v2355_v58 }
 0x447   :  { %4402 = vst.msk [vmem:[%s7134_s5 + $0x320] sm:$0xff] %vm4301_vm6, %v3894_v3  ;;  %v3898_v46 = vsub.f32 1.0, %v3897_v47  ;;  %vm3916_vm4 = vweird.f32 %v2355_v58 }
 0x448   :  { %v1797_v11 = vpop.f32.mrf.mxu2  ;;  %v3923_v20 = vor.u32 1.1754944e-38, %v3922_v18  ;;  %vm3921_vm5 = vcmp.eq.f32.partialorder %v3920_v14, 8.507059e+37 }
 0x449   :  { %v3899_v57 = vmul.f32 %v5247_v56, %v3898_v46  ;;  %v1798_v6 = vadd.f32 %v6874_v25, %v1797_v11 }
 0x44b   :  { %v5249_v10 = vpop.eup %5248  ;;  %v3900_v31 = vadd.f32 %v5247_v56, %v3899_v57  ;;  %v4795_v0 = vmul.f32 -1.442695, %v1798_v6 }
 0x44c   :  { %v5251_v13 = vpop.eup %5250  ;;  %v2356_v15 = vadd.f32 1.0, %v5249_v10 }
 0x44d   :  { %v3904_v50 = vsel %vm3903_vm15, %v5247_v56, %v3900_v31  ;;  %v3912_v16 = vmul.f32 %v5251_v13, %v2355_v58  ;;  %5252 = vpow2.f32 %v4795_v0  ;;  %4684 = vmatmul.msk.f32.gmra.mxu2 %vm1083_vm2, %v1064_v62  ;;  %vm3917_vm3 = vweird.f32 %v5251_v13 }
 0x44e   :  { %v3909_v60 = vsel %vm3906_vm0, %v3908_v5, %v3904_v50  ;;  %5254 = vrcp.f32 %v2356_v15  ;;  %vm3918_vm1 = vmor %vm3916_vm4, %vm3917_vm3  ;;  %v3937_v32 = vand.u32 2147483648, %v2356_v15  ;;  %v3935_v44 = vand.u32 2147483647, %v2356_v15 }
 0x44f   :  { %4403 = vst.msk [vmem:[%s7134_s5 + $0x328] sm:$0xff] %vm4301_vm6, %v3909_v60  ;;  %v3913_v17 = vsub.f32 1.0, %v3912_v16  ;;  %vm3931_vm8 = vweird.f32 %v2356_v15  ;;  %v932_v58 = vadd.f32 %v6827_v59, %v6927_v61  ;;  %v935_v62 = vadd.f32 %v6827_v59, %v6937_v45 }
 0x450   :  { %v1800_v21 = vpop.f32.mrf.mxu2  ;;  %v3938_v55 = vor.u32 1.1754944e-38, %v3937_v32  ;;  %vm3936_vm10 = vcmp.eq.f32.partialorder %v3935_v44, 8.507059e+37 }
 0x451   :  { %v3914_v29 = vmul.f32 %v5251_v13, %v3913_v17  ;;  %v1801_v48 = vadd.f32 %v6874_v25, %v1800_v21  ;;  %v1067_v1 = vmax.f32 %v932_v58, 0.0  ;;  %v1068_v17 = vmax.f32 %v935_v62, 0.0 }
 0x453   :  { %v5253_v30 = vpop.eup %5252  ;;  %v3915_v27 = vadd.f32 %v5251_v13, %v3914_v29  ;;  %v4796_v34 = vmul.f32 -1.442695, %v1801_v48 }
 0x454   :  { %v5255_v35 = vpop.eup %5254  ;;  %v2357_v54 = vadd.f32 1.0, %v5253_v30 }
 0x455   :  { %v3919_v37 = vsel %vm3918_vm1, %v5251_v13, %v3915_v27  ;;  %v3927_v38 = vmul.f32 %v5255_v35, %v2356_v15  ;;  %5256 = vpow2.f32 %v4796_v34  ;;  %4685 = vmatmul.msk.f32.gmra.mxu2 %vm1083_vm2, %v1065_v33  ;;  %vm3932_vm7 = vweird.f32 %v5255_v35 }
 0x456   :  { %v3924_v23 = vsel %vm3921_vm5, %v3923_v20, %v3919_v37  ;;  %5258 = vrcp.f32 %v2357_v54  ;;  %vm3933_vm9 = vmor %vm3931_vm8, %vm3932_vm7  ;;  %v3952_v40 = vand.u32 2147483648, %v2357_v54  ;;  %v3950_v3 = vand.u32 2147483647, %v2357_v54 }
 0x457   :  { %4404 = vst.msk [vmem:[%s7134_s5 + $0x330] sm:$0xff] %vm4301_vm6, %v3924_v23  ;;  %v3928_v19 = vsub.f32 1.0, %v3927_v38  ;;  %vm3946_vm12 = vweird.f32 %v2357_v54  ;;  %v938_v27 = vadd.f32 %v6827_v59, %v6947_v12 }
 0x458   :  { %v1803_v24 = vpop.f32.mrf.mxu2  ;;  %v3953_v57 = vor.u32 1.1754944e-38, %v3952_v40  ;;  %vm3951_vm14 = vcmp.eq.f32.partialorder %v3950_v3, 8.507059e+37 }
 0x459   :  { %v3929_v26 = vmul.f32 %v5255_v35, %v3928_v19  ;;  %v1804_v36 = vadd.f32 %v6874_v25, %v1803_v24  ;;  %v1069_v23 = vmax.f32 %v938_v27, 0.0 }
 0x45b   :  { %v5257_v22 = vpop.eup %5256  ;;  %v3930_v52 = vadd.f32 %v5255_v35, %v3929_v26  ;;  %v4797_v28 = vmul.f32 -1.442695, %v1804_v36 }
 0x45c   :  { %v5259_v51 = vpop.eup %5258  ;;  %v2358_v41 = vadd.f32 1.0, %v5257_v22 }
 0x45d   :  { %v3934_v7 = vsel %vm3933_vm9, %v5255_v35, %v3930_v52  ;;  %v3942_v56 = vmul.f32 %v5259_v51, %v2357_v54  ;;  %5260 = vpow2.f32 %v4797_v28  ;;  %4686 = vmatmul.msk.f32.gmra.mxu2 %vm1083_vm2, %v1066_v49  ;;  %vm3947_vm11 = vweird.f32 %v5259_v51 }
 0x45e   :  { %v3939_v42 = vsel %vm3936_vm10, %v3938_v55, %v3934_v7  ;;  %5262 = vrcp.f32 %v2358_v41  ;;  %vm3948_vm13 = vmor %vm3946_vm12, %vm3947_vm11  ;;  %v3967_v0 = vand.u32 2147483648, %v2358_v41  ;;  %v3965_v15 = vand.u32 2147483647, %v2358_v41 }
 0x45f   :  { %4405 = vst.msk [vmem:[%s7134_s5 + $0x338] sm:$0xff] %vm4301_vm6, %v3939_v42  ;;  %v3943_v43 = vsub.f32 1.0, %v3942_v56  ;;  %vm3961_vm0 = vweird.f32 %v2358_v41 }
 0x460   :  { %v1806_v2 = vpop.f32.mrf.mxu2  ;;  %v3968_v21 = vor.u32 1.1754944e-38, %v3967_v0  ;;  %vm3966_vm4 = vcmp.eq.f32.partialorder %v3965_v15, 8.507059e+37 }
 0x461   :  { %v3944_v47 = vmul.f32 %v5259_v51, %v3943_v43  ;;  %v1807_v46 = vadd.f32 %v6874_v25, %v1806_v2 }
 0x463   :  { %v5261_v63 = vpop.eup %5260  ;;  %v3945_v53 = vadd.f32 %v5259_v51, %v3944_v47  ;;  %v4798_v4 = vmul.f32 -1.442695, %v1807_v46 }
 0x464   :  { %v5263_v11 = vpop.eup %5262  ;;  %v2359_v6 = vadd.f32 1.0, %v5261_v63 }
 0x465   :  { %v3949_v8 = vsel %vm3948_vm13, %v5259_v51, %v3945_v53  ;;  %v3957_v10 = vmul.f32 %v5263_v11, %v2358_v41  ;;  %5264 = vpow2.f32 %v4798_v4  ;;  %4687 = vmatmul.msk.f32.gmra.mxu2 %vm1083_vm2, %v1067_v1  ;;  %vm3962_vm15 = vweird.f32 %v5263_v11 }
 0x466   :  { %v3954_v61 = vsel %vm3951_vm14, %v3953_v57, %v3949_v8  ;;  %5266 = vrcp.f32 %v2359_v6  ;;  %vm3963_vm3 = vmor %vm3961_vm0, %vm3962_vm15  ;;  %v3982_v33 = vand.u32 2147483648, %v2359_v6  ;;  %v3980_v20 = vand.u32 2147483647, %v2359_v6 }
 0x467   :  { %4406 = vst.msk [vmem:[%s7134_s5 + $0x340] sm:$0xff] %vm4301_vm6, %v3954_v61  ;;  %v3958_v31 = vsub.f32 1.0, %v3957_v10  ;;  %vm3976_vm5 = vweird.f32 %v2359_v6 }
 0x468   :  { %v1809_v13 = vpop.f32.mrf.mxu2  ;;  %v3983_v32 = vor.u32 1.1754944e-38, %v3982_v33  ;;  %vm3981_vm8 = vcmp.eq.f32.partialorder %v3980_v20, 8.507059e+37 }
 0x469   :  { %v3959_v5 = vmul.f32 %v5263_v11, %v3958_v31  ;;  %v1810_v50 = vadd.f32 %v6874_v25, %v1809_v13 }
 0x46b   :  { %v5265_v16 = vpop.eup %5264  ;;  %v3960_v60 = vadd.f32 %v5263_v11, %v3959_v5  ;;  %v4799_v9 = vmul.f32 -1.442695, %v1810_v50 }
 0x46c   :  { %v5267_v18 = vpop.eup %5266  ;;  %v2360_v29 = vadd.f32 1.0, %v5265_v16 }
 0x46d   :  { %v3964_v14 = vsel %vm3963_vm3, %v5263_v11, %v3960_v60  ;;  %v3972_v48 = vmul.f32 %v5267_v18, %v2359_v6  ;;  %5268 = vpow2.f32 %v4799_v9  ;;  %4688 = vmatmul.msk.f32.gmra.mxu2 %vm1083_vm2, %v1068_v17  ;;  %vm3977_vm1 = vweird.f32 %v5267_v18 }
 0x46e   :  { %v3969_v45 = vsel %vm3966_vm4, %v3968_v21, %v3964_v14  ;;  %5270 = vrcp.f32 %v2360_v29  ;;  %vm3978_vm7 = vmor %vm3976_vm5, %vm3977_vm1  ;;  %v3997_v36 = vand.u32 2147483648, %v2360_v29  ;;  %v3995_v49 = vand.u32 2147483647, %v2360_v29 }
 0x46f   :  { %4407 = vst.msk [vmem:[%s7134_s5 + $0x348] sm:$0xff] %vm4301_vm6, %v3969_v45  ;;  %v3973_v30 = vsub.f32 1.0, %v3972_v48  ;;  %vm3991_vm10 = vweird.f32 %v2360_v29 }
 0x470   :  { %v1812_v34 = vpop.f32.mrf.mxu2  ;;  %v3998_v56 = vor.u32 1.1754944e-38, %v3997_v36  ;;  %vm3996_vm11 = vcmp.eq.f32.partialorder %v3995_v49, 8.507059e+37 }
 0x471   :  { %v3974_v35 = vmul.f32 %v5267_v18, %v3973_v30  ;;  %v1813_v54 = vadd.f32 %v6874_v25, %v1812_v34 }
 0x473   :  { %v5269_v37 = vpop.eup %5268  ;;  %v3975_v38 = vadd.f32 %v5267_v18, %v3974_v35  ;;  %v4800_v19 = vmul.f32 -1.442695, %v1813_v54 }
 0x474   :  { %v5271_v39 = vpop.eup %5270  ;;  %v2361_v24 = vadd.f32 1.0, %v5269_v37 }
 0x475   :  { %v3979_v26 = vsel %vm3978_vm7, %v5267_v18, %v3975_v38  ;;  %v3987_v44 = vmul.f32 %v5271_v39, %v2360_v29  ;;  %5272 = vpow2.f32 %v4800_v19  ;;  %4689 = vmatmul.msk.f32.gmra.mxu2 %vm1083_vm2, %v1069_v23  ;;  %vm3992_vm9 = vweird.f32 %v5271_v39 }
 0x476   :  { %v3984_v59 = vsel %vm3981_vm8, %v3983_v32, %v3979_v26  ;;  %5274 = vrcp.f32 %v2361_v24  ;;  %vm3993_vm2 = vmor %vm3991_vm10, %vm3992_vm9  ;;  %v4012_v47 = vand.u32 2147483648, %v2361_v24  ;;  %v4010_v63 = vand.u32 2147483647, %v2361_v24 }
 0x477   :  { %4408 = vst.msk [vmem:[%s7134_s5 + $0x350] sm:$0xff] %vm4301_vm6, %v3984_v59  ;;  %v3988_v12 = vsub.f32 1.0, %v3987_v44  ;;  %vm4006_vm13 = vweird.f32 %v2361_v24 }
 0x478   :  { %v1815_v22 = vpop.f32.mrf.mxu2  ;;  %v4013_v6 = vor.u32 1.1754944e-38, %v4012_v47  ;;  %vm4011_vm15 = vcmp.eq.f32.partialorder %v4010_v63, 8.507059e+37 }
 0x479   :  { %v3989_v52 = vmul.f32 %v5271_v39, %v3988_v12  ;;  %v1816_v28 = vadd.f32 %v6874_v25, %v1815_v22 }
 0x47b   :  { %v5273_v51 = vpop.eup %5272  ;;  %v3990_v55 = vadd.f32 %v5271_v39, %v3989_v52  ;;  %v4801_v41 = vmul.f32 -1.442695, %v1816_v28 }
 0x47c   :  { %v5275_v7 = vpop.eup %5274  ;;  %v2362_v42 = vadd.f32 1.0, %v5273_v51 }
 0x47d   :  { %v3994_v43 = vsel %vm3993_vm2, %v5271_v39, %v3990_v55  ;;  %v4002_v58 = vmul.f32 %v5275_v7, %v2361_v24  ;;  %5276 = vpow2.f32 %v4801_v41  ;;  %vm4007_vm12 = vweird.f32 %v5275_v7 }
 0x47e   :  { %v3999_v40 = vsel %vm3996_vm11, %v3998_v56, %v3994_v43  ;;  %5278 = vrcp.f32 %v2362_v42  ;;  %vm4008_vm14 = vmor %vm4006_vm13, %vm4007_vm12  ;;  %v4027_v0 = vand.u32 2147483648, %v2362_v42  ;;  %v4025_v15 = vand.u32 2147483647, %v2362_v42 }
 0x47f   :  { %4409 = vst.msk [vmem:[%s7134_s5 + $0x358] sm:$0xff] %vm4301_vm6, %v3999_v40  ;;  %v4003_v2 = vsub.f32 1.0, %v4002_v58  ;;  %vm4021_vm3 = vweird.f32 %v2362_v42 }
 0x480   :  { %v1818_v3 = vpop.f32.mrf.mxu2  ;;  %v4028_v18 = vor.u32 1.1754944e-38, %v4027_v0  ;;  %vm4026_vm1 = vcmp.eq.f32.partialorder %v4025_v15, 8.507059e+37  ;;  %v7045_v0 = vld [vmem:[%s7133_s4] ss:$0 sm:$0xff] }
 0x481   :  { %v4004_v46 = vmul.f32 %v5275_v7, %v4003_v2  ;;  %v1819_v53 = vadd.f32 %v6874_v25, %v1818_v3 }
 0x483   :  { %v5277_v1 = vpop.eup %5276  ;;  %v4005_v4 = vadd.f32 %v5275_v7, %v4004_v46  ;;  %v4802_v11 = vmul.f32 -1.442695, %v1819_v53 }
 0x484   :  { %v5279_v57 = vpop.eup %5278  ;;  %v2363_v8 = vadd.f32 1.0, %v5277_v1 }
 0x485   :  { %v4009_v10 = vsel %vm4008_vm14, %v5275_v7, %v4005_v4  ;;  %v4017_v61 = vmul.f32 %v5279_v57, %v2362_v42  ;;  %5280 = vpow2.f32 %v4802_v11  ;;  %vm4022_vm0 = vweird.f32 %v5279_v57 }
 0x486   :  { %v4014_v31 = vsel %vm4011_vm15, %v4013_v6, %v4009_v10  ;;  %5282 = vrcp.f32 %v2363_v8  ;;  %vm4023_vm4 = vmor %vm4021_vm3, %vm4022_vm0  ;;  %v4042_v30 = vand.u32 2147483648, %v2363_v8  ;;  %v4040_v34 = vand.u32 2147483647, %v2363_v8 }
 0x487   :  { %4410 = vst.msk [vmem:[%s7134_s5 + $0x360] sm:$0xff] %vm4301_vm6, %v4014_v31  ;;  %v4018_v62 = vsub.f32 1.0, %v4017_v61  ;;  %vm4036_vm7 = vweird.f32 %v2363_v8 }
 0x488   :  { %v1821_v13 = vpop.f32.mrf.mxu2  ;;  %v4043_v23 = vor.u32 1.1754944e-38, %v4042_v30  ;;  %vm4041_vm9 = vcmp.eq.f32.partialorder %v4040_v34, 8.507059e+37 }
 0x489   :  { %v4019_v5 = vmul.f32 %v5279_v57, %v4018_v62  ;;  %v1822_v50 = vadd.f32 %v6874_v25, %v1821_v13 }
 0x48b   :  { %v5281_v16 = vpop.eup %5280  ;;  %v4020_v60 = vadd.f32 %v5279_v57, %v4019_v5  ;;  %v4803_v17 = vmul.f32 -1.442695, %v1822_v50 }
 0x48c   :  { %v5283_v9 = vpop.eup %5282  ;;  %v2364_v21 = vadd.f32 1.0, %v5281_v16 }
 0x48d   :  { %v4024_v29 = vsel %vm4023_vm4, %v5279_v57, %v4020_v60  ;;  %v4032_v14 = vmul.f32 %v5283_v9, %v2363_v8  ;;  %5284 = vpow2.f32 %v4803_v17  ;;  %vm4037_vm5 = vweird.f32 %v5283_v9 }
 0x48e   :  { %v4029_v48 = vsel %vm4026_vm1, %v4028_v18, %v4024_v29  ;;  %5286 = vrcp.f32 %v2364_v21  ;;  %vm4038_vm8 = vmor %vm4036_vm7, %vm4037_vm5  ;;  %v4057_v44 = vand.u32 2147483648, %v2364_v21  ;;  %v4055_v36 = vand.u32 2147483647, %v2364_v21 }
 0x48f   :  { %4411 = vst.msk [vmem:[%s7134_s5 + $0x368] sm:$0xff] %vm4301_vm6, %v4029_v48  ;;  %v4033_v45 = vsub.f32 1.0, %v4032_v14  ;;  %vm4051_vm2 = vweird.f32 %v2364_v21 }
 0x490   :  { %v1824_v27 = vpop.f32.mrf.mxu2  ;;  %v4058_v55 = vor.u32 1.1754944e-38, %v4057_v44  ;;  %vm4056_vm12 = vcmp.eq.f32.partialorder %v4055_v36, 8.507059e+37 }
 0x491   :  { %v4034_v33 = vmul.f32 %v5283_v9, %v4033_v45  ;;  %v1825_v35 = vadd.f32 %v6874_v25, %v1824_v27 }
 0x493   :  { %v5285_v20 = vpop.eup %5284  ;;  %v4035_v54 = vadd.f32 %v5283_v9, %v4034_v33  ;;  %v4804_v37 = vmul.f32 -1.442695, %v1825_v35 }
 0x494   :  { %v5287_v38 = vpop.eup %5286  ;;  %v2365_v19 = vadd.f32 1.0, %v5285_v20 }
 0x495   :  { %v4039_v39 = vsel %vm4038_vm8, %v5283_v9, %v4035_v54  ;;  %v4047_v32 = vmul.f32 %v5287_v38, %v2364_v21  ;;  %5288 = vpow2.f32 %v4804_v37  ;;  %vm4052_vm10 = vweird.f32 %v5287_v38 }
 0x496   :  { %v4044_v24 = vsel %vm4041_vm9, %v4043_v23, %v4039_v39  ;;  %5290 = vrcp.f32 %v2365_v19  ;;  %vm4053_vm11 = vmor %vm4051_vm2, %vm4052_vm10  ;;  %v4072_v58 = vand.u32 2147483648, %v2365_v19  ;;  %v4070_v47 = vand.u32 2147483647, %v2365_v19 }
 0x497   :  { %4412 = vst.msk [vmem:[%s7134_s5 + $0x370] sm:$0xff] %vm4301_vm6, %v4044_v24  ;;  %v4048_v26 = vsub.f32 1.0, %v4047_v32  ;;  %vm4066_vm14 = vweird.f32 %v2365_v19 }
 0x498   :  { %v1827_v59 = vpop.f32.mrf.mxu2  ;;  %v4073_v4 = vor.u32 1.1754944e-38, %v4072_v58  ;;  %vm4071_vm0 = vcmp.eq.f32.partialorder %v4070_v47, 8.507059e+37 }
 0x499   :  { %v4049_v12 = vmul.f32 %v5287_v38, %v4048_v26  ;;  %v1828_v22 = vadd.f32 %v6874_v25, %v1827_v59 }
 0x49b   :  { %v5289_v52 = vpop.eup %5288  ;;  %v4050_v49 = vadd.f32 %v5287_v38, %v4049_v12  ;;  %v4805_v28 = vmul.f32 -1.442695, %v1828_v22 }
 0x49c   :  { %v5291_v51 = vpop.eup %5290  ;;  %v2366_v41 = vadd.f32 1.0, %v5289_v52 }
 0x49d   :  { %v4054_v7 = vsel %vm4053_vm11, %v5287_v38, %v4050_v49  ;;  %v4062_v56 = vmul.f32 %v5291_v51, %v2365_v19  ;;  %5292 = vpow2.f32 %v4805_v28  ;;  %vm4067_vm13 = vweird.f32 %v5291_v51 }
 0x49e   :  { %v4059_v42 = vsel %vm4056_vm12, %v4058_v55, %v4054_v7  ;;  %5294 = vrcp.f32 %v2366_v41  ;;  %vm4068_vm15 = vmor %vm4066_vm14, %vm4067_vm13  ;;  %v4087_v10 = vand.u32 2147483648, %v2366_v41  ;;  %v4085_v62 = vand.u32 2147483647, %v2366_v41 }
 0x49f   :  { %4413 = vst.msk [vmem:[%s7134_s5 + $0x378] sm:$0xff] %vm4301_vm6, %v4059_v42  ;;  %v4063_v43 = vsub.f32 1.0, %v4062_v56  ;;  %vm4081_vm4 = vweird.f32 %v2366_v41 }
 0x4a0   :  { %v1830_v40 = vpop.f32.mrf.mxu2  ;;  %v4088_v60 = vor.u32 1.1754944e-38, %v4087_v10  ;;  %vm4086_vm5 = vcmp.eq.f32.partialorder %v4085_v62, 8.507059e+37 }
 0x4a1   :  { %v4064_v2 = vmul.f32 %v5291_v51, %v4063_v43  ;;  %v1831_v3 = vadd.f32 %v6874_v25, %v1830_v40 }
 0x4a3   :  { %v5293_v46 = vpop.eup %5292  ;;  %v4065_v63 = vadd.f32 %v5291_v51, %v4064_v2  ;;  %v4806_v53 = vmul.f32 -1.442695, %v1831_v3 }
 0x4a4   :  { %v5295_v1 = vpop.eup %5294  ;;  %v2367_v11 = vadd.f32 1.0, %v5293_v46 }
 0x4a5   :  { %v4069_v57 = vsel %vm4068_vm15, %v5291_v51, %v4065_v63  ;;  %v4077_v6 = vmul.f32 %v5295_v1, %v2366_v41  ;;  %5296 = vpow2.f32 %v4806_v53  ;;  %vm4082_vm3 = vweird.f32 %v5295_v1 }
 0x4a6   :  { %v4074_v8 = vsel %vm4071_vm0, %v4073_v4, %v4069_v57  ;;  %5298 = vrcp.f32 %v2367_v11  ;;  %vm4083_vm1 = vmor %vm4081_vm4, %vm4082_vm3  ;;  %v4102_v14 = vand.u32 2147483648, %v2367_v11  ;;  %v4100_v30 = vand.u32 2147483647, %v2367_v11 }
 0x4a7   :  { %4414 = vst.msk [vmem:[%s7134_s5 + $0x380] sm:$0xff] %vm4301_vm6, %v4074_v8  ;;  %v4078_v25 = vsub.f32 1.0, %v4077_v6  ;;  %vm4096_vm8 = vweird.f32 %v2367_v11 }
 0x4a8   :  { %v1833_v61 = vpop.f32.mrf.mxu2  ;;  %v4103_v54 = vor.u32 1.1754944e-38, %v4102_v14  ;;  %vm4101_vm10 = vcmp.eq.f32.partialorder %v4100_v30, 8.507059e+37 }
 0x4a9   :  { %v4079_v31 = vmul.f32 %v5295_v1, %v4078_v25  ;;  %v1834_v13 = vadd.f32 %v7045_v0, %v1833_v61 }
 0x4ab   :  { %v5297_v5 = vpop.eup %5296  ;;  %v4080_v15 = vadd.f32 %v5295_v1, %v4079_v31  ;;  %v4807_v50 = vmul.f32 -1.442695, %v1834_v13 }
 0x4ac   :  { %v5299_v16 = vpop.eup %5298  ;;  %v2368_v17 = vadd.f32 1.0, %v5297_v5 }
 0x4ad   :  { %v4084_v9 = vsel %vm4083_vm1, %v5295_v1, %v4080_v15  ;;  %v4092_v18 = vmul.f32 %v5299_v16, %v2367_v11  ;;  %5300 = vpow2.f32 %v4807_v50  ;;  %vm4097_vm7 = vweird.f32 %v5299_v16 }
 0x4ae   :  { %v4089_v21 = vsel %vm4086_vm5, %v4088_v60, %v4084_v9  ;;  %5302 = vrcp.f32 %v2368_v17  ;;  %vm4098_vm9 = vmor %vm4096_vm8, %vm4097_vm7  ;;  %v4117_v32 = vand.u32 2147483648, %v2368_v17  ;;  %v4115_v44 = vand.u32 2147483647, %v2368_v17 }
 0x4af   :  { %4415 = vst.msk [vmem:[%s7134_s5 + $0x388] sm:$0xff] %vm4301_vm6, %v4089_v21  ;;  %v4093_v29 = vsub.f32 1.0, %v4092_v18  ;;  %vm4111_vm11 = vweird.f32 %v2368_v17 }
 0x4b0   :  { %v1836_v48 = vpop.f32.mrf.mxu2  ;;  %v4118_v49 = vor.u32 1.1754944e-38, %v4117_v32  ;;  %vm4116_vm13 = vcmp.eq.f32.partialorder %v4115_v44, 8.507059e+37 }
 0x4b1   :  { %v4094_v45 = vmul.f32 %v5299_v16, %v4093_v29  ;;  %v1837_v27 = vadd.f32 %v7045_v0, %v1836_v48 }
 0x4b3   :  { %v5301_v33 = vpop.eup %5300  ;;  %v4095_v34 = vadd.f32 %v5299_v16, %v4094_v45  ;;  %v4808_v35 = vmul.f32 -1.442695, %v1837_v27 }
 0x4b4   :  { %v5303_v20 = vpop.eup %5302  ;;  %v2369_v37 = vadd.f32 1.0, %v5301_v33 }
 0x4b5   :  { %v4099_v38 = vsel %vm4098_vm9, %v5299_v16, %v4095_v34  ;;  %v4107_v23 = vmul.f32 %v5303_v20, %v2368_v17  ;;  %5304 = vpow2.f32 %v4808_v35  ;;  %vm4112_vm2 = vweird.f32 %v5303_v20 }
 0x4b6   :  { %v4104_v19 = vsel %vm4101_vm10, %v4103_v54, %v4099_v38  ;;  %5306 = vrcp.f32 %v2369_v37  ;;  %vm4113_vm12 = vmor %vm4111_vm11, %vm4112_vm2  ;;  %v4132_v56 = vand.u32 2147483648, %v2369_v37  ;;  %v4130_v58 = vand.u32 2147483647, %v2369_v37 }
 0x4b7   :  { %4416 = vst.msk [vmem:[%s7134_s5 + $0x390] sm:$0xff] %vm4301_vm6, %v4104_v19  ;;  %v4108_v39 = vsub.f32 1.0, %v4107_v23  ;;  %vm4126_vm15 = vweird.f32 %v2369_v37 }
 0x4b8   :  { %v1839_v24 = vpop.f32.mrf.mxu2  ;;  %v4133_v63 = vor.u32 1.1754944e-38, %v4132_v56  ;;  %vm4131_vm3 = vcmp.eq.f32.partialorder %v4130_v58, 8.507059e+37 }
 0x4b9   :  { %v4109_v26 = vmul.f32 %v5303_v20, %v4108_v39  ;;  %v1840_v59 = vadd.f32 %v7045_v0, %v1839_v24 }
 0x4bb   :  { %v5305_v12 = vpop.eup %5304  ;;  %v4110_v36 = vadd.f32 %v5303_v20, %v4109_v26  ;;  %v4809_v22 = vmul.f32 -1.442695, %v1840_v59 }
 0x4bc   :  { %v5307_v52 = vpop.eup %5306  ;;  %v2370_v28 = vadd.f32 1.0, %v5305_v12 }
 0x4bd   :  { %v4114_v51 = vsel %vm4113_vm12, %v5303_v20, %v4110_v36  ;;  %v4122_v55 = vmul.f32 %v5307_v52, %v2369_v37  ;;  %5308 = vpow2.f32 %v4809_v22  ;;  %vm4127_vm14 = vweird.f32 %v5307_v52 }
 0x4be   :  { %v4119_v41 = vsel %vm4116_vm13, %v4118_v49, %v4114_v51  ;;  %5310 = vrcp.f32 %v2370_v28  ;;  %vm4128_vm0 = vmor %vm4126_vm15, %vm4127_vm14  ;;  %v4147_v6 = vand.u32 2147483648, %v2370_v28  ;;  %v4145_v10 = vand.u32 2147483647, %v2370_v28 }
 0x4bf   :  { %4417 = vst.msk [vmem:[%s7134_s5 + $0x398] sm:$0xff] %vm4301_vm6, %v4119_v41  ;;  %v4123_v7 = vsub.f32 1.0, %v4122_v55  ;;  %vm4141_vm1 = vweird.f32 %v2370_v28 }
 0x4c0   :  { %v1842_v42 = vpop.f32.mrf.mxu2  ;;  %v4148_v15 = vor.u32 1.1754944e-38, %v4147_v6  ;;  %vm4146_vm7 = vcmp.eq.f32.partialorder %v4145_v10, 8.507059e+37 }
 0x4c1   :  { %v4124_v43 = vmul.f32 %v5307_v52, %v4123_v7  ;;  %v1843_v40 = vadd.f32 %v7045_v0, %v1842_v42 }
 0x4c3   :  { %v5309_v2 = vpop.eup %5308  ;;  %v4125_v47 = vadd.f32 %v5307_v52, %v4124_v43  ;;  %v4810_v3 = vmul.f32 -1.442695, %v1843_v40 }
 0x4c4   :  { %v5311_v46 = vpop.eup %5310  ;;  %v2371_v53 = vadd.f32 1.0, %v5309_v2 }
 0x4c5   :  { %v4129_v1 = vsel %vm4128_vm0, %v5307_v52, %v4125_v47  ;;  %v4137_v4 = vmul.f32 %v5311_v46, %v2370_v28  ;;  %5312 = vpow2.f32 %v4810_v3  ;;  %vm4142_vm4 = vweird.f32 %v5311_v46 }
 0x4c6   :  { %v4134_v11 = vsel %vm4131_vm3, %v4133_v63, %v4129_v1  ;;  %5314 = vrcp.f32 %v2371_v53  ;;  %vm4143_vm5 = vmor %vm4141_vm1, %vm4142_vm4  ;;  %v4160_v29 = vand.u32 2147483647, %v2371_v53  ;;  %v4162_v14 = vand.u32 2147483648, %v2371_v53 }
 0x4c7   :  { %4418 = vst.msk [vmem:[%s7134_s5 + $0x3a0] sm:$0xff] %vm4301_vm6, %v4134_v11  ;;  %v4138_v57 = vsub.f32 1.0, %v4137_v4  ;;  %v1866_v9 = vpop.f32.mrf.mxu3  ;;  %vm4156_vm9 = vweird.f32 %v2371_v53 }
 0x4c8   :  { %v1845_v8 = vpop.f32.mrf.mxu2  ;;  %v1867_v21 = vadd.f32 %v7045_v0, %v1866_v9  ;;  %v4163_v54 = vor.u32 1.1754944e-38, %v4162_v14  ;;  %vm4161_vm2 = vcmp.eq.f32.partialorder %v4160_v29, 8.507059e+37 }
 0x4c9   :  { %v4139_v25 = vmul.f32 %v5311_v46, %v4138_v57  ;;  %v1846_v61 = vadd.f32 %v7045_v0, %v1845_v8 }
 0x4ca   :  { %v4818_v27 = vmul.f32 -1.442695, %v1867_v21 }
 0x4cb   :  { %v5313_v31 = vpop.eup %5312  ;;  %v4140_v62 = vadd.f32 %v5311_v46, %v4139_v25  ;;  %v4811_v13 = vmul.f32 -1.442695, %v1846_v61 }
 0x4cc   :  { %v5315_v5 = vpop.eup %5314  ;;  %v2372_v50 = vadd.f32 1.0, %v5313_v31 }
 0x4cd   :  { %v4144_v16 = vsel %vm4143_vm5, %v5311_v46, %v4140_v62  ;;  %v4152_v60 = vmul.f32 %v5315_v5, %v2371_v53  ;;  %5316 = vpow2.f32 %v4811_v13  ;;  %vm4157_vm8 = vweird.f32 %v5315_v5 }
 0x4ce   :  { %v4149_v17 = vsel %vm4146_vm7, %v4148_v15, %v4144_v16  ;;  %5318 = vrcp.f32 %v2372_v50  ;;  %vm4158_vm10 = vmor %vm4156_vm9, %vm4157_vm8  ;;  %v4177_v32 = vand.u32 2147483648, %v2372_v50  ;;  %v4175_v59 = vand.u32 2147483647, %v2372_v50 }
 0x4cf   :  { %4419 = vst.msk [vmem:[%s7134_s5 + $0x3a8] sm:$0xff] %vm4301_vm6, %v4149_v17  ;;  %v4153_v18 = vsub.f32 1.0, %v4152_v60  ;;  %5320 = vpow2.f32 %v4818_v27  ;;  %vm4171_vm12 = vweird.f32 %v2372_v50 }
 0x4d0   :  { %v1848_v48 = vpop.f32.mrf.mxu2  ;;  %v4178_v51 = vor.u32 1.1754944e-38, %v4177_v32  ;;  %vm4176_vm14 = vcmp.eq.f32.partialorder %v4175_v59, 8.507059e+37 }
 0x4d1   :  { %v4154_v45 = vmul.f32 %v5315_v5, %v4153_v18  ;;  %v1849_v30 = vadd.f32 %v7045_v0, %v1848_v48 }
 0x4d3   :  { %v5317_v33 = vpop.eup %5316  ;;  %v4155_v34 = vadd.f32 %v5315_v5, %v4154_v45  ;;  %v4812_v35 = vmul.f32 -1.442695, %v1849_v30 }
 0x4d4   :  { %v5319_v20 = vpop.eup %5318  ;;  %v2373_v37 = vadd.f32 1.0, %v5317_v33 }
 0x4d5   :  { %v4159_v38 = vsel %vm4158_vm10, %v5315_v5, %v4155_v34  ;;  %v4167_v23 = vmul.f32 %v5319_v20, %v2372_v50  ;;  %5322 = vpow2.f32 %v4812_v35  ;;  %v5321_v26 = vpop.eup %5320  ;;  %vm4172_vm11 = vweird.f32 %v5319_v20 }
 0x4d6   :  { %v4164_v19 = vsel %vm4161_vm2, %v4163_v54, %v4159_v38  ;;  %5324 = vrcp.f32 %v2373_v37  ;;  %v7079_v36 = vadd.f32 1.0, %v5321_v26  ;;  %vm4173_vm13 = vmor %vm4171_vm12, %vm4172_vm11  ;;  %v4192_v43 = vand.u32 2147483648, %v2373_v37 }
 0x4d7   :  { %4420 = vst.msk [vmem:[%s7134_s5 + $0x3b0] sm:$0xff] %vm4301_vm6, %v4164_v19  ;;  %v4168_v39 = vsub.f32 1.0, %v4167_v23  ;;  %v4190_v2 = vand.u32 2147483647, %v2373_v37  ;;  %vm4186_vm0 = vweird.f32 %v2373_v37 }
 0x4d8   :  { %v1851_v24 = vpop.f32.mrf.mxu2  ;;  %5326 = vrcp.f32 %v7079_v36  ;;  %v4193_v11 = vor.u32 1.1754944e-38, %v4192_v43  ;;  %vm4291_vm5 = vweird.f32 %v7079_v36  ;;  %v4297_v5 = vand.u32 2147483648, %v7079_v36 }
 0x4d9   :  { %v4169_v44 = vmul.f32 %v5319_v20, %v4168_v39  ;;  %v1852_v12 = vadd.f32 %v7045_v0, %v1851_v24  ;;  %vm4191_vm4 = vcmp.eq.f32.partialorder %v4190_v2, 8.507059e+37  ;;  %v4295_v60 = vand.u32 2147483647, %v7079_v36 }
 0x4da   :  { %v4298_v45 = vor.u32 1.1754944e-38, %v4297_v5 }
 0x4db   :  { %v5323_v22 = vpop.eup %5322  ;;  %v4170_v52 = vadd.f32 %v5319_v20, %v4169_v44  ;;  %v4813_v49 = vmul.f32 -1.442695, %v1852_v12  ;;  %vm4296_vm11 = vcmp.eq.f32.partialorder %v4295_v60, 8.507059e+37 }
 0x4dc   :  { %v5325_v28 = vpop.eup %5324  ;;  %v2374_v55 = vadd.f32 1.0, %v5323_v22 }
 0x4dd   :  { %v4174_v41 = vsel %vm4173_vm13, %v5319_v20, %v4170_v52  ;;  %v4182_v7 = vmul.f32 %v5325_v28, %v2373_v37  ;;  %5328 = vpow2.f32 %v4813_v49  ;;  %vm4187_vm15 = vweird.f32 %v5325_v28 }
 0x4de   :  { %v4179_v56 = vsel %vm4176_vm14, %v4178_v51, %v4174_v41  ;;  %5330 = vrcp.f32 %v2374_v55  ;;  %v5327_v3 = vpop.eup %5326  ;;  %vm4188_vm3 = vmor %vm4186_vm0, %vm4187_vm15  ;;  %v4205_v61 = vand.u32 2147483647, %v2374_v55  ;;  %v4207_v31 = vand.u32 2147483648, %v2374_v55 }
 0x4df   :  { %4421 = vst.msk [vmem:[%s7134_s5 + $0x3b8] sm:$0xff] %vm4301_vm6, %v4179_v56  ;;  %v4183_v42 = vsub.f32 1.0, %v4182_v7  ;;  %v4287_v1 = vmul.f32 %v5327_v3, %v7079_v36  ;;  %vm4292_vm7 = vweird.f32 %v5327_v3  ;;  %vm4201_vm8 = vweird.f32 %v2374_v55 }
 0x4e0   :  { %v1854_v58 = vpop.f32.mrf.mxu2  ;;  %vm4206_vm10 = vcmp.eq.f32.partialorder %v4205_v61, 8.507059e+37  ;;  %v4208_v14 = vor.u32 1.1754944e-38, %v4207_v31  ;;  %vm4293_vm2 = vmor %vm4291_vm5, %vm4292_vm7 }
 0x4e1   :  { %v4184_v40 = vmul.f32 %v5325_v28, %v4183_v42  ;;  %v1855_v47 = vadd.f32 %v7045_v0, %v1854_v58  ;;  %v4288_v62 = vsub.f32 1.0, %v4287_v1 }
 0x4e3   :  { %v5329_v46 = vpop.eup %5328  ;;  %v4185_v63 = vadd.f32 %v5325_v28, %v4184_v40  ;;  %v4814_v53 = vmul.f32 -1.442695, %v1855_v47  ;;  %v4289_v16 = vmul.f32 %v5327_v3, %v4288_v62 }
 0x4e4   :  { %v5331_v4 = vpop.eup %5330  ;;  %v2375_v57 = vadd.f32 1.0, %v5329_v46 }
 0x4e5   :  { %v4189_v6 = vsel %vm4188_vm3, %v5325_v28, %v4185_v63  ;;  %v4197_v8 = vmul.f32 %v5331_v4, %v2374_v55  ;;  %5332 = vpow2.f32 %v4814_v53  ;;  %vm4202_vm1 = vweird.f32 %v5331_v4 }
 0x4e6   :  { %v4194_v25 = vsel %vm4191_vm4, %v4193_v11, %v4189_v6  ;;  %5334 = vrcp.f32 %v2375_v57  ;;  %vm4203_vm9 = vmor %vm4201_vm8, %vm4202_vm1  ;;  %v4290_v21 = vadd.f32 %v5327_v3, %v4289_v16  ;;  %v4222_v20 = vand.u32 2147483648, %v2375_v57 }
 0x4e7   :  { %4422 = vst.msk [vmem:[%s7134_s5 + $0x3c0] sm:$0xff] %vm4301_vm6, %v4194_v25  ;;  %v4198_v10 = vsub.f32 1.0, %v4197_v8  ;;  %v4220_v23 = vand.u32 2147483647, %v2375_v57  ;;  %vm4216_vm13 = vweird.f32 %v2375_v57 }
 0x4e8   :  { %v1857_v13 = vpop.f32.mrf.mxu2  ;;  %v4294_v35 = vsel %vm4293_vm2, %v5327_v3, %v4290_v21  ;;  %v4223_v44 = vor.u32 1.1754944e-38, %v4222_v20 }
 0x4e9   :  { %v4199_v15 = vmul.f32 %v5331_v4, %v4198_v10  ;;  %v1858_v50 = vadd.f32 %v7045_v0, %v1857_v13  ;;  %v4299_v54 = vsel %vm4296_vm11, %v4298_v45, %v4294_v35  ;;  %vm4221_vm15 = vcmp.eq.f32.partialorder %v4220_v23, 8.507059e+37 }
 0x4ea   :  { %4429 = vst.msk [vmem:[%s7134_s5 + $0x3f8] sm:$0xff] %vm4301_vm6, %v4299_v54 }
 0x4eb   :  { %v5333_v17 = vpop.eup %5332  ;;  %v4200_v9 = vadd.f32 %v5331_v4, %v4199_v15  ;;  %v4815_v18 = vmul.f32 -1.442695, %v1858_v50 }
 0x4ec   :  { %v5335_v29 = vpop.eup %5334  ;;  %v2376_v48 = vadd.f32 1.0, %v5333_v17 }
 0x4ed   :  { %v4204_v30 = vsel %vm4203_vm9, %v5331_v4, %v4200_v9  ;;  %v4212_v27 = vmul.f32 %v5335_v29, %v2375_v57  ;;  %5336 = vpow2.f32 %v4815_v18  ;;  %vm4217_vm12 = vweird.f32 %v5335_v29 }
 0x4ee   :  { %v4209_v33 = vsel %vm4206_vm10, %v4208_v14, %v4204_v30  ;;  %5338 = vrcp.f32 %v2376_v48  ;;  %vm4218_vm14 = vmor %vm4216_vm13, %vm4217_vm12  ;;  %v4237_v49 = vand.u32 2147483648, %v2376_v48  ;;  %v4235_v55 = vand.u32 2147483647, %v2376_v48 }
 0x4ef   :  { %4423 = vst.msk [vmem:[%s7134_s5 + $0x3c8] sm:$0xff] %vm4301_vm6, %v4209_v33  ;;  %v4213_v34 = vsub.f32 1.0, %v4212_v27  ;;  %vm4231_vm3 = vweird.f32 %v2376_v48 }
 0x4f0   :  { %v1860_v37 = vpop.f32.mrf.mxu2  ;;  %v4238_v58 = vor.u32 1.1754944e-38, %v4237_v49  ;;  %vm4236_vm1 = vcmp.eq.f32.partialorder %v4235_v55, 8.507059e+37 }
 0x4f1   :  { %v4214_v38 = vmul.f32 %v5335_v29, %v4213_v34  ;;  %v1861_v19 = vadd.f32 %v7045_v0, %v1860_v37 }
 0x4f3   :  { %v5337_v39 = vpop.eup %5336  ;;  %v4215_v32 = vadd.f32 %v5335_v29, %v4214_v38  ;;  %v4816_v24 = vmul.f32 -1.442695, %v1861_v19 }
 0x4f4   :  { %v5339_v26 = vpop.eup %5338  ;;  %v2377_v59 = vadd.f32 1.0, %v5337_v39 }
 0x4f5   :  { %v4219_v12 = vsel %vm4218_vm14, %v5335_v29, %v4215_v32  ;;  %v4227_v36 = vmul.f32 %v5339_v26, %v2376_v48  ;;  %5340 = vpow2.f32 %v4816_v24  ;;  %vm4232_vm0 = vweird.f32 %v5339_v26 }
 0x4f6   :  { %v4224_v22 = vsel %vm4221_vm15, %v4223_v44, %v4219_v12  ;;  %5342 = vrcp.f32 %v2377_v59  ;;  %vm4233_vm4 = vmor %vm4231_vm3, %vm4232_vm0  ;;  %v4252_v46 = vand.u32 2147483648, %v2377_v59  ;;  %v4250_v53 = vand.u32 2147483647, %v2377_v59 }
 0x4f7   :  { %4424 = vst.msk [vmem:[%s7134_s5 + $0x3d0] sm:$0xff] %vm4301_vm6, %v4224_v22  ;;  %v4228_v52 = vsub.f32 1.0, %v4227_v36  ;;  %vm4246_vm7 = vweird.f32 %v2377_v59 }
 0x4f8   :  { %v1863_v28 = vpop.f32.mrf.mxu2  ;;  %v4253_v57 = vor.u32 1.1754944e-38, %v4252_v46  ;;  %vm4251_vm9 = vcmp.eq.f32.partialorder %v4250_v53, 8.507059e+37 }
 0x4f9   :  { %v4229_v51 = vmul.f32 %v5339_v26, %v4228_v52  ;;  %v1864_v41 = vadd.f32 %v7045_v0, %v1863_v28 }
 0x4fb   :  { %v5341_v7 = vpop.eup %5340  ;;  %v4230_v56 = vadd.f32 %v5339_v26, %v4229_v51  ;;  %v4817_v42 = vmul.f32 -1.442695, %v1864_v41 }
 0x4fc   :  { %v5343_v43 = vpop.eup %5342  ;;  %v2378_v40 = vadd.f32 1.0, %v5341_v7 }
 0x4fd   :  { %v4234_v2 = vsel %vm4233_vm4, %v5339_v26, %v4230_v56  ;;  %v4242_v47 = vmul.f32 %v5343_v43, %v2377_v59  ;;  %5344 = vpow2.f32 %v4817_v42  ;;  %vm4247_vm5 = vweird.f32 %v5343_v43 }
 0x4fe   :  { %v4239_v3 = vsel %vm4236_vm1, %v4238_v58, %v4234_v2  ;;  %5346 = vrcp.f32 %v2378_v40  ;;  %vm4248_vm8 = vmor %vm4246_vm7, %vm4247_vm5  ;;  %v4267_v31 = vand.u32 2147483648, %v2378_v40  ;;  %v4265_v13 = vand.u32 2147483647, %v2378_v40 }
 0x4ff   :  { %4425 = vst.msk [vmem:[%s7134_s5 + $0x3d8] sm:$0xff] %vm4301_vm6, %v4239_v3  ;;  %v4243_v0 = vsub.f32 1.0, %v4242_v47  ;;  %vm4261_vm2 = vweird.f32 %v2378_v40 }
 0x500   :  { %v4268_v50 = vor.u32 1.1754944e-38, %v4267_v31  ;;  %vm4266_vm12 = vcmp.eq.f32.partialorder %v4265_v13, 8.507059e+37 }
 0x501   :  { %v4244_v63 = vmul.f32 %v5343_v43, %v4243_v0 }
 0x503   :  { %v5345_v1 = vpop.eup %5344  ;;  %v4245_v4 = vadd.f32 %v5343_v43, %v4244_v63 }
 0x504   :  { %v5347_v11 = vpop.eup %5346  ;;  %v2379_v6 = vadd.f32 1.0, %v5345_v1 }
 0x505   :  { %v4249_v8 = vsel %vm4248_vm8, %v5343_v43, %v4245_v4  ;;  %v4257_v25 = vmul.f32 %v5347_v11, %v2378_v40  ;;  %vm4262_vm10 = vweird.f32 %v5347_v11 }
 0x506   :  { %v4254_v10 = vsel %vm4251_vm9, %v4253_v57, %v4249_v8  ;;  %5348 = vrcp.f32 %v2379_v6  ;;  %vm4263_vm11 = vmor %vm4261_vm2, %vm4262_vm10  ;;  %v4282_v18 = vand.u32 2147483648, %v2379_v6  ;;  %v4280_v29 = vand.u32 2147483647, %v2379_v6 }
 0x507   :  { %4426 = vst.msk [vmem:[%s7134_s5 + $0x3e0] sm:$0xff] %vm4301_vm6, %v4254_v10  ;;  %v4258_v61 = vsub.f32 1.0, %v4257_v25  ;;  %vm4276_vm14 = vweird.f32 %v2379_v6 }
 0x508   :  { %v4283_v48 = vor.u32 1.1754944e-38, %v4282_v18  ;;  %vm4281_vm0 = vcmp.eq.f32.partialorder %v4280_v29, 8.507059e+37 }
 0x509   :  { %v4259_v62 = vmul.f32 %v5347_v11, %v4258_v61 }
 0x50b   :  { %v4260_v5 = vadd.f32 %v5347_v11, %v4259_v62 }
 0x50c   :  { %v5349_v15 = vpop.eup %5348 }
 0x50d   :  { %v4264_v16 = vsel %vm4263_vm11, %v5347_v11, %v4260_v5  ;;  %v4272_v60 = vmul.f32 %v5349_v15, %v2379_v6  ;;  %vm4277_vm13 = vweird.f32 %v5349_v15 }
 0x50e   :  { %v4269_v17 = vsel %vm4266_vm12, %v4268_v50, %v4264_v16  ;;  %vm4278_vm15 = vmor %vm4276_vm14, %vm4277_vm13 }
 0x50f   :  { %4427 = vst.msk [vmem:[%s7134_s5 + $0x3e8] sm:$0xff] %vm4301_vm6, %v4269_v17  ;;  %v4273_v9 = vsub.f32 1.0, %v4272_v60 }
 0x511   :  { %v4274_v21 = vmul.f32 %v5349_v15, %v4273_v9 }
 0x513   :  { %v4275_v14 = vadd.f32 %v5349_v15, %v4274_v21 }
 0x515   :  { %v4279_v45 = vsel %vm4278_vm15, %v5349_v15, %v4275_v14 }
 0x516   :  { %v4284_v30 = vsel %vm4281_vm0, %v4283_v48, %v4279_v45 }
 0x517   :  { %4428 = vst.msk [vmem:[%s7134_s5 + $0x3f0] sm:$0xff] %vm4301_vm6, %v4284_v30 }

</bundles_post_ra>
